<compile_context>
chip_gen: v7x
topology: tpu7x:2x2x1
jax: 0.10.0
libtpu: 0.0.40
codegen_flags: <defaults>
</compile_context>

<pallas_src>
import functools

import jax
import jax.numpy as jnp
from jax import lax
from jax.experimental import pallas as pl
from jax.experimental.pallas import tpu as pltpu

EPS = 1e-5


# ============================================================================
# Kernels
# ============================================================================
def _conv3x3_accum(phase_refs, w_ref, *, stride, ho, wo, precision):
    """f32 accumulator of a 3x3 / pad=1 conv for ONE image.

    phase_refs holds stride**2 refs: phase[p, q] = padded_input[:, p::s, q::s, :],
    so tap (kh, kw) is the contiguous slice of phase[kh % s, kw % s] starting
    at (kh // s, kw // s).  Nine accumulating MXU matmuls with K = Cin each;
    the [9, Cin, Cout] weight slab is VMEM-resident (constant block index).
    """
    cin, cout = w_ref.shape[1], w_ref.shape[2]
    acc = jnp.zeros((ho * wo, cout), jnp.float32)
    for kh in range(3):
        for kw in range(3):
            p_ref = phase_refs[(kh % stride) * stride + (kw % stride)]
            dh, dw = kh // stride, kw // stride
            tap = p_ref[0, dh:dh + ho, dw:dw + wo, :].reshape(ho * wo, cin)
            acc = acc + jnp.dot(tap, w_ref[kh * 3 + kw],
                                preferred_element_type=jnp.float32,
                                precision=precision)
    return acc


def conv1_bn2_relu_kernel(*args, stride, ho, wo, precision):
    """h2 = relu(scale2 * conv1(h1) + add2); conv1 bias folded into add2."""
    nphase = stride * stride
    phase_refs = args[:nphase]
    w_ref, scale_ref, add_ref, o_ref = args[nphase:]
    acc = _conv3x3_accum(phase_refs, w_ref, stride=stride, ho=ho, wo=wo,
                         precision=precision)
    h2 = jnp.maximum(acc * scale_ref[...] + add_ref[...], 0.0)
    o_ref[...] = h2.reshape(1, ho, wo, w_ref.shape[2]).astype(o_ref.dtype)


def conv2_conv_shortcut_kernel(hp_ref, w_ref, xs_ref, ws_ref, bias_ref, o_ref,
                               *, ho, wo, precision):
    """out = conv2(h2) + x_strided @ Ws + (b2 + bs): 1x1 shortcut fused."""
    acc = _conv3x3_accum((hp_ref,), w_ref, stride=1, ho=ho, wo=wo,
                         precision=precision)
    cin = xs_ref.shape[-1]
    xs = xs_ref[0].reshape(ho * wo, cin)
    acc = acc + jnp.dot(xs, ws_ref[...], preferred_element_type=jnp.float32,
                        precision=precision)
    out = acc + bias_ref[...]
    o_ref[...] = out.reshape(1, ho, wo, w_ref.shape[2]).astype(o_ref.dtype)


def conv2_identity_shortcut_kernel(hp_ref, w_ref, xid_ref, bias_ref, o_ref,
                                   *, ho, wo, precision):
    """out = conv2(h2) + b2 + x: identity shortcut fused (exact f32 add)."""
    acc = _conv3x3_accum((hp_ref,), w_ref, stride=1, ho=ho, wo=wo,
                         precision=precision)
    cout = w_ref.shape[2]
    res = xid_ref[0].astype(jnp.float32).reshape(ho * wo, cout)
    out = acc + bias_ref[...] + res
    o_ref[...] = out.reshape(1, ho, wo, cout).astype(o_ref.dtype)


# ============================================================================
# Launch helpers
# ============================================================================
def _nbytes(shape, dtype):
    size = 1
    for d in shape:
        size *= int(d)
    return size * jnp.dtype(dtype).itemsize


def _vmem_limit(block_bytes):
    # Double-buffered pipeline stages + room for the f32 accumulator and tap
    # temporaries the compiler keeps in VMEM.  For CIFAR WideResNet shapes
    # (<= 640 ch, 32x32) this stays well under v7x's 64 MiB physical VMEM;
    # v5e/v6e (128 MiB) have further headroom.
    need = 2 * int(block_bytes) + (16 << 20)
    return max(32 << 20, min(need, 112 << 20))


def _per_image_call(kernel, operands, n, ho, wo, cout, out_dtype):
    """Launch `kernel` on a 1-D grid over images.

    4-D operands stream one image per grid step; 3-D / 2-D operands (weight
    slabs, BN vectors, biases, the 1x1 shortcut weight) use constant block
    indices so they stay VMEM-resident across the whole image sweep.
    """
    in_specs, block_bytes = [], _nbytes((1, ho, wo, cout), out_dtype)
    for arr in operands:
        if arr.ndim == 4:            # [N, H, W, C]: one image per grid step
            blk = (1,) + tuple(arr.shape[1:])
            in_specs.append(pl.BlockSpec(blk, lambda b: (b, 0, 0, 0)))
        elif arr.ndim == 3:          # [9, Cin, Cout] weight slab: resident
            blk = tuple(arr.shape)
            in_specs.append(pl.BlockSpec(blk, lambda b: (0, 0, 0)))
        else:                        # [1, Cout] vectors / [Cin, Cout] 1x1 w
            blk = tuple(arr.shape)
            in_specs.append(pl.BlockSpec(blk, lambda b: (0, 0)))
        block_bytes += _nbytes(blk, arr.dtype)

    return pl.pallas_call(
        kernel,
        out_shape=jax.ShapeDtypeStruct((n, ho, wo, cout), out_dtype),
        grid=(n,),
        in_specs=in_specs,
        out_specs=pl.BlockSpec((1, ho, wo, cout), lambda b: (b, 0, 0, 0)),
        compiler_params=pltpu.CompilerParams(
            dimension_semantics=("parallel",),      # both v7x TCs get images
            vmem_limit_bytes=_vmem_limit(block_bytes)),
    )(*operands)


# ============================================================================
# Wrapper-side glue (cheap XLA elementwise / layout ops, ~1x activation bytes)
# ============================================================================
def _bn_scale_shift(gamma, beta, mean, var):
    scale = gamma / jnp.sqrt(var + EPS)
    shift = beta - mean * scale
    return scale, shift


def _pad_and_phase_split(h_nhwc, stride):
    """Zero-pad (1 px) an ALREADY-ACTIVATED NHWC tensor and split it into the
    stride**2 sampling phases so every 3x3 tap becomes a contiguous slice.
    Zero padding after activation keeps the conv padding ring exactly zero."""
    hp = jnp.pad(h_nhwc, ((0, 0), (1, 1), (1, 1), (0, 0)))
    if stride == 1:
        return [hp]
    return [hp[:, p::stride, q::stride, :]
            for p in range(stride) for q in range(stride)]


# ============================================================================
# WideBasic forward (eval mode): Dropout = identity, BN uses running stats.
# ============================================================================
def wide_basic_forward(x_nchw, params, stride, compute_dtype=jnp.bfloat16,
                       out_dtype=jnp.float32):
    """NCHW in / NCHW out.  compute_dtype = MXU operand dtype (bf16 for perf,
    f32 for strict numerics); accumulation is always f32."""
    x = jnp.transpose(x_nchw, (0, 2, 3, 1)).astype(jnp.float32)    # -> NHWC
    n, h, w, cin = x.shape
    cout = params["w1"].shape[-1]
    assert h % stride == 0 and w % stride == 0, "spatial dims must divide stride"
    ho, wo = h // stride, w // stride

    strict_f32 = jnp.dtype(compute_dtype) == jnp.dtype(jnp.float32)
    prec = lax.Precision.HIGHEST if strict_f32 else None

    scale1, shift1 = _bn_scale_shift(*params["bn1"])               # [cin]
    scale2, shift2 = _bn_scale_shift(*params["bn2"])               # [cout]

    # (1) h1 = relu(bn1(x)) once per element, BEFORE zero padding; then pad +
    #     stride-phase split (XLA, ~1x activation bytes, no 9x im2col).
    h1 = jnp.maximum(x * scale1 + shift1, 0.0).astype(compute_dtype)
    phases1 = _pad_and_phase_split(h1, stride)

    # (2) h2 = relu(bn2(conv1(h1) + b1)): one fused kernel per image with the
    #     [9, cin, cout] weight slab resident; Dropout (eval) = identity.
    w1 = params["w1"].reshape(9, cin, cout).astype(compute_dtype)
    add2 = (scale2 * params["b1"] + shift2)[None, :]               # folds b1
    k1 = functools.partial(conv1_bn2_relu_kernel, stride=stride,
                           ho=ho, wo=wo, precision=prec)
    h2 = _per_image_call(k1, [*phases1, w1, scale2[None, :], add2],
                         n, ho, wo, cout, compute_dtype)

    # (3) out = conv2(h2) + b2 + shortcut(x); shortcut fused in the same tile.
    hp2 = _pad_and_phase_split(h2, 1)[0]
    w2 = params["w2"].reshape(9, cout, cout).astype(compute_dtype)
    if "ws" in params:
        xs = x[:, ::stride, ::stride, :].astype(compute_dtype)     # 1x1 samples
        ws = params["ws"].reshape(cin, cout).astype(compute_dtype)
        bias = (params["b2"] + params["bs"])[None, :]
        k2 = functools.partial(conv2_conv_shortcut_kernel, ho=ho, wo=wo,
                               precision=prec)
        out = _per_image_call(k2, [hp2, w2, xs, ws, bias],
                              n, ho, wo, cout, out_dtype)
    else:
        assert stride == 1 and cin == cout, "identity shortcut precondition"
        bias = params["b2"][None, :]
        k2 = functools.partial(conv2_identity_shortcut_kernel, ho=ho, wo=wo,
                               precision=prec)
        out = _per_image_call(k2, [hp2, w2, x, bias],
                              n, ho, wo, cout, out_dtype)

    # NCHW interface to match the PyTorch module.
    # TODO(synk): a full-network NHWC pipeline would drop this transpose and
    #             emit bf16 block outputs for the next block's BN1.
    return jnp.transpose(out, (0, 3, 1, 2))


# ============================================================================
# Pure-JAX reference (lax convs, f32, highest precision) and params builder.
# ============================================================================
def wide_basic_reference(x_nchw, params, stride):
    x = jnp.transpose(x_nchw, (0, 2, 3, 1)).astype(jnp.float32)

    def bn(v, g, b, m, var):
        return (v - m) / jnp.sqrt(var + EPS) * g + b

    dn = ("NHWC", "HWIO", "NHWC")
    hi = lax.Precision.HIGHEST
    h1 = jax.nn.relu(bn(x, *params["bn1"]))
    y1 = lax.conv_general_dilated(h1, params["w1"], (stride, stride),
                                  [(1, 1), (1, 1)], dimension_numbers=dn,
                                  precision=hi) + params["b1"]
    h2 = jax.nn.relu(bn(y1, *params["bn2"]))
    y2 = lax.conv_general_dilated(h2, params["w2"], (1, 1),
                                  [(1, 1), (1, 1)], dimension_numbers=dn,
                                  precision=hi) + params["b2"]
    if "ws" in params:
        sc = lax.conv_general_dilated(x, params["ws"], (stride, stride),
                                      [(0, 0), (0, 0)], dimension_numbers=dn,
                                      precision=hi) + params["bs"]
    else:
        sc = x
    return jnp.transpose(y2 + sc, (0, 3, 1, 2))


def make_params(key, cin, cout, stride):
    ks = jax.random.split(key, 12)
    p = {
        # BN params: (gamma, beta, running_mean, running_var) -- eval mode
        "bn1": (jax.random.normal(ks[0], (cin,)) * 0.1 + 1.0,
                jax.random.normal(ks[1], (cin,)) * 0.1,
                jax.random.normal(ks[2], (cin,)) * 0.1,
                jnp.abs(jax.random.normal(ks[3], (cin,))) * 0.5 + 0.5),
        "w1": jax.random.normal(ks[4], (3, 3, cin, cout)) * 0.1,   # HWIO
        "b1": jax.random.normal(ks[5], (cout,)) * 0.1,
        "bn2": (jax.random.normal(ks[6], (cout,)) * 0.1 + 1.0,
                jax.random.normal(ks[7], (cout,)) * 0.1,
                jax.random.normal(ks[8], (cout,)) * 0.1,
                jnp.abs(jax.random.normal(ks[9], (cout,))) * 0.5 + 0.5),
        "w2": jax.random.normal(ks[10], (3, 3, cout, cout)) * 0.1,
        "b2": jax.random.normal(ks[11], (cout,)) * 0.1,
    }
    if cin != cout or stride != 1:
        k1, k2 = jax.random.split(ks[4])
        p["ws"] = jax.random.normal(k1, (1, 1, cin, cout)) * 0.1
        p["bs"] = jax.random.normal(k2, (cout,)) * 0.1
    return jax.tree.map(lambda a: a.astype(jnp.float32), p)


if __name__ == "__main__":
    key = jax.random.PRNGKey(0)
    kx, kp, kx2, kp2 = jax.random.split(key, 4)

    # ---- Config 1: channel-expanding, stride-2 block (conv shortcut path) --
    N, CIN, COUT, H, W, STRIDE = 2, 4, 8, 16, 16, 2
    x = jax.random.normal(kx, (N, CIN, H, W), jnp.float32)         # NCHW
    params = make_params(kp, CIN, COUT, STRIDE)
    ref = wide_basic_reference(x, params, STRIDE)

    # Strict correctness gate: f32 matmul operands.
    fwd_f32 = jax.jit(functools.partial(wide_basic_forward,
                                        compute_dtype=jnp.float32),
                      static_argnums=2)
    out_f32 = jax.block_until_ready(fwd_f32(x, params, STRIDE))
    assert out_f32.shape == ref.shape == (N, COUT, H // STRIDE, W // STRIDE)
    err_f32 = float(jnp.max(jnp.abs(out_f32 - ref)))
    assert err_f32 < 2e-3, err_f32

    # Performance path: bf16 MXU operands, f32 accumulation (loose tolerance
    # reflects bf16 operand rounding only).
    fwd_bf16 = jax.jit(functools.partial(wide_basic_forward,
                                         compute_dtype=jnp.bfloat16),
                       static_argnums=2)
    out_bf16 = jax.block_until_ready(fwd_bf16(x, params, STRIDE))
    assert out_bf16.shape == ref.shape
    assert jnp.allclose(out_bf16, ref, rtol=1e-1, atol=1e-1), (
        float(jnp.max(jnp.abs(out_bf16 - ref))))

    # ---- Config 2: identity-shortcut, stride-1 block ----------------------
    N2, C2, H2 = 2, 8, 8
    x2 = jax.random.normal(kx2, (N2, C2, H2, H2), jnp.float32)
    params2 = make_params(kp2, C2, C2, 1)
    ref2 = wide_basic_reference(x2, params2, 1)
    out2 = jax.block_until_ready(fwd_f32(x2, params2, 1))
    assert out2.shape == ref2.shape == (N2, C2, H2, H2)
    err2 = float(jnp.max(jnp.abs(out2 - ref2)))
    assert err2 < 2e-3, err2

    print("KERNEL_OK")
</pallas_src>

<mosaic_0001>
module attributes {stable_mosaic.version = 11 : i64} {
  func.func @conv1_bn2_relu_kernel(%arg0: i32, %arg1: memref<1x9x9x4xf32, #tpu.memory_space<vmem>>, %arg2: memref<1x9x9x4xf32, #tpu.memory_space<vmem>>, %arg3: memref<1x9x9x4xf32, #tpu.memory_space<vmem>>, %arg4: memref<1x9x9x4xf32, #tpu.memory_space<vmem>>, %arg5: memref<9x4x8xf32, #tpu.memory_space<vmem>>, %arg6: memref<1x8xf32, #tpu.memory_space<vmem>>, %arg7: memref<1x8xf32, #tpu.memory_space<vmem>>, %arg8: memref<1x8x8x8xf32, #tpu.memory_space<vmem>>) attributes {dimension_semantics = [#tpu.dimension_semantics<parallel>], iteration_bounds = array<i64: 2>, scalar_prefetch = 0 : i64, scratch_operands = 0 : i64, tpu.core_type = #tpu.core_type<tc>, window_params = [{transform_indices = @transform_0, window_bounds = array<i64: 1, 9, 9, 4>}, {transform_indices = @transform_1, window_bounds = array<i64: 1, 9, 9, 4>}, {transform_indices = @transform_2, window_bounds = array<i64: 1, 9, 9, 4>}, {transform_indices = @transform_3, window_bounds = array<i64: 1, 9, 9, 4>}, {pipeline_mode = #tpu.pipeline_mode<synchronous>, transform_indices = @transform_4, window_bounds = array<i64: 9, 4, 8>}, {pipeline_mode = #tpu.pipeline_mode<synchronous>, transform_indices = @transform_5, window_bounds = array<i64: 1, 8>}, {pipeline_mode = #tpu.pipeline_mode<synchronous>, transform_indices = @transform_6, window_bounds = array<i64: 1, 8>}, {transform_indices = @transform_7, window_bounds = array<i64: 1, 8, 8, 8>}]} {
    %cst = arith.constant 0.000000e+00 : f32
    %0 = vector.broadcast %cst : f32 to vector<64x8xf32>
    %c0 = arith.constant 0 : index
    %c0_0 = arith.constant 0 : index
    %c0_1 = arith.constant 0 : index
    %c0_2 = arith.constant 0 : index
    %1 = vector.load %arg1[%c0, %c0_0, %c0_1, %c0_2] : memref<1x9x9x4xf32, #tpu.memory_space<vmem>>, vector<1x8x8x4xf32>
    %2 = vector.shape_cast %1 : vector<1x8x8x4xf32> to vector<8x8x4xf32>
    %3 = vector.shape_cast %2 : vector<8x8x4xf32> to vector<64x4xf32>
    %c0_3 = arith.constant 0 : index
    %c0_4 = arith.constant 0 : index
    %c0_5 = arith.constant 0 : index
    %4 = vector.load %arg5[%c0_3, %c0_4, %c0_5] : memref<9x4x8xf32, #tpu.memory_space<vmem>>, vector<1x4x8xf32>
    %5 = vector.shape_cast %4 : vector<1x4x8xf32> to vector<4x8xf32>
    %cst_6 = arith.constant dense<0.000000e+00> : vector<64x8xf32>
    %6 = tpu.matmul %3, %5, %cst_6 {dimension_numbers = #tpu.dot_dimension_numbers<[1], [0], [0], [1], [0, 0, 1, 1], [], []>, precision = #tpu.contract_precision<fp32>} : vector<64x4xf32>, vector<4x8xf32>, vector<64x8xf32> -> vector<64x8xf32>
    %7 = arith.addf %0, %6 : vector<64x8xf32>
    %c0_7 = arith.constant 0 : index
    %c0_8 = arith.constant 0 : index
    %c0_9 = arith.constant 0 : index
    %c0_10 = arith.constant 0 : index
    %8 = vector.load %arg2[%c0_7, %c0_8, %c0_9, %c0_10] : memref<1x9x9x4xf32, #tpu.memory_space<vmem>>, vector<1x8x8x4xf32>
    %9 = vector.shape_cast %8 : vector<1x8x8x4xf32> to vector<8x8x4xf32>
    %10 = vector.shape_cast %9 : vector<8x8x4xf32> to vector<64x4xf32>
    %c1 = arith.constant 1 : index
    %c0_11 = arith.constant 0 : index
    %c0_12 = arith.constant 0 : index
    %11 = vector.load %arg5[%c1, %c0_11, %c0_12] : memref<9x4x8xf32, #tpu.memory_space<vmem>>, vector<1x4x8xf32>
    %12 = vector.shape_cast %11 : vector<1x4x8xf32> to vector<4x8xf32>
    %cst_13 = arith.constant dense<0.000000e+00> : vector<64x8xf32>
    %13 = tpu.matmul %10, %12, %cst_13 {dimension_numbers = #tpu.dot_dimension_numbers<[1], [0], [0], [1], [0, 0, 1, 1], [], []>, precision = #tpu.contract_precision<fp32>} : vector<64x4xf32>, vector<4x8xf32>, vector<64x8xf32> -> vector<64x8xf32>
    %14 = arith.addf %7, %13 : vector<64x8xf32>
    %c0_14 = arith.constant 0 : index
    %c0_15 = arith.constant 0 : index
    %c1_16 = arith.constant 1 : index
    %c0_17 = arith.constant 0 : index
    %15 = vector.load %arg1[%c0_14, %c0_15, %c1_16, %c0_17] : memref<1x9x9x4xf32, #tpu.memory_space<vmem>>, vector<1x8x8x4xf32>
    %16 = vector.shape_cast %15 : vector<1x8x8x4xf32> to vector<8x8x4xf32>
    %17 = vector.shape_cast %16 : vector<8x8x4xf32> to vector<64x4xf32>
    %c2 = arith.constant 2 : index
    %c0_18 = arith.constant 0 : index
    %c0_19 = arith.constant 0 : index
    %18 = vector.load %arg5[%c2, %c0_18, %c0_19] : memref<9x4x8xf32, #tpu.memory_space<vmem>>, vector<1x4x8xf32>
    %19 = vector.shape_cast %18 : vector<1x4x8xf32> to vector<4x8xf32>
    %cst_20 = arith.constant dense<0.000000e+00> : vector<64x8xf32>
    %20 = tpu.matmul %17, %19, %cst_20 {dimension_numbers = #tpu.dot_dimension_numbers<[1], [0], [0], [1], [0, 0, 1, 1], [], []>, precision = #tpu.contract_precision<fp32>} : vector<64x4xf32>, vector<4x8xf32>, vector<64x8xf32> -> vector<64x8xf32>
    %21 = arith.addf %14, %20 : vector<64x8xf32>
    %c0_21 = arith.constant 0 : index
    %c0_22 = arith.constant 0 : index
    %c0_23 = arith.constant 0 : index
    %c0_24 = arith.constant 0 : index
    %22 = vector.load %arg3[%c0_21, %c0_22, %c0_23, %c0_24] : memref<1x9x9x4xf32, #tpu.memory_space<vmem>>, vector<1x8x8x4xf32>
    %23 = vector.shape_cast %22 : vector<1x8x8x4xf32> to vector<8x8x4xf32>
    %24 = vector.shape_cast %23 : vector<8x8x4xf32> to vector<64x4xf32>
    %c3 = arith.constant 3 : index
    %c0_25 = arith.constant 0 : index
    %c0_26 = arith.constant 0 : index
    %25 = vector.load %arg5[%c3, %c0_25, %c0_26] : memref<9x4x8xf32, #tpu.memory_space<vmem>>, vector<1x4x8xf32>
    %26 = vector.shape_cast %25 : vector<1x4x8xf32> to vector<4x8xf32>
    %cst_27 = arith.constant dense<0.000000e+00> : vector<64x8xf32>
    %27 = tpu.matmul %24, %26, %cst_27 {dimension_numbers = #tpu.dot_dimension_numbers<[1], [0], [0], [1], [0, 0, 1, 1], [], []>, precision = #tpu.contract_precision<fp32>} : vector<64x4xf32>, vector<4x8xf32>, vector<64x8xf32> -> vector<64x8xf32>
    %28 = arith.addf %21, %27 : vector<64x8xf32>
    %c0_28 = arith.constant 0 : index
    %c0_29 = arith.constant 0 : index
    %c0_30 = arith.constant 0 : index
    %c0_31 = arith.constant 0 : index
    %29 = vector.load %arg4[%c0_28, %c0_29, %c0_30, %c0_31] : memref<1x9x9x4xf32, #tpu.memory_space<vmem>>, vector<1x8x8x4xf32>
    %30 = vector.shape_cast %29 : vector<1x8x8x4xf32> to vector<8x8x4xf32>
    %31 = vector.shape_cast %30 : vector<8x8x4xf32> to vector<64x4xf32>
    %c4 = arith.constant 4 : index
    %c0_32 = arith.constant 0 : index
    %c0_33 = arith.constant 0 : index
    %32 = vector.load %arg5[%c4, %c0_32, %c0_33] : memref<9x4x8xf32, #tpu.memory_space<vmem>>, vector<1x4x8xf32>
    %33 = vector.shape_cast %32 : vector<1x4x8xf32> to vector<4x8xf32>
    %cst_34 = arith.constant dense<0.000000e+00> : vector<64x8xf32>
    %34 = tpu.matmul %31, %33, %cst_34 {dimension_numbers = #tpu.dot_dimension_numbers<[1], [0], [0], [1], [0, 0, 1, 1], [], []>, precision = #tpu.contract_precision<fp32>} : vector<64x4xf32>, vector<4x8xf32>, vector<64x8xf32> -> vector<64x8xf32>
    %35 = arith.addf %28, %34 : vector<64x8xf32>
    %c0_35 = arith.constant 0 : index
    %c0_36 = arith.constant 0 : index
    %c1_37 = arith.constant 1 : index
    %c0_38 = arith.constant 0 : index
    %36 = vector.load %arg3[%c0_35, %c0_36, %c1_37, %c0_38] : memref<1x9x9x4xf32, #tpu.memory_space<vmem>>, vector<1x8x8x4xf32>
    %37 = vector.shape_cast %36 : vector<1x8x8x4xf32> to vector<8x8x4xf32>
    %38 = vector.shape_cast %37 : vector<8x8x4xf32> to vector<64x4xf32>
    %c5 = arith.constant 5 : index
    %c0_39 = arith.constant 0 : index
    %c0_40 = arith.constant 0 : index
    %39 = vector.load %arg5[%c5, %c0_39, %c0_40] : memref<9x4x8xf32, #tpu.memory_space<vmem>>, vector<1x4x8xf32>
    %40 = vector.shape_cast %39 : vector<1x4x8xf32> to vector<4x8xf32>
    %cst_41 = arith.constant dense<0.000000e+00> : vector<64x8xf32>
    %41 = tpu.matmul %38, %40, %cst_41 {dimension_numbers = #tpu.dot_dimension_numbers<[1], [0], [0], [1], [0, 0, 1, 1], [], []>, precision = #tpu.contract_precision<fp32>} : vector<64x4xf32>, vector<4x8xf32>, vector<64x8xf32> -> vector<64x8xf32>
    %42 = arith.addf %35, %41 : vector<64x8xf32>
    %c0_42 = arith.constant 0 : index
    %c1_43 = arith.constant 1 : index
    %c0_44 = arith.constant 0 : index
    %c0_45 = arith.constant 0 : index
    %43 = vector.load %arg1[%c0_42, %c1_43, %c0_44, %c0_45] : memref<1x9x9x4xf32, #tpu.memory_space<vmem>>, vector<1x8x8x4xf32>
    %44 = vector.shape_cast %43 : vector<1x8x8x4xf32> to vector<8x8x4xf32>
    %45 = vector.shape_cast %44 : vector<8x8x4xf32> to vector<64x4xf32>
    %c6 = arith.constant 6 : index
    %c0_46 = arith.constant 0 : index
    %c0_47 = arith.constant 0 : index
    %46 = vector.load %arg5[%c6, %c0_46, %c0_47] : memref<9x4x8xf32, #tpu.memory_space<vmem>>, vector<1x4x8xf32>
    %47 = vector.shape_cast %46 : vector<1x4x8xf32> to vector<4x8xf32>
    %cst_48 = arith.constant dense<0.000000e+00> : vector<64x8xf32>
    %48 = tpu.matmul %45, %47, %cst_48 {dimension_numbers = #tpu.dot_dimension_numbers<[1], [0], [0], [1], [0, 0, 1, 1], [], []>, precision = #tpu.contract_precision<fp32>} : vector<64x4xf32>, vector<4x8xf32>, vector<64x8xf32> -> vector<64x8xf32>
    %49 = arith.addf %42, %48 : vector<64x8xf32>
    %c0_49 = arith.constant 0 : index
    %c1_50 = arith.constant 1 : index
    %c0_51 = arith.constant 0 : index
    %c0_52 = arith.constant 0 : index
    %50 = vector.load %arg2[%c0_49, %c1_50, %c0_51, %c0_52] : memref<1x9x9x4xf32, #tpu.memory_space<vmem>>, vector<1x8x8x4xf32>
    %51 = vector.shape_cast %50 : vector<1x8x8x4xf32> to vector<8x8x4xf32>
    %52 = vector.shape_cast %51 : vector<8x8x4xf32> to vector<64x4xf32>
    %c7 = arith.constant 7 : index
    %c0_53 = arith.constant 0 : index
    %c0_54 = arith.constant 0 : index
    %53 = vector.load %arg5[%c7, %c0_53, %c0_54] : memref<9x4x8xf32, #tpu.memory_space<vmem>>, vector<1x4x8xf32>
    %54 = vector.shape_cast %53 : vector<1x4x8xf32> to vector<4x8xf32>
    %cst_55 = arith.constant dense<0.000000e+00> : vector<64x8xf32>
    %55 = tpu.matmul %52, %54, %cst_55 {dimension_numbers = #tpu.dot_dimension_numbers<[1], [0], [0], [1], [0, 0, 1, 1], [], []>, precision = #tpu.contract_precision<fp32>} : vector<64x4xf32>, vector<4x8xf32>, vector<64x8xf32> -> vector<64x8xf32>
    %56 = arith.addf %49, %55 : vector<64x8xf32>
    %c0_56 = arith.constant 0 : index
    %c1_57 = arith.constant 1 : index
    %c1_58 = arith.constant 1 : index
    %c0_59 = arith.constant 0 : index
    %57 = vector.load %arg1[%c0_56, %c1_57, %c1_58, %c0_59] : memref<1x9x9x4xf32, #tpu.memory_space<vmem>>, vector<1x8x8x4xf32>
    %58 = vector.shape_cast %57 : vector<1x8x8x4xf32> to vector<8x8x4xf32>
    %59 = vector.shape_cast %58 : vector<8x8x4xf32> to vector<64x4xf32>
    %c8 = arith.constant 8 : index
    %c0_60 = arith.constant 0 : index
    %c0_61 = arith.constant 0 : index
    %60 = vector.load %arg5[%c8, %c0_60, %c0_61] : memref<9x4x8xf32, #tpu.memory_space<vmem>>, vector<1x4x8xf32>
    %61 = vector.shape_cast %60 : vector<1x4x8xf32> to vector<4x8xf32>
    %cst_62 = arith.constant dense<0.000000e+00> : vector<64x8xf32>
    %62 = tpu.matmul %59, %61, %cst_62 {dimension_numbers = #tpu.dot_dimension_numbers<[1], [0], [0], [1], [0, 0, 1, 1], [], []>, precision = #tpu.contract_precision<fp32>} : vector<64x4xf32>, vector<4x8xf32>, vector<64x8xf32> -> vector<64x8xf32>
    %63 = arith.addf %56, %62 : vector<64x8xf32>
    %c0_63 = arith.constant 0 : index
    %c0_64 = arith.constant 0 : index
    %64 = vector.load %arg6[%c0_63, %c0_64] : memref<1x8xf32, #tpu.memory_space<vmem>>, vector<1x8xf32>
    %65 = vector.broadcast %64 : vector<1x8xf32> to vector<64x8xf32>
    %66 = arith.mulf %63, %65 : vector<64x8xf32>
    %c0_65 = arith.constant 0 : index
    %c0_66 = arith.constant 0 : index
    %67 = vector.load %arg7[%c0_65, %c0_66] : memref<1x8xf32, #tpu.memory_space<vmem>>, vector<1x8xf32>
    %68 = vector.broadcast %67 : vector<1x8xf32> to vector<64x8xf32>
    %69 = arith.addf %66, %68 : vector<64x8xf32>
    %cst_67 = arith.constant 0.000000e+00 : f32
    %70 = vector.broadcast %cst_67 : f32 to vector<64x8xf32>
    %71 = arith.maximumf %69, %70 : vector<64x8xf32>
    %72 = vector.shape_cast %71 : vector<64x8xf32> to vector<1x8x8x8xf32>
    %c0_68 = arith.constant 0 : index
    %c0_69 = arith.constant 0 : index
    %c0_70 = arith.constant 0 : index
    %c0_71 = arith.constant 0 : index
    %73 = vector.load %arg8[%c0_68, %c0_69, %c0_70, %c0_71] : memref<1x8x8x8xf32, #tpu.memory_space<vmem>>, vector<1x8x8x8xf32>
    tpu.vector_store %arg8[%c0_68, %c0_69, %c0_70, %c0_71], %72 {strides = array<i32>} : memref<1x8x8x8xf32, #tpu.memory_space<vmem>>, vector<1x8x8x8xf32>,
    return
  }
  func.func @transform_0(%arg0: i32) -> (i32, i32, i32, i32) {
    %c0_i32 = arith.constant 0 : i32
    %c0_i32_0 = arith.constant 0 : i32
    %c0_i32_1 = arith.constant 0 : i32
    %c0_i32_2 = arith.constant 0 : i32
    return %arg0, %c0_i32, %c0_i32_0, %c0_i32_1 : i32, i32, i32, i32
  }
  func.func @transform_1(%arg0: i32) -> (i32, i32, i32, i32) {
    %c0_i32 = arith.constant 0 : i32
    %c0_i32_0 = arith.constant 0 : i32
    %c0_i32_1 = arith.constant 0 : i32
    %c0_i32_2 = arith.constant 0 : i32
    return %arg0, %c0_i32, %c0_i32_0, %c0_i32_1 : i32, i32, i32, i32
  }
  func.func @transform_2(%arg0: i32) -> (i32, i32, i32, i32) {
    %c0_i32 = arith.constant 0 : i32
    %c0_i32_0 = arith.constant 0 : i32
    %c0_i32_1 = arith.constant 0 : i32
    %c0_i32_2 = arith.constant 0 : i32
    return %arg0, %c0_i32, %c0_i32_0, %c0_i32_1 : i32, i32, i32, i32
  }
  func.func @transform_3(%arg0: i32) -> (i32, i32, i32, i32) {
    %c0_i32 = arith.constant 0 : i32
    %c0_i32_0 = arith.constant 0 : i32
    %c0_i32_1 = arith.constant 0 : i32
    %c0_i32_2 = arith.constant 0 : i32
    return %arg0, %c0_i32, %c0_i32_0, %c0_i32_1 : i32, i32, i32, i32
  }
  func.func @transform_4(%arg0: i32) -> (i32, i32, i32) {
    %c0_i32 = arith.constant 0 : i32
    %c0_i32_0 = arith.constant 0 : i32
    %c0_i32_1 = arith.constant 0 : i32
    %c0_i32_2 = arith.constant 0 : i32
    return %c0_i32, %c0_i32_0, %c0_i32_1 : i32, i32, i32
  }
  func.func @transform_5(%arg0: i32) -> (i32, i32) {
    %c0_i32 = arith.constant 0 : i32
    %c0_i32_0 = arith.constant 0 : i32
    %c0_i32_1 = arith.constant 0 : i32
    return %c0_i32, %c0_i32_0 : i32, i32
  }
  func.func @transform_6(%arg0: i32) -> (i32, i32) {
    %c0_i32 = arith.constant 0 : i32
    %c0_i32_0 = arith.constant 0 : i32
    %c0_i32_1 = arith.constant 0 : i32
    return %c0_i32, %c0_i32_0 : i32, i32
  }
  func.func @transform_7(%arg0: i32) -> (i32, i32, i32, i32) {
    %c0_i32 = arith.constant 0 : i32
    %c0_i32_0 = arith.constant 0 : i32
    %c0_i32_1 = arith.constant 0 : i32
    %c0_i32_2 = arith.constant 0 : i32
    return %arg0, %c0_i32, %c0_i32_0, %c0_i32_1 : i32, i32, i32, i32
  }
}

module attributes {stable_mosaic.version = 11 : i64} {
  func.func @conv2_conv_shortcut_kernel(%arg0: i32, %arg1: memref<1x10x10x8xf32, #tpu.memory_space<vmem>>, %arg2: memref<9x8x8xf32, #tpu.memory_space<vmem>>, %arg3: memref<1x8x8x4xf32, #tpu.memory_space<vmem>>, %arg4: memref<4x8xf32, #tpu.memory_space<vmem>>, %arg5: memref<1x8xf32, #tpu.memory_space<vmem>>, %arg6: memref<1x8x8x8xf32, #tpu.memory_space<vmem>>) attributes {dimension_semantics = [#tpu.dimension_semantics<parallel>], iteration_bounds = array<i64: 2>, scalar_prefetch = 0 : i64, scratch_operands = 0 : i64, tpu.core_type = #tpu.core_type<tc>, window_params = [{transform_indices = @transform_0, window_bounds = array<i64: 1, 10, 10, 8>}, {pipeline_mode = #tpu.pipeline_mode<synchronous>, transform_indices = @transform_1, window_bounds = array<i64: 9, 8, 8>}, {transform_indices = @transform_2, window_bounds = array<i64: 1, 8, 8, 4>}, {pipeline_mode = #tpu.pipeline_mode<synchronous>, transform_indices = @transform_3, window_bounds = array<i64: 4, 8>}, {pipeline_mode = #tpu.pipeline_mode<synchronous>, transform_indices = @transform_4, window_bounds = array<i64: 1, 8>}, {transform_indices = @transform_5, window_bounds = array<i64: 1, 8, 8, 8>}]} {
    %cst = arith.constant 0.000000e+00 : f32
    %0 = vector.broadcast %cst : f32 to vector<64x8xf32>
    %c0 = arith.constant 0 : index
    %c0_0 = arith.constant 0 : index
    %c0_1 = arith.constant 0 : index
    %c0_2 = arith.constant 0 : index
    %1 = vector.load %arg1[%c0, %c0_0, %c0_1, %c0_2] : memref<1x10x10x8xf32, #tpu.memory_space<vmem>>, vector<1x8x8x8xf32>
    %2 = vector.shape_cast %1 : vector<1x8x8x8xf32> to vector<8x8x8xf32>
    %3 = vector.shape_cast %2 : vector<8x8x8xf32> to vector<64x8xf32>
    %c0_3 = arith.constant 0 : index
    %c0_4 = arith.constant 0 : index
    %c0_5 = arith.constant 0 : index
    %4 = vector.load %arg2[%c0_3, %c0_4, %c0_5] : memref<9x8x8xf32, #tpu.memory_space<vmem>>, vector<1x8x8xf32>
    %5 = vector.shape_cast %4 : vector<1x8x8xf32> to vector<8x8xf32>
    %cst_6 = arith.constant dense<0.000000e+00> : vector<64x8xf32>
    %6 = tpu.matmul %3, %5, %cst_6 {dimension_numbers = #tpu.dot_dimension_numbers<[1], [0], [0], [1], [0, 0, 1, 1], [], []>, precision = #tpu.contract_precision<fp32>} : vector<64x8xf32>, vector<8x8xf32>, vector<64x8xf32> -> vector<64x8xf32>
    %7 = arith.addf %0, %6 : vector<64x8xf32>
    %c0_7 = arith.constant 0 : index
    %c0_8 = arith.constant 0 : index
    %c1 = arith.constant 1 : index
    %c0_9 = arith.constant 0 : index
    %8 = vector.load %arg1[%c0_7, %c0_8, %c1, %c0_9] : memref<1x10x10x8xf32, #tpu.memory_space<vmem>>, vector<1x8x8x8xf32>
    %9 = vector.shape_cast %8 : vector<1x8x8x8xf32> to vector<8x8x8xf32>
    %10 = vector.shape_cast %9 : vector<8x8x8xf32> to vector<64x8xf32>
    %c1_10 = arith.constant 1 : index
    %c0_11 = arith.constant 0 : index
    %c0_12 = arith.constant 0 : index
    %11 = vector.load %arg2[%c1_10, %c0_11, %c0_12] : memref<9x8x8xf32, #tpu.memory_space<vmem>>, vector<1x8x8xf32>
    %12 = vector.shape_cast %11 : vector<1x8x8xf32> to vector<8x8xf32>
    %cst_13 = arith.constant dense<0.000000e+00> : vector<64x8xf32>
    %13 = tpu.matmul %10, %12, %cst_13 {dimension_numbers = #tpu.dot_dimension_numbers<[1], [0], [0], [1], [0, 0, 1, 1], [], []>, precision = #tpu.contract_precision<fp32>} : vector<64x8xf32>, vector<8x8xf32>, vector<64x8xf32> -> vector<64x8xf32>
    %14 = arith.addf %7, %13 : vector<64x8xf32>
    %c0_14 = arith.constant 0 : index
    %c0_15 = arith.constant 0 : index
    %c2 = arith.constant 2 : index
    %c0_16 = arith.constant 0 : index
    %15 = vector.load %arg1[%c0_14, %c0_15, %c2, %c0_16] : memref<1x10x10x8xf32, #tpu.memory_space<vmem>>, vector<1x8x8x8xf32>
    %16 = vector.shape_cast %15 : vector<1x8x8x8xf32> to vector<8x8x8xf32>
    %17 = vector.shape_cast %16 : vector<8x8x8xf32> to vector<64x8xf32>
    %c2_17 = arith.constant 2 : index
    %c0_18 = arith.constant 0 : index
    %c0_19 = arith.constant 0 : index
    %18 = vector.load %arg2[%c2_17, %c0_18, %c0_19] : memref<9x8x8xf32, #tpu.memory_space<vmem>>, vector<1x8x8xf32>
    %19 = vector.shape_cast %18 : vector<1x8x8xf32> to vector<8x8xf32>
    %cst_20 = arith.constant dense<0.000000e+00> : vector<64x8xf32>
    %20 = tpu.matmul %17, %19, %cst_20 {dimension_numbers = #tpu.dot_dimension_numbers<[1], [0], [0], [1], [0, 0, 1, 1], [], []>, precision = #tpu.contract_precision<fp32>} : vector<64x8xf32>, vector<8x8xf32>, vector<64x8xf32> -> vector<64x8xf32>
    %21 = arith.addf %14, %20 : vector<64x8xf32>
    %c0_21 = arith.constant 0 : index
    %c1_22 = arith.constant 1 : index
    %c0_23 = arith.constant 0 : index
    %c0_24 = arith.constant 0 : index
    %22 = vector.load %arg1[%c0_21, %c1_22, %c0_23, %c0_24] : memref<1x10x10x8xf32, #tpu.memory_space<vmem>>, vector<1x8x8x8xf32>
    %23 = vector.shape_cast %22 : vector<1x8x8x8xf32> to vector<8x8x8xf32>
    %24 = vector.shape_cast %23 : vector<8x8x8xf32> to vector<64x8xf32>
    %c3 = arith.constant 3 : index
    %c0_25 = arith.constant 0 : index
    %c0_26 = arith.constant 0 : index
    %25 = vector.load %arg2[%c3, %c0_25, %c0_26] : memref<9x8x8xf32, #tpu.memory_space<vmem>>, vector<1x8x8xf32>
    %26 = vector.shape_cast %25 : vector<1x8x8xf32> to vector<8x8xf32>
    %cst_27 = arith.constant dense<0.000000e+00> : vector<64x8xf32>
    %27 = tpu.matmul %24, %26, %cst_27 {dimension_numbers = #tpu.dot_dimension_numbers<[1], [0], [0], [1], [0, 0, 1, 1], [], []>, precision = #tpu.contract_precision<fp32>} : vector<64x8xf32>, vector<8x8xf32>, vector<64x8xf32> -> vector<64x8xf32>
    %28 = arith.addf %21, %27 : vector<64x8xf32>
    %c0_28 = arith.constant 0 : index
    %c1_29 = arith.constant 1 : index
    %c1_30 = arith.constant 1 : index
    %c0_31 = arith.constant 0 : index
    %29 = vector.load %arg1[%c0_28, %c1_29, %c1_30, %c0_31] : memref<1x10x10x8xf32, #tpu.memory_space<vmem>>, vector<1x8x8x8xf32>
    %30 = vector.shape_cast %29 : vector<1x8x8x8xf32> to vector<8x8x8xf32>
    %31 = vector.shape_cast %30 : vector<8x8x8xf32> to vector<64x8xf32>
    %c4 = arith.constant 4 : index
    %c0_32 = arith.constant 0 : index
    %c0_33 = arith.constant 0 : index
    %32 = vector.load %arg2[%c4, %c0_32, %c0_33] : memref<9x8x8xf32, #tpu.memory_space<vmem>>, vector<1x8x8xf32>
    %33 = vector.shape_cast %32 : vector<1x8x8xf32> to vector<8x8xf32>
    %cst_34 = arith.constant dense<0.000000e+00> : vector<64x8xf32>
    %34 = tpu.matmul %31, %33, %cst_34 {dimension_numbers = #tpu.dot_dimension_numbers<[1], [0], [0], [1], [0, 0, 1, 1], [], []>, precision = #tpu.contract_precision<fp32>} : vector<64x8xf32>, vector<8x8xf32>, vector<64x8xf32> -> vector<64x8xf32>
    %35 = arith.addf %28, %34 : vector<64x8xf32>
    %c0_35 = arith.constant 0 : index
    %c1_36 = arith.constant 1 : index
    %c2_37 = arith.constant 2 : index
    %c0_38 = arith.constant 0 : index
    %36 = vector.load %arg1[%c0_35, %c1_36, %c2_37, %c0_38] : memref<1x10x10x8xf32, #tpu.memory_space<vmem>>, vector<1x8x8x8xf32>
    %37 = vector.shape_cast %36 : vector<1x8x8x8xf32> to vector<8x8x8xf32>
    %38 = vector.shape_cast %37 : vector<8x8x8xf32> to vector<64x8xf32>
    %c5 = arith.constant 5 : index
    %c0_39 = arith.constant 0 : index
    %c0_40 = arith.constant 0 : index
    %39 = vector.load %arg2[%c5, %c0_39, %c0_40] : memref<9x8x8xf32, #tpu.memory_space<vmem>>, vector<1x8x8xf32>
    %40 = vector.shape_cast %39 : vector<1x8x8xf32> to vector<8x8xf32>
    %cst_41 = arith.constant dense<0.000000e+00> : vector<64x8xf32>
    %41 = tpu.matmul %38, %40, %cst_41 {dimension_numbers = #tpu.dot_dimension_numbers<[1], [0], [0], [1], [0, 0, 1, 1], [], []>, precision = #tpu.contract_precision<fp32>} : vector<64x8xf32>, vector<8x8xf32>, vector<64x8xf32> -> vector<64x8xf32>
    %42 = arith.addf %35, %41 : vector<64x8xf32>
    %c0_42 = arith.constant 0 : index
    %c2_43 = arith.constant 2 : index
    %c0_44 = arith.constant 0 : index
    %c0_45 = arith.constant 0 : index
    %43 = vector.load %arg1[%c0_42, %c2_43, %c0_44, %c0_45] : memref<1x10x10x8xf32, #tpu.memory_space<vmem>>, vector<1x8x8x8xf32>
    %44 = vector.shape_cast %43 : vector<1x8x8x8xf32> to vector<8x8x8xf32>
    %45 = vector.shape_cast %44 : vector<8x8x8xf32> to vector<64x8xf32>
    %c6 = arith.constant 6 : index
    %c0_46 = arith.constant 0 : index
    %c0_47 = arith.constant 0 : index
    %46 = vector.load %arg2[%c6, %c0_46, %c0_47] : memref<9x8x8xf32, #tpu.memory_space<vmem>>, vector<1x8x8xf32>
    %47 = vector.shape_cast %46 : vector<1x8x8xf32> to vector<8x8xf32>
    %cst_48 = arith.constant dense<0.000000e+00> : vector<64x8xf32>
    %48 = tpu.matmul %45, %47, %cst_48 {dimension_numbers = #tpu.dot_dimension_numbers<[1], [0], [0], [1], [0, 0, 1, 1], [], []>, precision = #tpu.contract_precision<fp32>} : vector<64x8xf32>, vector<8x8xf32>, vector<64x8xf32> -> vector<64x8xf32>
    %49 = arith.addf %42, %48 : vector<64x8xf32>
    %c0_49 = arith.constant 0 : index
    %c2_50 = arith.constant 2 : index
    %c1_51 = arith.constant 1 : index
    %c0_52 = arith.constant 0 : index
    %50 = vector.load %arg1[%c0_49, %c2_50, %c1_51, %c0_52] : memref<1x10x10x8xf32, #tpu.memory_space<vmem>>, vector<1x8x8x8xf32>
    %51 = vector.shape_cast %50 : vector<1x8x8x8xf32> to vector<8x8x8xf32>
    %52 = vector.shape_cast %51 : vector<8x8x8xf32> to vector<64x8xf32>
    %c7 = arith.constant 7 : index
    %c0_53 = arith.constant 0 : index
    %c0_54 = arith.constant 0 : index
    %53 = vector.load %arg2[%c7, %c0_53, %c0_54] : memref<9x8x8xf32, #tpu.memory_space<vmem>>, vector<1x8x8xf32>
    %54 = vector.shape_cast %53 : vector<1x8x8xf32> to vector<8x8xf32>
    %cst_55 = arith.constant dense<0.000000e+00> : vector<64x8xf32>
    %55 = tpu.matmul %52, %54, %cst_55 {dimension_numbers = #tpu.dot_dimension_numbers<[1], [0], [0], [1], [0, 0, 1, 1], [], []>, precision = #tpu.contract_precision<fp32>} : vector<64x8xf32>, vector<8x8xf32>, vector<64x8xf32> -> vector<64x8xf32>
    %56 = arith.addf %49, %55 : vector<64x8xf32>
    %c0_56 = arith.constant 0 : index
    %c2_57 = arith.constant 2 : index
    %c2_58 = arith.constant 2 : index
    %c0_59 = arith.constant 0 : index
    %57 = vector.load %arg1[%c0_56, %c2_57, %c2_58, %c0_59] : memref<1x10x10x8xf32, #tpu.memory_space<vmem>>, vector<1x8x8x8xf32>
    %58 = vector.shape_cast %57 : vector<1x8x8x8xf32> to vector<8x8x8xf32>
    %59 = vector.shape_cast %58 : vector<8x8x8xf32> to vector<64x8xf32>
    %c8 = arith.constant 8 : index
    %c0_60 = arith.constant 0 : index
    %c0_61 = arith.constant 0 : index
    %60 = vector.load %arg2[%c8, %c0_60, %c0_61] : memref<9x8x8xf32, #tpu.memory_space<vmem>>, vector<1x8x8xf32>
    %61 = vector.shape_cast %60 : vector<1x8x8xf32> to vector<8x8xf32>
    %cst_62 = arith.constant dense<0.000000e+00> : vector<64x8xf32>
    %62 = tpu.matmul %59, %61, %cst_62 {dimension_numbers = #tpu.dot_dimension_numbers<[1], [0], [0], [1], [0, 0, 1, 1], [], []>, precision = #tpu.contract_precision<fp32>} : vector<64x8xf32>, vector<8x8xf32>, vector<64x8xf32> -> vector<64x8xf32>
    %63 = arith.addf %56, %62 : vector<64x8xf32>
    %c0_63 = arith.constant 0 : index
    %c0_64 = arith.constant 0 : index
    %c0_65 = arith.constant 0 : index
    %c0_66 = arith.constant 0 : index
    %64 = vector.load %arg3[%c0_63, %c0_64, %c0_65, %c0_66] : memref<1x8x8x4xf32, #tpu.memory_space<vmem>>, vector<1x8x8x4xf32>
    %65 = vector.shape_cast %64 : vector<1x8x8x4xf32> to vector<8x8x4xf32>
    %66 = vector.shape_cast %65 : vector<8x8x4xf32> to vector<64x4xf32>
    %c0_67 = arith.constant 0 : index
    %c0_68 = arith.constant 0 : index
    %67 = vector.load %arg4[%c0_67, %c0_68] : memref<4x8xf32, #tpu.memory_space<vmem>>, vector<4x8xf32>
    %cst_69 = arith.constant dense<0.000000e+00> : vector<64x8xf32>
    %68 = tpu.matmul %66, %67, %cst_69 {dimension_numbers = #tpu.dot_dimension_numbers<[1], [0], [0], [1], [0, 0, 1, 1], [], []>, precision = #tpu.contract_precision<fp32>} : vector<64x4xf32>, vector<4x8xf32>, vector<64x8xf32> -> vector<64x8xf32>
    %69 = arith.addf %63, %68 : vector<64x8xf32>
    %c0_70 = arith.constant 0 : index
    %c0_71 = arith.constant 0 : index
    %70 = vector.load %arg5[%c0_70, %c0_71] : memref<1x8xf32, #tpu.memory_space<vmem>>, vector<1x8xf32>
    %71 = vector.broadcast %70 : vector<1x8xf32> to vector<64x8xf32>
    %72 = arith.addf %69, %71 : vector<64x8xf32>
    %73 = vector.shape_cast %72 : vector<64x8xf32> to vector<1x8x8x8xf32>
    %c0_72 = arith.constant 0 : index
    %c0_73 = arith.constant 0 : index
    %c0_74 = arith.constant 0 : index
    %c0_75 = arith.constant 0 : index
    %74 = vector.load %arg6[%c0_72, %c0_73, %c0_74, %c0_75] : memref<1x8x8x8xf32, #tpu.memory_space<vmem>>, vector<1x8x8x8xf32>
    tpu.vector_store %arg6[%c0_72, %c0_73, %c0_74, %c0_75], %73 {strides = array<i32>} : memref<1x8x8x8xf32, #tpu.memory_space<vmem>>, vector<1x8x8x8xf32>,
    return
  }
  func.func @transform_0(%arg0: i32) -> (i32, i32, i32, i32) {
    %c0_i32 = arith.constant 0 : i32
    %c0_i32_0 = arith.constant 0 : i32
    %c0_i32_1 = arith.constant 0 : i32
    %c0_i32_2 = arith.constant 0 : i32
    return %arg0, %c0_i32, %c0_i32_0, %c0_i32_1 : i32, i32, i32, i32
  }
  func.func @transform_1(%arg0: i32) -> (i32, i32, i32) {
    %c0_i32 = arith.constant 0 : i32
    %c0_i32_0 = arith.constant 0 : i32
    %c0_i32_1 = arith.constant 0 : i32
    %c0_i32_2 = arith.constant 0 : i32
    return %c0_i32, %c0_i32_0, %c0_i32_1 : i32, i32, i32
  }
  func.func @transform_2(%arg0: i32) -> (i32, i32, i32, i32) {
    %c0_i32 = arith.constant 0 : i32
    %c0_i32_0 = arith.constant 0 : i32
    %c0_i32_1 = arith.constant 0 : i32
    %c0_i32_2 = arith.constant 0 : i32
    return %arg0, %c0_i32, %c0_i32_0, %c0_i32_1 : i32, i32, i32, i32
  }
  func.func @transform_3(%arg0: i32) -> (i32, i32) {
    %c0_i32 = arith.constant 0 : i32
    %c0_i32_0 = arith.constant 0 : i32
    %c0_i32_1 = arith.constant 0 : i32
    return %c0_i32, %c0_i32_0 : i32, i32
  }
  func.func @transform_4(%arg0: i32) -> (i32, i32) {
    %c0_i32 = arith.constant 0 : i32
    %c0_i32_0 = arith.constant 0 : i32
    %c0_i32_1 = arith.constant 0 : i32
    return %c0_i32, %c0_i32_0 : i32, i32
  }
  func.func @transform_5(%arg0: i32) -> (i32, i32, i32, i32) {
    %c0_i32 = arith.constant 0 : i32
    %c0_i32_0 = arith.constant 0 : i32
    %c0_i32_1 = arith.constant 0 : i32
    %c0_i32_2 = arith.constant 0 : i32
    return %arg0, %c0_i32, %c0_i32_0, %c0_i32_1 : i32, i32, i32, i32
  }
}

</mosaic_0001>

<bundles_post_ra>
// kernel: wide_basic_forward.2
= control target key start
LH: loop header
LB: loop body
LE: loop exit
PB: predicated region body
PF: predicated region fallthrough
CT: control target
= control target key end

     0   :  { %s9363_s24 = smov 0   ;;  %s10759_s0 = inlined_call_operand.vmem [shape: f32[2,9,9,4], index: 0, kind: input, shape index: {}]   ;;  %s10760_s1 = inlined_call_operand.vmem [shape: f32[2,9,9,4], index: 1, kind: input, shape index: {}]   ;;  %s10761_s2 = inlined_call_operand.vmem [shape: f32[2,9,9,4], index: 2, kind: input, shape index: {}]   ;;  %s10762_s3 = inlined_call_operand.vmem [shape: f32[2,9,9,4], index: 3, kind: input, shape index: {}]   ;;  %s10763_s4 = inlined_call_operand.vmem [shape: f32[9,4,8], index: 4, kind: input, shape index: {}]   ;;  %s10764_s5 = inlined_call_operand.vmem [shape: f32[1,8], index: 5, kind: input, shape index: {}]   ;;  %s10765_s6 = inlined_call_operand.vmem [shape: f32[1,8], index: 6, kind: input, shape index: {}]   ;;  %s10766_s7 = inlined_call_operand.vmem [shape: f32[2,8,8,8], index: 7, kind: output, shape index: {}]  }
   0x1 LB: > { %s7592_s25 = sadd.s32 4294967295, %s9321_s24   ;;  %p7596_p0 = scmp.ge.s32.totalorder %s9321_s24, 1  ;;  %s9321_s24 = sphi %s9363_s24, %s17_s24  }
   0x2   : > { %p267_p1 = scmp.lt.s32.totalorder %s9321_s24, 3 }
   0x4   : > { %p268_p2 = pnand %p7596_p0, %p267_p1 }
   0x6   : > { %271 = sbr.rel (%p268_p2) target bundleno = 686 (0x2ae), region = 48 }
   0xd   : > { %vm383_vm0 = vcmask 1043456   ;;  %v7606_v0 = vld [vmem:[%s10763_s4 + $0x10] sm:$0xf]  ;;  %p314_p3 = scmp.lt.s32.totalorder %s7592_s25, 1  ;;  %v7603_v2 = vld [vmem:[%s10763_s4 + $0x4] sm:$0xf] }
   0xe   : > { %v3527_v1 = vsel %vm383_vm0, %v7606_v0, 0  ;;  %v385_v4 = vsel %vm383_vm0, %v7603_v2, 0  ;;  %vm358_vm1 = vcmask 31744   ;;  %vm7492_vm2 = vcmask 64512  }
   0xf   : > { %v9378_v3 = vand.u32 4294901760, %v3527_v1  ;;  %s10945_s25 = smov (!%p314_p3, %s7592_s25), 1  ;;  %v9383_v5 = vand.u32 4294901760, %v385_v4 }
  0x10   : > { %s9387_s30 = smul.u32 144, %s10945_s25  ;;  %s7639_s17 = sshll.u32 %s10945_s25, 6 }
  0x11   : > { %8504 = vmatprep.subr.mxu0 %v9378_v3  ;;  %v9390_v6 = vsub.f32 %v3527_v1, %v9378_v3  ;;  %8126 = vmatprep.subr.mxu1 %v9383_v5  ;;  %v9395_v7 = vsub.f32 %v385_v4, %v9383_v5  ;;  %s10738_s20 = scalar_lea.vmem %s10766_s7, %s7639_s17 }
  0x12   : > { %8505 = vmatpush3.msra.mxu0 %v9378_v3  ;;  %s9401_s10 = scalar_lea.vmem %s10760_s1, %s9387_s30  ;;  %8127 = vmatpush3.msra.mxu1 %v9383_v5  ;;  %s9411_s13 = scalar_lea.vmem %s10762_s3, %s9387_s30 }
  0x13   : > { %10840 = vst [vmem:[#allocation2_spill] sm:$0xff] %v9390_v6  ;;  %v9405_v8 = vand.u32 4294901760, %v9390_v6  ;;  %v348_v9 = vld [vmem:[%s9401_s10] sm:$0xff]  ;;  %v9415_v10 = vand.u32 4294901760, %v9395_v7  ;;  %v349_v11 = vld [vmem:[%s9401_s10 + $0x10] sm:$0xff]  ;;  %s9601_s18 = scalar_lea.vmem %s10761_s2, %s9387_s30  ;;  %s9773_s23 = scalar_lea.vmem %s10759_s0, %s9387_s30 }
  0x14   : > { %v350_v12 = vld [vmem:[%s9401_s10 + $0x20] sm:$0xff]  ;;  %v3493_v14 = vld [vmem:[%s9411_s13 + $0x10] sm:$0xff]  ;;  %v360_v15 = vsel %vm358_vm1, %v348_v9, 0  ;;  %v363_v17 = vsel %vm358_vm1, %v349_v11, 0 }
  0x15   : > { %10841 = vst [vmem:[#allocation3_spill] sm:$0xff] %v9405_v8  ;;  %v3492_v13 = vld [vmem:[%s9411_s13] sm:$0xff]  ;;  %8518 = vmatprep.subr.mxu0 %v9405_v8  ;;  %v366_v18 = vsel %vm358_vm1, %v350_v12, 0  ;;  %v3506_v20 = vsel %vm358_vm1, %v3493_v14, 0  ;;  %v9428_v21 = vand.u32 4294901760, %v360_v15  ;;  %v537_v22 = vsub.f32 %v9395_v7, %v9415_v10  ;;  %v3495_v23 = vld [vmem:[%s9411_s13 + $0x30] sm:$0xff] }
  0x16   : > { %v3494_v16 = vld [vmem:[%s9411_s13 + $0x20] sm:$0xff]  ;;  %v3503_v19 = vsel %vm358_vm1, %v3492_v13, 0  ;;  %v9435_v25 = vand.u32 4294901760, %v3506_v20  ;;  %v9438_v27 = vand.u32 4294901760, %v363_v17  ;;  %v3512_v32 = vsel %vm358_vm1, %v3495_v23, 0  ;;  %v351_v45 = vld [vmem:[%s9401_s10 + $0x30] sm:$0xff] }
  0x17   : > { %v9433_v24 = vand.u32 4294901760, %v3503_v19  ;;  %v3509_v26 = vsel %vm358_vm1, %v3494_v16, 0  ;;  %v3496_v28 = vld [vmem:[%s9411_s13 + $0x40] sm:$0xff]  ;;  %v9442_v29 = vsub.f32 %v360_v15, %v9428_v21  ;;  %v538_v30 = vand.u32 4294901760, %v537_v22  ;;  %v3497_v50 = vld [vmem:[%s9411_s13 + $0x50] sm:$0xff] }
  0x18   : > { %10843 = vst [vmem:[#allocation5_spill] sm:$0xff] %v9435_v25  ;;  %v9444_v31 = vand.u32 4294901760, %v3509_v26  ;;  %v9451_v34 = vsub.f32 %v3506_v20, %v9435_v25  ;;  %v9454_v35 = vsub.f32 %v363_v17, %v9438_v27  ;;  %v9456_v36 = vand.u32 4294901760, %v3512_v32  ;;  %v352_v53 = vld [vmem:[%s9401_s10 + $0x40] sm:$0xff]  ;;  %v353_v59 = vld [vmem:[%s9401_s10 + $0x50] sm:$0xff] }
  0x19   : > { %10842 = vst [vmem:[#allocation4_spill] sm:$0xff] %v9433_v24  ;;  %v9448_v33 = vsub.f32 %v3503_v19, %v9433_v24  ;;  %v10783_v37 = vand.u32 4294901760, %v9442_v29  ;;  %8140 = vmatprep.subr.mxu1 %v538_v30  ;;  %v9462_v39 = vand.u32 4294901760, %v366_v18  ;;  %v3515_v40 = vsel %vm358_vm1, %v3496_v28, 0  ;;  %v3498_v58 = vld [vmem:[%s9411_s13 + $0x60] sm:$0xff]  ;;  %v3499_v4 = vld [vmem:[%s9411_s13 + $0x70] sm:$0xff] }
  0x1a   : > { %10844 = vst [vmem:[#allocation6_spill] sm:$0xff] %v9444_v31  ;;  %10846 = vst [vmem:[#allocation8_spill] sm:$0xff] %v9451_v34  ;;  %v9460_v38 = vsub.f32 %v3509_v26, %v9444_v31  ;;  %v10773_v42 = vand.u32 4294901760, %v9451_v34  ;;  %v10781_v43 = vand.u32 4294901760, %v9454_v35  ;;  %v9469_v44 = vsub.f32 %v3512_v32, %v9456_v36  ;;  %v354_v9 = vld [vmem:[%s9401_s10 + $0x60] sm:$0xff]  ;;  %v355_v19 = vld [vmem:[%s9401_s10 + $0x70] sm:$0xff] }
  0x1b   : > { %10845 = vst [vmem:[#allocation7_spill] sm:$0xff] %v9448_v33  ;;  %10847 = vst [vmem:[#allocation9_spill] sm:$0xff] %v9456_v36  ;;  %v10774_v41 = vand.u32 4294901760, %v9448_v33  ;;  %v456_v46 = vsub.f32 %v9442_v29, %v10783_v37  ;;  %v9477_v48 = vsub.f32 %v366_v18, %v9462_v39  ;;  %v9479_v49 = vand.u32 4294901760, %v3515_v40 }
  0x1c   : > { %10848 = vst [vmem:[#allocation10_spill] sm:$0xff] %v9460_v38  ;;  %10849 = vst [vmem:[#allocation11_spill] sm:$0xff] %v9469_v44  ;;  %v10772_v47 = vand.u32 4294901760, %v9460_v38  ;;  %v466_v51 = vsub.f32 %v9454_v35, %v10781_v43  ;;  %v10771_v52 = vand.u32 4294901760, %v9469_v44  ;;  %v369_v57 = vsel %vm358_vm1, %v351_v45, 0  ;;  %v7623_v44 = vld [vmem:[%s9401_s10 + $0x70] sm:$0xff] }
  0x1d   : > { %10850 = vst [vmem:[#allocation12_spill] sm:$0xff] %v9479_v49  ;;  %8506 = vmatprep.mubr.f32.mxu0 %v10774_v41  ;;  %v457_v54 = vand.u32 4294901760, %v456_v46  ;;  %v10780_v55 = vand.u32 4294901760, %v9477_v48  ;;  %v9493_v56 = vsub.f32 %v3515_v40, %v9479_v49  ;;  %v9501_v61 = vand.u32 4294901760, %v369_v57 }
  0x1e   : > { %8507 = vmatmul.mubr.f32.vlgmr.msra.gmra.mrb[0].mxu0 %v10773_v42  ;;  %v467_v60 = vand.u32 4294901760, %v466_v51  ;;  %v3518_v62 = vsel %vm358_vm1, %v3497_v50, 0  ;;  %v372_v2 = vsel %vm358_vm1, %v352_v53, 0  ;;  %v3521_v13 = vsel %vm358_vm1, %v3498_v58, 0  ;;  %v4290_v42 = vld [vmem:[%s9601_s18 + $0x61] sm:$0xff] }
  0x1f   : > { %10851 = vst [vmem:[#allocation13_spill] sm:$0xff] %v9493_v56  ;;  %8509 = vmatprep.mubr.f32.mxu0 %v10772_v47  ;;  %8519 = vmatpush3.msra.mxu0 %v9405_v8  ;;  %v476_v63 = vsub.f32 %v9477_v48, %v10780_v55  ;;  %v10770_v0 = vand.u32 4294901760, %v9493_v56  ;;  %v9508_v1 = vand.u32 4294901760, %v3518_v62  ;;  %v9515_v11 = vsub.f32 %v369_v57, %v9501_v61  ;;  %v4289_v47 = vld [vmem:[%s9601_s18 + $0x51] sm:$0xff]  ;;  %v7622_v56 = vld [vmem:[%s9401_s10 + $0x60] sm:$0xff] }
  0x20   : > { %8128 = vmatprep.mubr.f32.mxu1 %v457_v54  ;;  %8532 = vmatprep.subr.mxu0 %v9378_v3  ;;  %v9517_v12 = vand.u32 4294901760, %v372_v2  ;;  %v375_v14 = vsel %vm358_vm1, %v353_v59, 0  ;;  %v9526_v17 = vand.u32 4294901760, %v3521_v13  ;;  %v3524_v23 = vsel %vm358_vm1, %v3499_v4, 0 }
  0x21   : > { %10852 = vst [vmem:[#allocation14_spill] sm:$0xff] %v9508_v1  ;;  %8129 = vmatmul.mubr.f32.vlgmr.msra.gmra.mrb[0].mxu1 %v467_v60  ;;  %v477_v15 = vand.u32 4294901760, %v476_v63  ;;  %v9524_v16 = vsub.f32 %v3518_v62, %v9508_v1  ;;  %v9528_v18 = vand.u32 4294901760, %v375_v14  ;;  %v10779_v20 = vand.u32 4294901760, %v9515_v11  ;;  %v7607_v63 = vld [vmem:[%s10763_s4 + $0x14] sm:$0xf] }
  0x22   : > { %8141 = vmatpush3.msra.mxu1 %v538_v30  ;;  %8510 = vmatmul.mubr.f32.gmra.mrb[2].mxu0 %v10771_v52  ;;  %10854 = vst [vmem:[#allocation16_spill] sm:$0xff] %v9526_v17  ;;  %v9535_v22 = vsub.f32 %v372_v2, %v9517_v12  ;;  %v378_v26 = vsel %vm358_vm1, %v354_v9, 0  ;;  %v9542_v30 = vsub.f32 %v3521_v13, %v9526_v17  ;;  %v9547_v40 = vand.u32 4294901760, %v3524_v23 }
  0x23   : > { %10853 = vst [vmem:[#allocation15_spill] sm:$0xff] %v9524_v16  ;;  %8512 = vmatprep.mubr.f32.mxu0 %v10770_v0  ;;  %8154 = vmatprep.subr.mxu1 %v9395_v7  ;;  %v10769_v28 = vand.u32 4294901760, %v9524_v16  ;;  %v9545_v32 = vsub.f32 %v375_v14, %v9528_v18  ;;  %v486_v45 = vsub.f32 %v9515_v11, %v10779_v20  ;;  %v9553_v50 = vand.u32 4294901760, %v378_v26 }
  0x24   : > { %8131 = vmatprep.mubr.f32.mxu1 %v477_v15  ;;  %10855 = vst [vmem:[#allocation17_spill] sm:$0xff] %v9542_v30  ;;  %10856 = vst [vmem:[#allocation18_spill] sm:$0xff] %v9547_v40  ;;  %v10778_v46 = vand.u32 4294901760, %v9535_v22  ;;  %v381_v51 = vsel %vm358_vm1, %v355_v19, 0  ;;  %v10768_v53 = vand.u32 4294901760, %v9542_v30  ;;  %v9561_v57 = vsub.f32 %v3524_v23, %v9547_v40 }
  0x25   : > { %v10777_v54 = vand.u32 4294901760, %v9545_v32  ;;  %v9563_v58 = vand.u32 4294901760, %v381_v51  ;;  %v487_v59 = vand.u32 4294901760, %v486_v45  ;;  %v9569_v62 = vsub.f32 %v378_v26, %v9553_v50 }
  0x26   : > { %8513 = vmatmul.mubr.f32.gmra.mrb[4].mxu0 %v10769_v28  ;;  %10857 = vst [vmem:[#allocation19_spill] sm:$0xff] %v9561_v57  ;;  %v496_v60 = vsub.f32 %v9535_v22, %v10778_v46  ;;  %v10767_v4 = vand.u32 4294901760, %v9561_v57  ;;  %v4319_v23 = vsel %vm383_vm0, %v7607_v63, 0  ;;  %v4284_v63 = vld [vmem:[%s9601_s18 + $0x1] sm:$0xff] }
  0x27   : > { %8515 = vmatprep.mubr.f32.mxu0 %v10768_v53  ;;  %v506_v2 = vsub.f32 %v9545_v32, %v10777_v54  ;;  %v9581_v9 = vsub.f32 %v381_v51, %v9563_v58  ;;  %8132 = vmatmul.mubr.f32.gmra.mrb[2].mxu1 %v487_v59  ;;  %v10776_v14 = vand.u32 4294901760, %v9569_v62  ;;  %v9595_v59 = vand.u32 4294901760, %v4319_v23 }
  0x28   : > { %v497_v13 = vand.u32 4294901760, %v496_v60 }
  0x29   : > { %v507_v15 = vand.u32 4294901760, %v506_v2  ;;  %v10775_v19 = vand.u32 4294901760, %v9581_v9  ;;  %v516_v26 = vsub.f32 %v9569_v62, %v10776_v14  ;;  %v9609_v2 = vsub.f32 %v4319_v23, %v9595_v59  ;;  %v4286_v23 = vld [vmem:[%s9601_s18 + $0x21] sm:$0xff] }
  0x2a   : > { %8516 = vmatmul.mubr.f32.gmra.mrb[6].mxu0 %v10767_v4  ;;  %8134 = vmatprep.mubr.f32.mxu1 %v497_v13  ;;  %v4295_v13 = vsel %vm358_vm1, %v4284_v63, 0  ;;  %v4287_v63 = vld [vmem:[%s9601_s18 + $0x31] sm:$0xff]  ;;  %v4288_v4 = vld [vmem:[%s9601_s18 + $0x41] sm:$0xff]  ;;  %v4313_v14 = vsel %vm358_vm1, %v4290_v42, 0 }
  0x2b   : > { %8520 = vmatprep.mubr.f32.mxu0 %v9433_v24  ;;  %v526_v45 = vsub.f32 %v9581_v9, %v10775_v19  ;;  %8135 = vmatmul.mubr.f32.gmra.mrb[4].mxu1 %v507_v15  ;;  %v517_v51 = vand.u32 4294901760, %v516_v26  ;;  %v4285_v15 = vld [vmem:[%s9601_s18 + $0x11] sm:$0xff]  ;;  %v9618_v26 = vand.u32 4294901760, %v9609_v2  ;;  %v4307_v52 = vsel %vm358_vm1, %v4288_v4, 0 }
  0x2c   : > { %v9685_v55 = vand.u32 4294901760, %v4313_v14 }
  0x2d   : > { %v527_v60 = vand.u32 4294901760, %v526_v45  ;;  %8137 = vmatprep.mubr.f32.mxu1 %v517_v51  ;;  %v9625_v45 = vand.u32 4294901760, %v4295_v13  ;;  %v4298_v51 = vsel %vm358_vm1, %v4285_v15, 0 }
  0x2e   : > { %8521 = vmatmul.mubr.f32.vlgmr.msra.gmra.mrb[0].mxu0 %v9435_v25  ;;  %v9640_v28 = vand.u32 4294901760, %v4298_v51 }
  0x2f   : > { %8523 = vmatprep.mubr.f32.mxu0 %v9444_v31  ;;  %8533 = vmatpush3.msra.mxu0 %v9378_v3  ;;  %v9638_v53 = vsub.f32 %v4295_v13, %v9625_v45 }
  0x30   : > { %8138 = vmatmul.mubr.f32.gmra.mrb[6].mxu1 %v527_v60  ;;  %8546 = vmatprep.subr.mxu0 %v9595_v59  ;;  %v4301_v60 = vsel %vm358_vm1, %v4286_v23, 0  ;;  %v4304_v23 = vsel %vm358_vm1, %v4287_v63, 0  ;;  %v9654_v41 = vsub.f32 %v4298_v51, %v9640_v28  ;;  %v4310_v63 = vsel %vm358_vm1, %v4289_v47, 0  ;;  %v4291_v51 = vld [vmem:[%s9601_s18 + $0x71] sm:$0xff] }
  0x31   : > { %8142 = vmatprep.mubr.f32.mxu1 %v9428_v21  ;;  %v9643_v15 = vand.u32 4294901760, %v4301_v60  ;;  %v10782_v13 = vand.u32 4294901760, %v9638_v53  ;;  %v9656_v19 = vand.u32 4294901760, %v4304_v23  ;;  %v9678_v47 = vand.u32 4294901760, %v4310_v63 }
  0x32   : > { %8524 = vmatmul.mubr.f32.gmra.mrb[2].mxu0 %v9456_v36  ;;  %v4316_v43 = vsel %vm358_vm1, %v4291_v51, 0 }
  0x33   : > { %8526 = vmatprep.mubr.f32.mxu0 %v9479_v49  ;;  %v9661_v4 = vsub.f32 %v4301_v60, %v9643_v15  ;;  %v4390_v54 = vsub.f32 %v9638_v53, %v10782_v13  ;;  %v10786_v60 = vand.u32 4294901760, %v9654_v41  ;;  %v9676_v46 = vsub.f32 %v4304_v23, %v9656_v19 }
  0x34   : > { %8143 = vmatmul.mubr.f32.vlgmr.msra.gmra.mrb[0].mxu1 %v9438_v27  ;;  %v9698_v13 = vsub.f32 %v4310_v63, %v9678_v47  ;;  %v9700_v51 = vand.u32 4294901760, %v4316_v43 }
  0x35   : > { %8155 = vmatpush3.msra.mxu1 %v9395_v7  ;;  %8145 = vmatprep.mubr.f32.mxu1 %v9462_v39  ;;  %v4471_v7 = vsub.f32 %v9609_v2, %v9618_v26  ;;  %v10788_v42 = vand.u32 4294901760, %v9661_v4  ;;  %v4400_v23 = vsub.f32 %v9654_v41, %v10786_v60  ;;  %v4391_v37 = vand.u32 4294901760, %v4390_v54 }
  0x36   : > { %8527 = vmatmul.mubr.f32.gmra.mrb[4].mxu0 %v9508_v1  ;;  %8168 = vmatprep.subr.mxu1 %v9383_v5  ;;  %v9708_v60 = vsub.f32 %v4313_v14, %v9685_v55 }
  0x37   : > { %8529 = vmatprep.mubr.f32.mxu0 %v9526_v17  ;;  %v4472_v0 = vand.u32 4294901760, %v4471_v7  ;;  %v9663_v7 = vand.u32 4294901760, %v4307_v52  ;;  %v4401_v63 = vand.u32 4294901760, %v4400_v23 }
  0x38   : > { %8146 = vmatmul.mubr.f32.gmra.mrb[2].mxu1 %v9501_v61 }
  0x39   : > { %8148 = vmatprep.mubr.f32.mxu1 %v9517_v12  ;;  %v9683_v20 = vsub.f32 %v4307_v52, %v9663_v7  ;;  %v10791_v52 = vand.u32 4294901760, %v9676_v46 }
  0x3a   : > { %8530 = vmatmul.mubr.f32.gmra.mrb[6].mxu0 %v9547_v40 }
  0x3b   : > { %8534 = vmatprep.mubr.f32.mxu0 %v9433_v24  ;;  %v4420_v54 = vsub.f32 %v9676_v46, %v10791_v52  ;;  %v10858_v14 = vand.u32 4294901760, %v9683_v20 }
  0x3c   : > { %8149 = vmatmul.mubr.f32.gmra.mrb[4].mxu1 %v9528_v18 }
  0x3d   : > { %8151 = vmatprep.mubr.f32.mxu1 %v9553_v50  ;;  %v4421_v23 = vand.u32 4294901760, %v4420_v54 }
  0x3e   : > { %8535 = vmatmul.mubr.f32.vlgmr.msra.gmra.mrb[0].mxu0 %v9435_v25  ;;  %v7621_v25 = vld [vmem:[%s9401_s10 + $0x50] sm:$0xff] }
  0x3f   : > { %8537 = vmatprep.mubr.f32.mxu0 %v9444_v31  ;;  %8547 = vmatpush3.msra.mxu0 %v9595_v59  ;;  %v10792_v31 = vand.u32 4294901760, %v9708_v60  ;;  %v5893_v16 = vsel %vm358_vm1, %v7621_v25, 0 }
  0x40   : > { %8152 = vmatmul.mubr.f32.gmra.mrb[6].mxu1 %v9563_v58  ;;  %8560 = vmatprep.subr.mxu0 %v4472_v0 }
  0x41   : > { %8156 = vmatprep.mubr.f32.mxu1 %v9442_v29 }
  0x42   : > { %8538 = vmatmul.mubr.f32.gmra.mrb[2].mxu0 %v9456_v36  ;;  %v4430_v36 = vsub.f32 %v9683_v20, %v10858_v14 }
  0x43   : > { %8540 = vmatprep.mubr.f32.mxu0 %v9479_v49 }
  0x44   : > { %8157 = vmatmul.mubr.f32.vlgmr.msra.gmra.mrb[0].mxu1 %v9454_v35 }
  0x45   : > { %8169 = vmatpush3.msra.mxu1 %v9383_v5  ;;  %8159 = vmatprep.mubr.f32.mxu1 %v9477_v48 }
  0x46   : > { %8541 = vmatmul.mubr.f32.gmra.mrb[4].mxu0 %v9508_v1  ;;  %8182 = vmatprep.subr.mxu1 %v9415_v10  ;;  %v4410_v1 = vsub.f32 %v9661_v4, %v10788_v42  ;;  %v9718_v42 = vsub.f32 %v4316_v43, %v9700_v51 }
  0x47   : > { %8543 = vmatprep.mubr.f32.mxu0 %v9526_v17  ;;  %v10795_v17 = vand.u32 4294901760, %v9698_v13 }
  0x48   : > { %8160 = vmatmul.mubr.f32.gmra.mrb[2].mxu1 %v9515_v11  ;;  %v4411_v49 = vand.u32 4294901760, %v4410_v1  ;;  %v10794_v43 = vand.u32 4294901760, %v9718_v42  ;;  %v4450_v1 = vsub.f32 %v9708_v60, %v10792_v31 }
  0x49   : > { %8162 = vmatprep.mubr.f32.mxu1 %v9535_v22  ;;  %v4440_v52 = vsub.f32 %v9698_v13, %v10795_v17  ;;  %v10868_v17 = vand.u32 4294901760, %v9654_v41 }
  0x4a   : > { %8544 = vmatmul.mubr.f32.gmra.mrb[6].mxu0 %v9547_v40  ;;  %v4460_v14 = vsub.f32 %v9718_v42, %v10794_v43 }
  0x4b   : > { %8548 = vmatprep.mubr.f32.mxu0 %v4391_v37  ;;  %v4431_v37 = vand.u32 4294901760, %v4430_v36  ;;  %v4441_v54 = vand.u32 4294901760, %v4440_v52  ;;  %v10860_v36 = vand.u32 4294901760, %v9454_v35  ;;  %v10863_v52 = vand.u32 4294901760, %v9535_v22  ;;  %v347_v35 = vld [vmem:[%s10763_s4] sm:$0xf] }
  0x4c   : > { %8163 = vmatmul.mubr.f32.gmra.mrb[4].mxu1 %v9545_v32  ;;  %v4461_v31 = vand.u32 4294901760, %v4460_v14  ;;  %v342_v14 = vld [vmem:[%s9773_s23 + $0x30] sm:$0xff] }
  0x4d   : > { %8165 = vmatprep.mubr.f32.mxu1 %v9569_v62 }
  0x4e   : > { %8549 = vmatmul.mubr.f32.vlgmr.msra.gmra.mrb[0].mxu0 %v4401_v63  ;;  %v10859_v63 = vand.u32 4294901760, %v9442_v29  ;;  %v10862_v29 = vand.u32 4294901760, %v9515_v11  ;;  %v10866_v11 = vand.u32 4294901760, %v9581_v9 }
  0x4f   : > { %8551 = vmatprep.mubr.f32.mxu0 %v4411_v49  ;;  %8561 = vmatpush3.msra.mxu0 %v4472_v0  ;;  %v4451_v49 = vand.u32 4294901760, %v4450_v1  ;;  %v10861_v0 = vand.u32 4294901760, %v9477_v48  ;;  %v10865_v48 = vand.u32 4294901760, %v9569_v62 }
  0x50   : > { %8166 = vmatmul.mubr.f32.gmra.mrb[6].mxu1 %v9581_v9  ;;  %8574 = vmatprep.subr.mxu0 %v9609_v2 }
  0x51   : > { %8170 = vmatprep.mubr.f32.mxu1 %v10859_v63 }
  0x52   : > { %8552 = vmatmul.mubr.f32.gmra.mrb[2].mxu0 %v4421_v23  ;;  %v341_v23 = vld [vmem:[%s9773_s23 + $0x20] sm:$0xff] }
  0x53   : > { %8554 = vmatprep.mubr.f32.mxu0 %v4431_v37 }
  0x54   : > { %8171 = vmatmul.mubr.f32.vlgmr.msra.gmra.mrb[0].mxu1 %v10860_v36 }
  0x55   : > { %8183 = vmatpush3.msra.mxu1 %v9415_v10  ;;  %8173 = vmatprep.mubr.f32.mxu1 %v10861_v0  ;;  %v10864_v10 = vand.u32 4294901760, %v9545_v32  ;;  %v339_v32 = vld [vmem:[%s9773_s23] sm:$0xff] }
  0x56   : > { %8555 = vmatmul.mubr.f32.gmra.mrb[4].mxu0 %v4441_v54  ;;  %8196 = vmatprep.subr.mxu1 %v9383_v5  ;;  %v1135_v9 = vsel %vm358_vm1, %v339_v32, 0  ;;  %v1141_v54 = vsel %vm358_vm1, %v341_v23, 0 }
  0x57   : > { %8557 = vmatprep.mubr.f32.mxu0 %v4451_v49  ;;  %v9797_v37 = vand.u32 4294901760, %v1135_v9  ;;  %v343_v49 = vld [vmem:[%s9773_s23 + $0x40] sm:$0xff] }
  0x58   : > { %8174 = vmatmul.mubr.f32.gmra.mrb[2].mxu1 %v10862_v29  ;;  %v9817_v29 = vand.u32 4294901760, %v1141_v54 }
  0x59   : > { %8176 = vmatprep.mubr.f32.mxu1 %v10863_v52  ;;  %v9811_v36 = vsub.f32 %v1135_v9, %v9797_v37  ;;  %v1144_v52 = vsel %vm358_vm1, %v342_v14, 0 }
  0x5a   : > { %8558 = vmatmul.mubr.f32.gmra.mrb[6].mxu0 %v4461_v31  ;;  %v1159_v31 = vsel %vm383_vm0, %v347_v35, 0  ;;  %v1147_v35 = vsel %vm358_vm1, %v343_v49, 0  ;;  %v9830_v32 = vand.u32 4294901760, %v1144_v52  ;;  %v9835_v9 = vsub.f32 %v1141_v54, %v9817_v29 }
  0x5b   : > { %8562 = vmatprep.mubr.f32.mxu0 %v9625_v45  ;;  %v9767_v22 = vand.u32 4294901760, %v1159_v31 }
  0x5c   : > { %8177 = vmatmul.mubr.f32.gmra.mrb[4].mxu1 %v10864_v10  ;;  %v9852_v54 = vsub.f32 %v1144_v52, %v9830_v32  ;;  %v9858_v49 = vand.u32 4294901760, %v9835_v9 }
  0x5d   : > { %8179 = vmatprep.mubr.f32.mxu1 %v10865_v48  ;;  %v9783_v62 = vsub.f32 %v1159_v31, %v9767_v22  ;;  %v344_v48 = vld [vmem:[%s9773_s23 + $0x50] sm:$0xff]  ;;  %v345_v31 = vld [vmem:[%s9773_s23 + $0x60] sm:$0xff] }
  0x5e   : > { %8563 = vmatmul.mubr.f32.vlgmr.msra.gmra.mrb[0].mxu0 %v9640_v28  ;;  %v1150_v23 = vsel %vm358_vm1, %v344_v48, 0  ;;  %v9873_v52 = vand.u32 4294901760, %v9852_v54 }
  0x5f   : > { %8565 = vmatprep.mubr.f32.mxu0 %v9643_v15  ;;  %8575 = vmatpush3.msra.mxu0 %v9609_v2  ;;  %v340_v2 = vld [vmem:[%s9773_s23 + $0x10] sm:$0xff]  ;;  %v9854_v14 = vand.u32 4294901760, %v1150_v23 }
  0x60   : > { %8180 = vmatmul.mubr.f32.gmra.mrb[6].mxu1 %v10866_v11  ;;  %8588 = vmatprep.subr.mxu0 %v9595_v59  ;;  %v1138_v1 = vsel %vm358_vm1, %v340_v2, 0  ;;  %v10793_v11 = vand.u32 4294901760, %v9811_v36  ;;  %v9837_v2 = vand.u32 4294901760, %v1147_v35 }
  0x61   : > { %8184 = vmatprep.mubr.f32.mxu1 %v9428_v21  ;;  %v9814_v0 = vand.u32 4294901760, %v1138_v1 }
  0x62   : > { %8566 = vmatmul.mubr.f32.gmra.mrb[2].mxu0 %v9656_v19  ;;  %v9861_v48 = vsub.f32 %v1147_v35, %v9837_v2  ;;  %v9876_v35 = vsub.f32 %v1150_v23, %v9854_v14  ;;  %v10869_v23 = vand.u32 4294901760, %v9661_v4 }
  0x63   : > { %8568 = vmatprep.mubr.f32.mxu0 %v9663_v7 }
  0x64   : > { %8185 = vmatmul.mubr.f32.vlgmr.msra.gmra.mrb[0].mxu1 %v9438_v27  ;;  %v9900_v40 = vand.u32 4294901760, %v9876_v35 }
  0x65   : > { %8197 = vmatpush3.msra.mxu1 %v9383_v5  ;;  %8187 = vmatprep.mubr.f32.mxu1 %v9462_v39  ;;  %v9791_v5 = vand.u32 4294901760, %v9783_v62 }
  0x66   : > { %8569 = vmatmul.mubr.f32.gmra.mrb[4].mxu0 %v9678_v47  ;;  %8210 = vmatprep.subr.mxu1 %v9767_v22 }
  0x67   : > { %8571 = vmatprep.mubr.f32.mxu0 %v9685_v55  ;;  %v1311_v63 = vsub.f32 %v9783_v62, %v9791_v5 }
  0x68   : > { %8188 = vmatmul.mubr.f32.gmra.mrb[2].mxu1 %v9501_v61 }
  0x69   : > { %8190 = vmatprep.mubr.f32.mxu1 %v9517_v12  ;;  %v1312_v10 = vand.u32 4294901760, %v1311_v63 }
  0x6a   : > { %8572 = vmatmul.mubr.f32.gmra.mrb[6].mxu0 %v9700_v51 }
  0x6b   : > { %8576 = vmatprep.mubr.f32.mxu0 %v9638_v53 }
  0x6c   : > { %8191 = vmatmul.mubr.f32.gmra.mrb[4].mxu1 %v9528_v18 }
  0x6d   : > { %8193 = vmatprep.mubr.f32.mxu1 %v9553_v50 }
  0x6e   : > { %8577 = vmatmul.mubr.f32.vlgmr.msra.gmra.mrb[0].mxu0 %v9654_v41 }
  0x6f   : > { %8579 = vmatprep.mubr.f32.mxu0 %v9661_v4  ;;  %8589 = vmatpush3.msra.mxu0 %v9595_v59  ;;  %v10871_v4 = vand.u32 4294901760, %v9683_v20 }
  0x70   : > { %8194 = vmatmul.mubr.f32.gmra.mrb[6].mxu1 %v9563_v58  ;;  %8602 = vmatprep.subr.mxu0 %v9618_v26 }
  0x71   : > { %8198 = vmatprep.mubr.f32.mxu1 %v9428_v21  ;;  %v9828_v21 = vsub.f32 %v1138_v1, %v9814_v0  ;;  %v346_v1 = vld [vmem:[%s9773_s23 + $0x70] sm:$0xff] }
  0x72   : > { %8580 = vmatmul.mubr.f32.gmra.mrb[2].mxu0 %v9676_v46 }
  0x73   : > { %8582 = vmatprep.mubr.f32.mxu0 %v9683_v20  ;;  %v9849_v63 = vand.u32 4294901760, %v9828_v21  ;;  %v10872_v20 = vand.u32 4294901760, %v9698_v13 }
  0x74   : > { %8199 = vmatmul.mubr.f32.vlgmr.msra.gmra.mrb[0].mxu1 %v9438_v27  ;;  %v1153_v27 = vsel %vm358_vm1, %v345_v31, 0  ;;  %v1156_v31 = vsel %vm358_vm1, %v346_v1, 0 }
  0x75   : > { %8211 = vmatpush3.msra.mxu1 %v9767_v22  ;;  %8201 = vmatprep.mubr.f32.mxu1 %v9462_v39  ;;  %v1230_v39 = vsub.f32 %v9811_v36, %v10793_v11  ;;  %v10867_v11 = vand.u32 4294901760, %v9638_v53  ;;  %v9878_v43 = vand.u32 4294901760, %v1156_v31  ;;  %v1250_v53 = vsub.f32 %v9835_v9, %v9858_v49 }
  0x76   : > { %8583 = vmatmul.mubr.f32.gmra.mrb[4].mxu0 %v9698_v13  ;;  %8224 = vmatprep.subr.mxu1 %v1312_v10 }
  0x77   : > { %8585 = vmatprep.mubr.f32.mxu0 %v9708_v60  ;;  %v1231_v1 = vand.u32 4294901760, %v1230_v39  ;;  %v1260_v39 = vsub.f32 %v9852_v54, %v9873_v52  ;;  %v9906_v41 = vand.u32 4294901760, %v1250_v53 }
  0x78   : > { %8202 = vmatmul.mubr.f32.gmra.mrb[2].mxu1 %v9501_v61  ;;  %v9863_v61 = vand.u32 4294901760, %v1153_v27 }
  0x79   : > { %8204 = vmatprep.mubr.f32.mxu1 %v9517_v12  ;;  %v1240_v12 = vsub.f32 %v9828_v21, %v9849_v63 }
  0x7a   : > { %8586 = vmatmul.mubr.f32.gmra.mrb[6].mxu0 %v9718_v42 }
  0x7b   : > { %8590 = vmatprep.mubr.f32.mxu0 %v10867_v11  ;;  %v9884_v11 = vand.u32 4294901760, %v9861_v48 }
  0x7c   : > { %8205 = vmatmul.mubr.f32.gmra.mrb[4].mxu1 %v9528_v18  ;;  %v9887_v18 = vsub.f32 %v1153_v27, %v9863_v61  ;;  %v9903_v27 = vsub.f32 %v1156_v31, %v9878_v43  ;;  %v9918_v31 = vand.u32 4294901760, %v1260_v39  ;;  %v10873_v39 = vand.u32 4294901760, %v9708_v60 }
  0x7d   : > { %8207 = vmatprep.mubr.f32.mxu1 %v9553_v50  ;;  %v9895_v50 = vand.u32 4294901760, %v1240_v12  ;;  %v1280_v12 = vsub.f32 %v9876_v35, %v9900_v40 }
  0x7e   : > { %8591 = vmatmul.mubr.f32.vlgmr.msra.gmra.mrb[0].mxu0 %v10868_v17  ;;  %v1270_v17 = vsub.f32 %v9861_v48, %v9884_v11 }
  0x7f   : > { %8593 = vmatprep.mubr.f32.mxu0 %v10869_v23  ;;  %8603 = vmatpush3.msra.mxu0 %v9618_v26  ;;  %v10870_v26 = vand.u32 4294901760, %v9676_v46  ;;  %v7616_v23 = vld [vmem:[%s10763_s4 + $0x18] sm:$0xf] }
  0x80   : > { %8208 = vmatmul.mubr.f32.gmra.mrb[6].mxu1 %v9563_v58  ;;  %8616 = vmatprep.subr.mxu0 %v9595_v59  ;;  %v9911_v58 = vand.u32 4294901760, %v9887_v18  ;;  %v9926_v53 = vand.u32 4294901760, %v1270_v17 }
  0x81   : > { %8212 = vmatprep.mubr.f32.mxu1 %v1231_v1  ;;  %v9923_v1 = vand.u32 4294901760, %v9903_v27 }
  0x82   : > { %8594 = vmatmul.mubr.f32.gmra.mrb[2].mxu0 %v10870_v26  ;;  %v1290_v46 = vsub.f32 %v9887_v18, %v9911_v58  ;;  %v5112_v26 = vsel %vm383_vm0, %v7616_v23, 0  ;;  %v1910_v23 = vld [vmem:[%s9773_s23 + $0x21] sm:$0xff] }
  0x83   : > { %8596 = vmatprep.mubr.f32.mxu0 %v10871_v4  ;;  %v1300_v17 = vsub.f32 %v9903_v27, %v9923_v1  ;;  %v10874_v4 = vand.u32 4294901760, %v9718_v42 }
  0x84   : > { %8213 = vmatmul.mubr.f32.vlgmr.msra.gmra.mrb[0].mxu1 %v9895_v50  ;;  %v9944_v13 = vand.u32 4294901760, %v1290_v46 }
  0x85   : > { %8225 = vmatpush3.msra.mxu1 %v1312_v10  ;;  %8215 = vmatprep.mubr.f32.mxu1 %v9906_v41  ;;  %v9939_v10 = vand.u32 4294901760, %v1280_v12  ;;  %v9951_v60 = vand.u32 4294901760, %v1300_v17  ;;  %v9953_v12 = vand.u32 4294901760, %v5112_v26 }
  0x86   : > { %8597 = vmatmul.mubr.f32.gmra.mrb[4].mxu0 %v10872_v20  ;;  %8238 = vmatprep.subr.mxu1 %v9783_v62  ;;  %v7615_v20 = vld [vmem:[%s9773_s23 + $0x80] sm:$0xff] }
  0x87   : > { %8599 = vmatprep.mubr.f32.mxu0 %v10873_v39  ;;  %v9962_v42 = vsub.f32 %v5112_v26, %v9953_v12  ;;  %v1911_v26 = vld [vmem:[%s9773_s23 + $0x31] sm:$0xff] }
  0x88   : > { %8216 = vmatmul.mubr.f32.gmra.mrb[2].mxu1 %v9918_v31 }
  0x89   : > { %8218 = vmatprep.mubr.f32.mxu1 %v9926_v53  ;;  %v9969_v46 = vand.u32 4294901760, %v9962_v42 }
  0x8a   : > { %8600 = vmatmul.mubr.f32.gmra.mrb[6].mxu0 %v10874_v4 }
  0x8b   : > { %8604 = vmatprep.mubr.f32.mxu0 %v9625_v45 }
  0x8c   : > { %8219 = vmatmul.mubr.f32.gmra.mrb[4].mxu1 %v9939_v10 }
  0x8d   : > { %8221 = vmatprep.mubr.f32.mxu1 %v9944_v13 }
  0x8e   : > { %8605 = vmatmul.mubr.f32.vlgmr.msra.gmra.mrb[0].mxu0 %v9640_v28 }
  0x8f   : > { %8607 = vmatprep.mubr.f32.mxu0 %v9643_v15  ;;  %8617 = vmatpush3.msra.mxu0 %v9595_v59  ;;  %v5264_v59 = vsub.f32 %v9962_v42, %v9969_v46 }
  0x90   : > { %8222 = vmatmul.mubr.f32.gmra.mrb[6].mxu1 %v9951_v60  ;;  %8630 = vmatprep.subr.mxu0 %v9953_v12 }
  0x91   : > { %8226 = vmatprep.mubr.f32.mxu1 %v9797_v37 }
  0x92   : > { %8608 = vmatmul.mubr.f32.gmra.mrb[2].mxu0 %v9656_v19 }
  0x93   : > { %8610 = vmatprep.mubr.f32.mxu0 %v9663_v7 }
  0x94   : > { %8227 = vmatmul.mubr.f32.vlgmr.msra.gmra.mrb[0].mxu1 %v9814_v0 }
  0x95   : > { %8239 = vmatpush3.msra.mxu1 %v9783_v62  ;;  %8229 = vmatprep.mubr.f32.mxu1 %v9817_v29  ;;  %v5265_v62 = vand.u32 4294901760, %v5264_v59 }
  0x96   : > { %8611 = vmatmul.mubr.f32.gmra.mrb[4].mxu0 %v9678_v47  ;;  %8252 = vmatprep.subr.mxu1 %v9767_v22 }
  0x97   : > { %8613 = vmatprep.mubr.f32.mxu0 %v9685_v55 }
  0x98   : > { %8230 = vmatmul.mubr.f32.gmra.mrb[2].mxu1 %v9830_v32 }
  0x99   : > { %8232 = vmatprep.mubr.f32.mxu1 %v9837_v2 }
  0x9a   : > { %8614 = vmatmul.mubr.f32.gmra.mrb[6].mxu0 %v9700_v51 }
  0x9b   : > { %8618 = vmatprep.mubr.f32.mxu0 %v9625_v45  ;;  %v5109_v45 = vsel %vm358_vm1, %v7615_v20, 0  ;;  %v1914_v20 = vld [vmem:[%s9773_s23 + $0x61] sm:$0xff] }
  0x9c   : > { %8233 = vmatmul.mubr.f32.gmra.mrb[4].mxu1 %v9854_v14 }
  0x9d   : > { %8235 = vmatprep.mubr.f32.mxu1 %v9863_v61 }
  0x9e   : > { %8619 = vmatmul.mubr.f32.vlgmr.msra.gmra.mrb[0].mxu0 %v9640_v28  ;;  %v9998_v28 = vand.u32 4294901760, %v5109_v45 }
  0x9f   : > { %8621 = vmatprep.mubr.f32.mxu0 %v9643_v15  ;;  %8631 = vmatpush3.msra.mxu0 %v9953_v12 }
  0xa0   : > { %8236 = vmatmul.mubr.f32.gmra.mrb[6].mxu1 %v9878_v43  ;;  %8644 = vmatprep.subr.mxu0 %v5265_v62 }
  0xa1   : > { %8240 = vmatprep.mubr.f32.mxu1 %v9811_v36 }
  0xa2   : > { %8622 = vmatmul.mubr.f32.gmra.mrb[2].mxu0 %v9656_v19  ;;  %v10005_v19 = vsub.f32 %v5109_v45, %v9998_v28 }
  0xa3   : > { %8624 = vmatprep.mubr.f32.mxu0 %v9663_v7 }
  0xa4   : > { %8241 = vmatmul.mubr.f32.vlgmr.msra.gmra.mrb[0].mxu1 %v9828_v21  ;;  %v5252_v15 = vand.u32 4294901760, %v10005_v19 }
  0xa5   : > { %8253 = vmatpush3.msra.mxu1 %v9767_v22  ;;  %8243 = vmatprep.mubr.f32.mxu1 %v9835_v9 }
  0xa6   : > { %8625 = vmatmul.mubr.f32.gmra.mrb[4].mxu0 %v9678_v47  ;;  %8266 = vmatprep.subr.mxu1 %v9791_v5  ;;  %v5253_v7 = vsub.f32 %v10005_v19, %v5252_v15 }
  0xa7   : > { %8627 = vmatprep.mubr.f32.mxu0 %v9685_v55  ;;  %v10875_v55 = vand.u32 4294901760, %v9811_v36 }
  0xa8   : > { %8244 = vmatmul.mubr.f32.gmra.mrb[2].mxu1 %v9852_v54  ;;  %v5254_v47 = vand.u32 4294901760, %v5253_v7 }
  0xa9   : > { %8246 = vmatprep.mubr.f32.mxu1 %v9861_v48 }
  0xaa   : > { %8628 = vmatmul.mubr.f32.gmra.mrb[6].mxu0 %v9700_v51  ;;  %v7604_v51 = vld [vmem:[%s10763_s4 + $0x8] sm:$0xf] }
  0xab   : > { %8632 = vmatprep.mubr.f32.mxu0 %v9895_v50  ;;  %v1908_v50 = vld [vmem:[%s9773_s23 + $0x1] sm:$0xff] }
  0xac   : > { %8247 = vmatmul.mubr.f32.gmra.mrb[4].mxu1 %v9876_v35 }
  0xad   : > { %8249 = vmatprep.mubr.f32.mxu1 %v9887_v18 }
  0xae   : > { %8633 = vmatmul.mubr.f32.vlgmr.msra.gmra.mrb[0].mxu0 %v9906_v41 }
  0xaf   : > { %8635 = vmatprep.mubr.f32.mxu0 %v9918_v31  ;;  %8645 = vmatpush3.msra.mxu0 %v5265_v62  ;;  %v1919_v31 = vsel %vm358_vm1, %v1908_v50, 0  ;;  %v1913_v62 = vld [vmem:[%s9773_s23 + $0x51] sm:$0xff] }
  0xb0   : > { %8250 = vmatmul.mubr.f32.gmra.mrb[6].mxu1 %v9903_v27  ;;  %8658 = vmatprep.subr.mxu0 %v9962_v42  ;;  %v10068_v39 = vand.u32 4294901760, %v1919_v31 }
  0xb1   : > { %8254 = vmatprep.mubr.f32.mxu1 %v10875_v55 }
  0xb2   : > { %8636 = vmatmul.mubr.f32.gmra.mrb[2].mxu0 %v9926_v53  ;;  %v1909_v53 = vld [vmem:[%s9773_s23 + $0x11] sm:$0xff]  ;;  %v10082_v4 = vsub.f32 %v1919_v31, %v10068_v39 }
  0xb3   : > { %8638 = vmatprep.mubr.f32.mxu0 %v9939_v10  ;;  %v1922_v10 = vsel %vm358_vm1, %v1909_v53, 0 }
  0xb4   : > { %8255 = vmatmul.mubr.f32.vlgmr.msra.gmra.mrb[0].mxu1 %v9849_v63  ;;  %v10797_v45 = vand.u32 4294901760, %v10082_v4 }
  0xb5   : > { %8267 = vmatpush3.msra.mxu1 %v9791_v5  ;;  %8257 = vmatprep.mubr.f32.mxu1 %v9858_v49  ;;  %v1943_v5 = vsel %vm383_vm0, %v7604_v51, 0  ;;  %v1915_v51 = vld [vmem:[%s9773_s23 + $0x71] sm:$0xff] }
  0xb6   : > { %8639 = vmatmul.mubr.f32.gmra.mrb[4].mxu0 %v9944_v13  ;;  %8280 = vmatprep.subr.mxu1 %v9767_v22  ;;  %v10044_v36 = vand.u32 4294901760, %v1943_v5  ;;  %v1925_v13 = vsel %vm358_vm1, %v1910_v23, 0 }
  0xb7   : > { %8641 = vmatprep.mubr.f32.mxu0 %v9951_v60  ;;  %v10088_v60 = vand.u32 4294901760, %v1925_v13 }
  0xb8   : > { %8258 = vmatmul.mubr.f32.gmra.mrb[2].mxu1 %v9873_v52  ;;  %v10054_v41 = vsub.f32 %v1943_v5, %v10044_v36  ;;  %v2014_v5 = vsub.f32 %v10082_v4, %v10797_v45  ;;  %v7620_v45 = vld [vmem:[%s9401_s10 + $0x40] sm:$0xff] }
  0xb9   : > { %8260 = vmatprep.mubr.f32.mxu1 %v9884_v11 }
  0xba   : > { %8642 = vmatmul.mubr.f32.gmra.mrb[6].mxu0 %v5254_v47  ;;  %v1937_v47 = vsel %vm358_vm1, %v1914_v20, 0 }
  0xbb   : > { %8646 = vmatprep.mubr.f32.mxu0 %v9814_v0  ;;  %v10134_v23 = vand.u32 4294901760, %v1937_v47 }
  0xbc   : > { %8261 = vmatmul.mubr.f32.gmra.mrb[4].mxu1 %v9900_v40 }
  0xbd   : > { %8263 = vmatprep.mubr.f32.mxu1 %v9911_v58 }
  0xbe   : > { %8647 = vmatmul.mubr.f32.vlgmr.msra.gmra.mrb[0].mxu0 %v9817_v29 }
  0xbf   : > { %8649 = vmatprep.mubr.f32.mxu0 %v9830_v32  ;;  %8659 = vmatpush3.msra.mxu0 %v9962_v42  ;;  %v1928_v42 = vsel %vm358_vm1, %v1911_v26, 0 }
  0xc0   : > { %8264 = vmatmul.mubr.f32.gmra.mrb[6].mxu1 %v9923_v1  ;;  %8672 = vmatprep.subr.mxu0 %v9953_v12  ;;  %v10101_v55 = vand.u32 4294901760, %v1928_v42 }
  0xc1   : > { %8268 = vmatprep.mubr.f32.mxu1 %v9797_v37 }
  0xc2   : > { %8650 = vmatmul.mubr.f32.gmra.mrb[2].mxu0 %v9837_v2  ;;  %v10123_v31 = vsub.f32 %v1928_v42, %v10101_v55  ;;  %v2015_v42 = vand.u32 4294901760, %v2014_v5 }
  0xc3   : > { %8652 = vmatprep.mubr.f32.mxu0 %v9854_v14 }
  0xc4   : > { %8269 = vmatmul.mubr.f32.vlgmr.msra.gmra.mrb[0].mxu1 %v9814_v0  ;;  %10877 = vst [vmem:[#allocation21_spill] sm:$0xff] %v10123_v31 }
  0xc5   : > { %8281 = vmatpush3.msra.mxu1 %v9767_v22  ;;  %8271 = vmatprep.mubr.f32.mxu1 %v9817_v29  ;;  %v10062_v22 = vand.u32 4294901760, %v10054_v41 }
  0xc6   : > { %8653 = vmatmul.mubr.f32.gmra.mrb[4].mxu0 %v9863_v61  ;;  %8294 = vmatprep.subr.mxu1 %v10044_v36 }
  0xc7   : > { %8655 = vmatprep.mubr.f32.mxu0 %v9878_v43  ;;  %v2095_v17 = vsub.f32 %v10054_v41, %v10062_v22 }
  0xc8   : > { %8272 = vmatmul.mubr.f32.gmra.mrb[2].mxu1 %v9830_v32 }
  0xc9   : > { %8274 = vmatprep.mubr.f32.mxu1 %v9837_v2 }
  0xca   : > { %8656 = vmatmul.mubr.f32.gmra.mrb[6].mxu0 %v9998_v28 }
  0xcb   : > { %8660 = vmatprep.mubr.f32.mxu0 %v9828_v21  ;;  %v1912_v21 = vld [vmem:[%s9773_s23 + $0x41] sm:$0xff] }
  0xcc   : > { %8275 = vmatmul.mubr.f32.gmra.mrb[4].mxu1 %v9854_v14  ;;  %v1931_v59 = vsel %vm358_vm1, %v1912_v21, 0 }
  0xcd   : > { %8277 = vmatprep.mubr.f32.mxu1 %v9863_v61  ;;  %v10108_v7 = vand.u32 4294901760, %v1931_v59 }
  0xce   : > { %8661 = vmatmul.mubr.f32.vlgmr.msra.gmra.mrb[0].mxu0 %v9835_v9  ;;  %v10085_v9 = vand.u32 4294901760, %v1922_v10 }
  0xcf   : > { %8663 = vmatprep.mubr.f32.mxu0 %v9852_v54  ;;  %8673 = vmatpush3.msra.mxu0 %v9953_v12  ;;  %v2096_v54 = vand.u32 4294901760, %v2095_v17 }
  0xd0   : > { %8278 = vmatmul.mubr.f32.gmra.mrb[6].mxu1 %v9878_v43  ;;  %8686 = vmatprep.subr.mxu0 %v9969_v46 }
  0xd1   : > { %8282 = vmatprep.mubr.f32.mxu1 %v9797_v37  ;;  %v10099_v37 = vsub.f32 %v1922_v10, %v10085_v9  ;;  %v1940_v10 = vsel %vm358_vm1, %v1915_v51, 0 }
  0xd2   : > { %8664 = vmatmul.mubr.f32.gmra.mrb[2].mxu0 %v9861_v48  ;;  %v10106_v48 = vsub.f32 %v1925_v13, %v10088_v60  ;;  %v10143_v13 = vand.u32 4294901760, %v10123_v31  ;;  %v10148_v21 = vand.u32 4294901760, %v1940_v10 }
  0xd3   : > { %8666 = vmatprep.mubr.f32.mxu0 %v9876_v35  ;;  %v1934_v35 = vsel %vm358_vm1, %v1913_v62, 0  ;;  %v10120_v50 = vand.u32 4294901760, %v10099_v37  ;;  %v10157_v62 = vsub.f32 %v1937_v47, %v10134_v23 }
  0xd4   : > { %8283 = vmatmul.mubr.f32.vlgmr.msra.gmra.mrb[0].mxu1 %v9814_v0  ;;  %v10125_v53 = vand.u32 4294901760, %v1934_v35  ;;  %10880 = vst [vmem:[#allocation24_spill] sm:$0xff] %v10143_v13  ;;  %v10171_v5 = vsub.f32 %v1940_v10, %v10148_v21 }
  0xd5   : > { %8295 = vmatpush3.msra.mxu1 %v10044_v36  ;;  %8285 = vmatprep.mubr.f32.mxu1 %v9817_v29  ;;  %10876 = vst [vmem:[#allocation20_spill] sm:$0xff] %v10120_v50  ;;  %v2024_v17 = vsub.f32 %v10099_v37, %v10120_v50  ;;  %10883 = vst [vmem:[#allocation27_spill] sm:$0xff] %v10157_v62 }
  0xd6   : > { %8667 = vmatmul.mubr.f32.gmra.mrb[4].mxu0 %v9887_v18  ;;  %8308 = vmatprep.subr.mxu1 %v2096_v54  ;;  %v10129_v18 = vand.u32 4294901760, %v10106_v48  ;;  %v10146_v26 = vsub.f32 %v1934_v35, %v10125_v53  ;;  %v2044_v35 = vsub.f32 %v10123_v31, %v10143_v13  ;;  %10885 = vst [vmem:[#allocation29_spill] sm:$0xff] %v10171_v5 }
  0xd7   : > { %8669 = vmatprep.mubr.f32.mxu0 %v9903_v27  ;;  %v10132_v27 = vsub.f32 %v1931_v59, %v10108_v7  ;;  %v10163_v20 = vand.u32 4294901760, %v2024_v17  ;;  %v10189_v17 = vand.u32 4294901760, %v10171_v5 }
  0xd8   : > { %8286 = vmatmul.mubr.f32.gmra.mrb[2].mxu1 %v9830_v32  ;;  %10878 = vst [vmem:[#allocation22_spill] sm:$0xff] %v10129_v18  ;;  %10881 = vst [vmem:[#allocation25_spill] sm:$0xff] %v10146_v26  ;;  %v2034_v59 = vsub.f32 %v10106_v48, %v10129_v18  ;;  %v10168_v51 = vand.u32 4294901760, %v10146_v26  ;;  %v10184_v47 = vand.u32 4294901760, %v2044_v35 }
  0xd9   : > { %8288 = vmatprep.mubr.f32.mxu1 %v9837_v2  ;;  %10879 = vst [vmem:[#allocation23_spill] sm:$0xff] %v10132_v27  ;;  %10887 = vst [vmem:[#allocation31_spill] sm:$0xff] %v10189_v17 }
  0xda   : > { %8670 = vmatmul.mubr.f32.gmra.mrb[6].mxu0 %v10005_v19  ;;  %10884 = vst [vmem:[#allocation28_spill] sm:$0xff] %v10168_v51  ;;  %v2064_v10 = vsub.f32 %v10146_v26, %v10168_v51  ;;  %v7617_v19 = vld [vmem:[%s9401_s10 + $0x10] sm:$0xff] }
  0xdb   : > { %8674 = vmatprep.mubr.f32.mxu0 %v9849_v63  ;;  %v10154_v63 = vand.u32 4294901760, %v10132_v27 }
  0xdc   : > { %8289 = vmatmul.mubr.f32.gmra.mrb[4].mxu1 %v9854_v14 }
  0xdd   : > { %8291 = vmatprep.mubr.f32.mxu1 %v9863_v61  ;;  %10882 = vst [vmem:[#allocation26_spill] sm:$0xff] %v10154_v63 }
  0xde   : > { %8675 = vmatmul.mubr.f32.vlgmr.msra.gmra.mrb[0].mxu0 %v9858_v49  ;;  %v10174_v49 = vand.u32 4294901760, %v2034_v59  ;;  %v2084_v59 = vsub.f32 %v10171_v5, %v10189_v17 }
  0xdf   : > { %8677 = vmatprep.mubr.f32.mxu0 %v9873_v52  ;;  %8687 = vmatpush3.msra.mxu0 %v9969_v46  ;;  %v2054_v52 = vsub.f32 %v10132_v27, %v10154_v63  ;;  %v10179_v46 = vand.u32 4294901760, %v10157_v62 }
  0xe0   : > { %8292 = vmatmul.mubr.f32.gmra.mrb[6].mxu1 %v9878_v43  ;;  %8700 = vmatprep.subr.mxu0 %v9953_v12 }
  0xe1   : > { %8296 = vmatprep.mubr.f32.mxu1 %v2015_v42  ;;  %10886 = vst [vmem:[#allocation30_spill] sm:$0xff] %v10179_v46  ;;  %v10192_v42 = vand.u32 4294901760, %v2054_v52 }
  0xe2   : > { %8678 = vmatmul.mubr.f32.gmra.mrb[2].mxu0 %v9884_v11  ;;  %v2074_v11 = vsub.f32 %v10157_v62, %v10179_v46 }
  0xe3   : > { %8680 = vmatprep.mubr.f32.mxu0 %v9900_v40  ;;  %v7625_v40 = vld [vmem:[%s10763_s4 + $0x1c] sm:$0xf] }
  0xe4   : > { %8297 = vmatmul.mubr.f32.vlgmr.msra.gmra.mrb[0].mxu1 %v10163_v20  ;;  %v10208_v35 = vand.u32 4294901760, %v2074_v11 }
  0xe5   : > { %8309 = vmatpush3.msra.mxu1 %v2096_v54  ;;  %8299 = vmatprep.mubr.f32.mxu1 %v10174_v49  ;;  %v10203_v54 = vand.u32 4294901760, %v2064_v10  ;;  %v5881_v10 = vsel %vm358_vm1, %v7617_v19, 0 }
  0xe6   : > { %8681 = vmatmul.mubr.f32.gmra.mrb[4].mxu0 %v9911_v58  ;;  %8322 = vmatprep.subr.mxu1 %v10054_v41  ;;  %v5905_v58 = vsel %vm383_vm0, %v7625_v40, 0  ;;  %v7619_v40 = vld [vmem:[%s9401_s10 + $0x30] sm:$0xff] }
  0xe7   : > { %8683 = vmatprep.mubr.f32.mxu0 %v9923_v1  ;;  %v10215_v1 = vand.u32 4294901760, %v2084_v59  ;;  %v10217_v52 = vand.u32 4294901760, %v5905_v58  ;;  %v10243_v59 = vand.u32 4294901760, %v5881_v10  ;;  %v5887_v19 = vsel %vm358_vm1, %v7619_v40, 0 }
  0xe8   : > { %8300 = vmatmul.mubr.f32.gmra.mrb[2].mxu1 %v10184_v47  ;;  %v5890_v40 = vsel %vm358_vm1, %v7620_v45, 0  ;;  %v10281_v45 = vand.u32 4294901760, %v5893_v16 }
  0xe9   : > { %8302 = vmatprep.mubr.f32.mxu1 %v10192_v42  ;;  %v10256_v24 = vsub.f32 %v5881_v10, %v10243_v59  ;;  %v10274_v38 = vand.u32 4294901760, %v5890_v40 }
  0xea   : > { %8684 = vmatmul.mubr.f32.gmra.mrb[6].mxu0 %v5252_v15  ;;  %v10227_v15 = vsub.f32 %v5905_v58, %v10217_v52  ;;  %v10301_v33 = vsub.f32 %v5893_v16, %v10281_v45 }
  0xeb   : > { %8688 = vmatprep.mubr.f32.mxu0 %v9814_v0  ;;  %v10818_v10 = vand.u32 4294901760, %v10256_v24  ;;  %v10294_v34 = vsub.f32 %v5890_v40, %v10274_v38 }
  0xec   : > { %8303 = vmatmul.mubr.f32.gmra.mrb[4].mxu1 %v10203_v54  ;;  %v10236_v11 = vand.u32 4294901760, %v10227_v15 }
  0xed   : > { %8305 = vmatprep.mubr.f32.mxu1 %v10208_v35  ;;  %v10827_v16 = vand.u32 4294901760, %v10294_v34 }
  0xee   : > { %8689 = vmatmul.mubr.f32.vlgmr.msra.gmra.mrb[0].mxu0 %v9817_v29 }
  0xef   : > { %8691 = vmatprep.mubr.f32.mxu0 %v9830_v32  ;;  %8701 = vmatpush3.msra.mxu0 %v9953_v12  ;;  %v7618_v12 = vld [vmem:[%s9401_s10 + $0x20] sm:$0xff] }
  0xf0   : > { %8306 = vmatmul.mubr.f32.gmra.mrb[6].mxu1 %v10215_v1  ;;  %8714 = vmatprep.subr.mxu0 %v10217_v52  ;;  %v5884_v58 = vsel %vm358_vm1, %v7618_v12, 0  ;;  %v10261_v12 = vand.u32 4294901760, %v5887_v19 }
  0xf1   : > { %8310 = vmatprep.mubr.f32.mxu1 %v10068_v39  ;;  %v10258_v57 = vand.u32 4294901760, %v5884_v58 }
  0xf2   : > { %8692 = vmatmul.mubr.f32.gmra.mrb[2].mxu0 %v9837_v2  ;;  %v10279_v25 = vsub.f32 %v5887_v19, %v10261_v12 }
  0xf3   : > { %8694 = vmatprep.mubr.f32.mxu0 %v9854_v14 }
  0xf4   : > { %8311 = vmatmul.mubr.f32.vlgmr.msra.gmra.mrb[0].mxu1 %v10085_v9 }
  0xf5   : > { %8323 = vmatpush3.msra.mxu1 %v10054_v41  ;;  %8313 = vmatprep.mubr.f32.mxu1 %v10088_v60  ;;  %v6057_v41 = vsub.f32 %v10227_v15, %v10236_v11 }
  0xf6   : > { %8695 = vmatmul.mubr.f32.gmra.mrb[4].mxu0 %v9863_v61  ;;  %8336 = vmatprep.subr.mxu1 %v10044_v36 }
  0xf7   : > { %8697 = vmatprep.mubr.f32.mxu0 %v9878_v43  ;;  %v6058_v30 = vand.u32 4294901760, %v6057_v41  ;;  %v5896_v41 = vsel %vm358_vm1, %v7622_v56, 0 }
  0xf8   : > { %8314 = vmatmul.mubr.f32.gmra.mrb[2].mxu1 %v10101_v55  ;;  %v10296_v56 = vand.u32 4294901760, %v5896_v41 }
  0xf9   : > { %8316 = vmatprep.mubr.f32.mxu1 %v10108_v7 }
  0xfa   : > { %8698 = vmatmul.mubr.f32.gmra.mrb[6].mxu0 %v9998_v28  ;;  %v10316_v40 = vsub.f32 %v5896_v41, %v10296_v56 }
  0xfb   : > { %8702 = vmatprep.mubr.f32.mxu0 %v9814_v0  ;;  %v10272_v0 = vsub.f32 %v5884_v58, %v10258_v57  ;;  %v7624_v58 = vld [vmem:[%s9401_s10 + $0x80] sm:$0xff] }
  0xfc   : > { %8317 = vmatmul.mubr.f32.gmra.mrb[4].mxu1 %v10125_v53 }
  0xfd   : > { %8319 = vmatprep.mubr.f32.mxu1 %v10134_v23  ;;  %v10820_v19 = vand.u32 4294901760, %v10272_v0 }
  0xfe   : > { %8703 = vmatmul.mubr.f32.vlgmr.msra.gmra.mrb[0].mxu0 %v9817_v29  ;;  %v5899_v29 = vsel %vm358_vm1, %v7623_v44, 0  ;;  %v10821_v44 = vand.u32 4294901760, %v10279_v25 }
  0xff   : > { %8705 = vmatprep.mubr.f32.mxu0 %v9830_v32  ;;  %8715 = vmatpush3.msra.mxu0 %v10217_v52  ;;  %v5976_v32 = vsub.f32 %v10256_v24, %v10818_v10  ;;  %v10303_v6 = vand.u32 4294901760, %v5899_v29 }
 0x100   : > { %8320 = vmatmul.mubr.f32.gmra.mrb[6].mxu1 %v10148_v21  ;;  %8728 = vmatprep.subr.mxu0 %v6058_v30 }
 0x101   : > { %8324 = vmatprep.mubr.f32.mxu1 %v10082_v4  ;;  %v5977_v10 = vand.u32 4294901760, %v5976_v32  ;;  %v10826_v32 = vand.u32 4294901760, %v10316_v40 }
 0x102   : > { %8706 = vmatmul.mubr.f32.gmra.mrb[2].mxu0 %v9837_v2  ;;  %v5902_v2 = vsel %vm358_vm1, %v7624_v58, 0 }
 0x103   : > { %8708 = vmatprep.mubr.f32.mxu0 %v9854_v14  ;;  %v5986_v14 = vsub.f32 %v10272_v0, %v10820_v19  ;;  %v10318_v58 = vand.u32 4294901760, %v5902_v2  ;;  %v10326_v19 = vsub.f32 %v5899_v29, %v10303_v6  ;;  %v10888_v29 = vand.u32 4294901760, %v10301_v33 }
 0x104   : > { %8325 = vmatmul.mubr.f32.vlgmr.msra.gmra.mrb[0].mxu1 %v10099_v37 }
 0x105   : > { %8337 = vmatpush3.msra.mxu1 %v10044_v36  ;;  %8327 = vmatprep.mubr.f32.mxu1 %v10106_v48  ;;  %v5987_v41 = vand.u32 4294901760, %v5986_v14  ;;  %v6026_v14 = vsub.f32 %v10316_v40, %v10826_v32  ;;  %v2705_v32 = vld [vmem:[%s9601_s18 + $0x50] sm:$0xff] }
 0x106   : > { %8709 = vmatmul.mubr.f32.gmra.mrb[4].mxu0 %v9863_v61  ;;  %8350 = vmatprep.subr.mxu1 %v10062_v22  ;;  %v5996_v61 = vsub.f32 %v10279_v25, %v10821_v44  ;;  %v10336_v44 = vsub.f32 %v5902_v2, %v10318_v58 }
 0x107   : > { %8711 = vmatprep.mubr.f32.mxu0 %v9878_v43  ;;  %v6006_v43 = vsub.f32 %v10294_v34, %v10827_v16 }
 0x108   : > { %8328 = vmatmul.mubr.f32.gmra.mrb[2].mxu1 %v10123_v31  ;;  %v5997_v8 = vand.u32 4294901760, %v5996_v61  ;;  %v6016_v31 = vsub.f32 %v10301_v33, %v10888_v29  ;;  %v10824_v2 = vand.u32 4294901760, %v10336_v44 }
 0x109   : > { %8330 = vmatprep.mubr.f32.mxu1 %v10132_v27  ;;  %v10825_v27 = vand.u32 4294901760, %v10326_v19 }
 0x10a   : > { %8712 = vmatmul.mubr.f32.gmra.mrb[6].mxu0 %v9998_v28  ;;  %v6007_v28 = vand.u32 4294901760, %v6006_v43  ;;  %v6027_v43 = vand.u32 4294901760, %v6026_v14  ;;  %v6046_v29 = vsub.f32 %v10336_v44, %v10824_v2 }
 0x10b   : > { %8716 = vmatprep.mubr.f32.mxu0 %v5977_v10  ;;  %v6017_v10 = vand.u32 4294901760, %v6016_v31  ;;  %v6036_v61 = vsub.f32 %v10326_v19, %v10825_v27 }
 0x10c   : > { %8331 = vmatmul.mubr.f32.gmra.mrb[4].mxu1 %v10146_v26 }
 0x10d   : > { %8333 = vmatprep.mubr.f32.mxu1 %v10157_v62 }
 0x10e   : > { %8717 = vmatmul.mubr.f32.vlgmr.msra.gmra.mrb[0].mxu0 %v5987_v41  ;;  %v10889_v41 = vand.u32 4294901760, %v10082_v4 }
 0x10f   : > { %8719 = vmatprep.mubr.f32.mxu0 %v5997_v8  ;;  %8729 = vmatpush3.msra.mxu0 %v6058_v30  ;;  %v6037_v8 = vand.u32 4294901760, %v6036_v61  ;;  %v6047_v30 = vand.u32 4294901760, %v6046_v29  ;;  %v2702_v61 = vld [vmem:[%s9601_s18 + $0x20] sm:$0xff] }
 0x110   : > { %8334 = vmatmul.mubr.f32.gmra.mrb[6].mxu1 %v10171_v5  ;;  %8742 = vmatprep.subr.mxu0 %v10227_v15 }
 0x111   : > { %8338 = vmatprep.mubr.f32.mxu1 %v10889_v41 }
 0x112   : > { %8720 = vmatmul.mubr.f32.gmra.mrb[2].mxu0 %v6007_v28 }
 0x113   : > { %8722 = vmatprep.mubr.f32.mxu0 %v6017_v10  ;;  %v2701_v10 = vld [vmem:[%s9601_s18 + $0x10] sm:$0xff] }
 0x114   : > { %8339 = vmatmul.mubr.f32.vlgmr.msra.gmra.mrb[0].mxu1 %v10120_v50 }
 0x115   : > { %8351 = vmatpush3.msra.mxu1 %v10062_v22  ;;  %8341 = vmatprep.mubr.f32.mxu1 %v10129_v18  ;;  %v7605_v22 = vld [vmem:[%s10763_s4 + $0xc] sm:$0xf] }
 0x116   : > { %8723 = vmatmul.mubr.f32.gmra.mrb[4].mxu0 %v6027_v43  ;;  %8364 = vmatprep.subr.mxu1 %v10044_v36  ;;  %v2735_v4 = vsel %vm383_vm0, %v7605_v22, 0  ;;  %v2714_v43 = vsel %vm358_vm1, %v2701_v10, 0  ;;  %v2704_v22 = vld [vmem:[%s9601_s18 + $0x40] sm:$0xff] }
 0x117   : > { %8725 = vmatprep.mubr.f32.mxu0 %v6037_v8  ;;  %v10378_v31 = vand.u32 4294901760, %v2735_v4  ;;  %v2717_v8 = vsel %vm358_vm1, %v2702_v61, 0  ;;  %v2723_v27 = vsel %vm358_vm1, %v2704_v22, 0  ;;  %v2726_v22 = vsel %vm358_vm1, %v2705_v32, 0 }
 0x118   : > { %8342 = vmatmul.mubr.f32.gmra.mrb[2].mxu1 %v10143_v13  ;;  %v10422_v10 = vand.u32 4294901760, %v2717_v8  ;;  %v10457_v32 = vand.u32 4294901760, %v2726_v22 }
 0x119   : > { %8344 = vmatprep.mubr.f32.mxu1 %v10154_v63  ;;  %v10388_v28 = vsub.f32 %v2735_v4, %v10378_v31 }
 0x11a   : > { %8726 = vmatmul.mubr.f32.gmra.mrb[6].mxu0 %v6047_v30  ;;  %v2703_v30 = vld [vmem:[%s9601_s18 + $0x30] sm:$0xff] }
 0x11b   : > { %8730 = vmatprep.mubr.f32.mxu0 %v10243_v59  ;;  %v2720_v61 = vsel %vm358_vm1, %v2703_v30, 0  ;;  %v10442_v30 = vand.u32 4294901760, %v2723_v27 }
 0x11c   : > { %8345 = vmatmul.mubr.f32.gmra.mrb[4].mxu1 %v10168_v51 }
 0x11d   : > { %8347 = vmatprep.mubr.f32.mxu1 %v10179_v46  ;;  %v10462_v13 = vsub.f32 %v2723_v27, %v10442_v30  ;;  %v10476_v27 = vsub.f32 %v2726_v22, %v10457_v32  ;;  %v10894_v22 = vand.u32 4294901760, %v10279_v25 }
 0x11e   : > { %8731 = vmatmul.mubr.f32.vlgmr.msra.gmra.mrb[0].mxu0 %v10258_v57 }
 0x11f   : > { %8733 = vmatprep.mubr.f32.mxu0 %v10261_v12  ;;  %8743 = vmatpush3.msra.mxu0 %v10227_v15  ;;  %v2700_v15 = vld [vmem:[%s9601_s18] sm:$0xff] }
 0x120   : > { %8348 = vmatmul.mubr.f32.gmra.mrb[6].mxu1 %v10189_v17  ;;  %8756 = vmatprep.subr.mxu0 %v10217_v52  ;;  %v2711_v14 = vsel %vm358_vm1, %v2700_v15, 0  ;;  %v10419_v15 = vand.u32 4294901760, %v2714_v43  ;;  %v10435_v17 = vand.u32 4294901760, %v2720_v61 }
 0x121   : > { %8352 = vmatprep.mubr.f32.mxu1 %v10068_v39  ;;  %v10402_v41 = vand.u32 4294901760, %v2711_v14 }
 0x122   : > { %8734 = vmatmul.mubr.f32.gmra.mrb[2].mxu0 %v10274_v38  ;;  %v10455_v63 = vsub.f32 %v2720_v61, %v10435_v17 }
 0x123   : > { %8736 = vmatprep.mubr.f32.mxu0 %v10281_v45  ;;  %v10416_v4 = vsub.f32 %v2711_v14, %v10402_v41  ;;  %v2706_v14 = vld [vmem:[%s9601_s18 + $0x60] sm:$0xff] }
 0x124   : > { %8353 = vmatmul.mubr.f32.vlgmr.msra.gmra.mrb[0].mxu1 %v10085_v9  ;;  %v2729_v16 = vsel %vm358_vm1, %v2706_v14, 0  ;;  %v10839_v14 = vand.u32 4294901760, %v10455_v63 }
 0x125   : > { %8365 = vmatpush3.msra.mxu1 %v10044_v36  ;;  %8355 = vmatprep.mubr.f32.mxu1 %v10088_v60  ;;  %v10396_v36 = vand.u32 4294901760, %v10388_v28  ;;  %v10890_v46 = vand.u32 4294901760, %v10416_v4  ;;  %v10464_v18 = vand.u32 4294901760, %v2729_v16 }
 0x126   : > { %8737 = vmatmul.mubr.f32.gmra.mrb[4].mxu0 %v10296_v56  ;;  %8378 = vmatprep.subr.mxu1 %v10378_v31 }
 0x127   : > { %8739 = vmatprep.mubr.f32.mxu0 %v10303_v6  ;;  %v2887_v29 = vsub.f32 %v10388_v28, %v10396_v36  ;;  %v2806_v51 = vsub.f32 %v10416_v4, %v10890_v46  ;;  %v10891_v46 = vand.u32 4294901760, %v10256_v24  ;;  %v10486_v26 = vsub.f32 %v2729_v16, %v10464_v18 }
 0x128   : > { %8356 = vmatmul.mubr.f32.gmra.mrb[2].mxu1 %v10101_v55 }
 0x129   : > { %8358 = vmatprep.mubr.f32.mxu1 %v10108_v7  ;;  %v2888_v2 = vand.u32 4294901760, %v2887_v29  ;;  %v10440_v29 = vsub.f32 %v2717_v8, %v10422_v10 }
 0x12a   : > { %8740 = vmatmul.mubr.f32.gmra.mrb[6].mxu0 %v10318_v58 }
 0x12b   : > { %8744 = vmatprep.mubr.f32.mxu0 %v10256_v24  ;;  %v10892_v62 = vand.u32 4294901760, %v10440_v29 }
 0x12c   : > { %8359 = vmatmul.mubr.f32.gmra.mrb[4].mxu1 %v10125_v53 }
 0x12d   : > { %8361 = vmatprep.mubr.f32.mxu1 %v10134_v23  ;;  %v2826_v24 = vsub.f32 %v10440_v29, %v10892_v62  ;;  %v2836_v62 = vsub.f32 %v10455_v63, %v10839_v14 }
 0x12e   : > { %8745 = vmatmul.mubr.f32.vlgmr.msra.gmra.mrb[0].mxu0 %v10272_v0 }
 0x12f   : > { %8747 = vmatprep.mubr.f32.mxu0 %v10279_v25  ;;  %8757 = vmatpush3.msra.mxu0 %v10217_v52  ;;  %v10895_v25 = vand.u32 4294901760, %v10462_v13  ;;  %v2837_v14 = vand.u32 4294901760, %v2836_v62 }
 0x130   : > { %8362 = vmatmul.mubr.f32.gmra.mrb[6].mxu1 %v10148_v21  ;;  %8770 = vmatprep.subr.mxu0 %v10236_v11 }
 0x131   : > { %8366 = vmatprep.mubr.f32.mxu1 %v10068_v39  ;;  %v10433_v39 = vsub.f32 %v2714_v43, %v10419_v15  ;;  %v2707_v43 = vld [vmem:[%s9601_s18 + $0x70] sm:$0xff] }
 0x132   : > { %8748 = vmatmul.mubr.f32.gmra.mrb[2].mxu0 %v10294_v34  ;;  %v2732_v50 = vsel %vm358_vm1, %v2707_v43, 0  ;;  %v2807_v43 = vand.u32 4294901760, %v2806_v51 }
 0x133   : > { %8750 = vmatprep.mubr.f32.mxu0 %v10301_v33  ;;  %v10838_v8 = vand.u32 4294901760, %v10433_v39  ;;  %v10478_v5 = vand.u32 4294901760, %v2732_v50 }
 0x134   : > { %8367 = vmatmul.mubr.f32.vlgmr.msra.gmra.mrb[0].mxu1 %v10085_v9 }
 0x135   : > { %8379 = vmatpush3.msra.mxu1 %v10378_v31  ;;  %8369 = vmatprep.mubr.f32.mxu1 %v10088_v60  ;;  %v2816_v61 = vsub.f32 %v10433_v39, %v10838_v8  ;;  %v10893_v8 = vand.u32 4294901760, %v10272_v0  ;;  %v10499_v16 = vsub.f32 %v2732_v50, %v10478_v5  ;;  %v2827_v0 = vand.u32 4294901760, %v2826_v24 }
 0x136   : > { %8751 = vmatmul.mubr.f32.gmra.mrb[4].mxu0 %v10316_v40  ;;  %8392 = vmatprep.subr.mxu1 %v2888_v2 }
 0x137   : > { %8753 = vmatprep.mubr.f32.mxu0 %v10326_v19  ;;  %v2817_v51 = vand.u32 4294901760, %v2816_v61  ;;  %v10896_v61 = vand.u32 4294901760, %v10294_v34  ;;  %v10898_v34 = vand.u32 4294901760, %v10316_v40 }
 0x138   : > { %8370 = vmatmul.mubr.f32.gmra.mrb[2].mxu1 %v10101_v55 }
 0x139   : > { %8372 = vmatprep.mubr.f32.mxu1 %v10108_v7 }
 0x13a   : > { %8754 = vmatmul.mubr.f32.gmra.mrb[6].mxu0 %v10336_v44 }
 0x13b   : > { %8758 = vmatprep.mubr.f32.mxu0 %v10891_v46  ;;  %v2855_v46 = vand.u32 4294901760, %v10476_v27 }
 0x13c   : > { %8373 = vmatmul.mubr.f32.gmra.mrb[4].mxu1 %v10125_v53 }
 0x13d   : > { %8375 = vmatprep.mubr.f32.mxu1 %v10134_v23  ;;  %v2856_v50 = vsub.f32 %v10476_v27, %v2855_v46 }
 0x13e   : > { %8759 = vmatmul.mubr.f32.vlgmr.msra.gmra.mrb[0].mxu0 %v10893_v8  ;;  %v2865_v8 = vand.u32 4294901760, %v10486_v26 }
 0x13f   : > { %8761 = vmatprep.mubr.f32.mxu0 %v10894_v22  ;;  %8771 = vmatpush3.msra.mxu0 %v10236_v11  ;;  %v2846_v11 = vsub.f32 %v10462_v13, %v10895_v25  ;;  %v10897_v22 = vand.u32 4294901760, %v10301_v33  ;;  %v7634_v33 = vld [vmem:[%s10763_s4 + $0x20] sm:$0xf] }
 0x140   : > { %8376 = vmatmul.mubr.f32.gmra.mrb[6].mxu1 %v10148_v21  ;;  %8784 = vmatprep.subr.mxu0 %v10217_v52  ;;  %v2866_v25 = vsub.f32 %v10486_v26, %v2865_v8  ;;  %v6697_v40 = vsel %vm383_vm0, %v7634_v33, 0  ;;  %v10927_v33 = vld [vmem:[#allocation28_spill] sm:$0xff] }
 0x141   : > { %8380 = vmatprep.mubr.f32.mxu1 %v2807_v43  ;;  %v2875_v43 = vand.u32 4294901760, %v10499_v16  ;;  %v2847_v24 = vand.u32 4294901760, %v2846_v11  ;;  %v10900_v11 = vand.u32 4294901760, %v10336_v44 }
 0x142   : > { %8762 = vmatmul.mubr.f32.gmra.mrb[2].mxu0 %v10896_v61 }
 0x143   : > { %8764 = vmatprep.mubr.f32.mxu0 %v10897_v22  ;;  %v2876_v62 = vsub.f32 %v10499_v16, %v2875_v43  ;;  %v10532_v22 = vand.u32 4294901760, %v6697_v40 }
 0x144   : > { %8381 = vmatmul.mubr.f32.vlgmr.msra.gmra.mrb[0].mxu1 %v2817_v51  ;;  %v10899_v51 = vand.u32 4294901760, %v10326_v19 }
 0x145   : > { %8393 = vmatpush3.msra.mxu1 %v2888_v2  ;;  %8383 = vmatprep.mubr.f32.mxu1 %v2827_v0  ;;  %v2857_v2 = vand.u32 4294901760, %v2856_v50  ;;  %v2867_v0 = vand.u32 4294901760, %v2866_v25  ;;  %v2877_v61 = vand.u32 4294901760, %v2876_v62  ;;  %v10539_v19 = vsub.f32 %v6697_v40, %v10532_v22  ;;  %v10930_v40 = vld [vmem:[#allocation17_spill] sm:$0xff] }
 0x146   : > { %8765 = vmatmul.mubr.f32.gmra.mrb[4].mxu0 %v10898_v34  ;;  %8406 = vmatprep.subr.mxu1 %v10388_v28  ;;  %v10926_v34 = vld [vmem:[#allocation26_spill] sm:$0xff] }
 0x147   : > { %8767 = vmatprep.mubr.f32.mxu0 %v10899_v51  ;;  %v10546_v44 = vand.u32 4294901760, %v10539_v19 }
 0x148   : > { %8384 = vmatmul.mubr.f32.gmra.mrb[2].mxu1 %v2837_v14  ;;  %v7633_v14 = vld [vmem:[%s9773_s23 + $0x81] sm:$0xff] }
 0x149   : > { %8386 = vmatprep.mubr.f32.mxu1 %v2847_v24 }
 0x14a   : > { %8768 = vmatmul.mubr.f32.gmra.mrb[6].mxu0 %v10900_v11  ;;  %v10931_v11 = vand.u32 4294901760, %v10930_v40 }
 0x14b   : > { %8772 = vmatprep.mubr.f32.mxu0 %v10243_v59 }
 0x14c   : > { %8387 = vmatmul.mubr.f32.gmra.mrb[4].mxu1 %v2857_v2  ;;  %v10928_v2 = vld [vmem:[#allocation15_spill] sm:$0xff] }
 0x14d   : > { %8389 = vmatprep.mubr.f32.mxu1 %v2867_v0 }
 0x14e   : > { %8773 = vmatmul.mubr.f32.vlgmr.msra.gmra.mrb[0].mxu0 %v10258_v57 }
 0x14f   : > { %8775 = vmatprep.mubr.f32.mxu0 %v10261_v12  ;;  %8785 = vmatpush3.msra.mxu0 %v10217_v52  ;;  %v6849_v52 = vsub.f32 %v10539_v19, %v10546_v44 }
 0x150   : > { %8390 = vmatmul.mubr.f32.gmra.mrb[6].mxu1 %v2877_v61  ;;  %8798 = vmatprep.subr.mxu0 %v10532_v22  ;;  %v3658_v61 = vsub.f32 %v10930_v40, %v10931_v11 }
 0x151   : > { %8394 = vmatprep.mubr.f32.mxu1 %v10402_v41 }
 0x152   : > { %8776 = vmatmul.mubr.f32.gmra.mrb[2].mxu0 %v10274_v38 }
 0x153   : > { %8778 = vmatprep.mubr.f32.mxu0 %v10281_v45 }
 0x154   : > { %8395 = vmatmul.mubr.f32.vlgmr.msra.gmra.mrb[0].mxu1 %v10419_v15 }
 0x155   : > { %8407 = vmatpush3.msra.mxu1 %v10388_v28  ;;  %8397 = vmatprep.mubr.f32.mxu1 %v10422_v10  ;;  %v6850_v28 = vand.u32 4294901760, %v6849_v52 }
 0x156   : > { %8779 = vmatmul.mubr.f32.gmra.mrb[4].mxu0 %v10296_v56  ;;  %8420 = vmatprep.subr.mxu1 %v10378_v31 }
 0x157   : > { %8781 = vmatprep.mubr.f32.mxu0 %v10303_v6 }
 0x158   : > { %8398 = vmatmul.mubr.f32.gmra.mrb[2].mxu1 %v10435_v17 }
 0x159   : > { %8400 = vmatprep.mubr.f32.mxu1 %v10442_v30 }
 0x15a   : > { %8782 = vmatmul.mubr.f32.gmra.mrb[6].mxu0 %v10318_v58 }
 0x15b   : > { %8786 = vmatprep.mubr.f32.mxu0 %v10243_v59  ;;  %v6694_v59 = vsel %vm358_vm1, %v7633_v14, 0 }
 0x15c   : > { %8401 = vmatmul.mubr.f32.gmra.mrb[4].mxu1 %v10457_v32 }
 0x15d   : > { %8403 = vmatprep.mubr.f32.mxu1 %v10464_v18 }
 0x15e   : > { %8787 = vmatmul.mubr.f32.vlgmr.msra.gmra.mrb[0].mxu0 %v10258_v57  ;;  %v10575_v57 = vand.u32 4294901760, %v6694_v59 }
 0x15f   : > { %8789 = vmatprep.mubr.f32.mxu0 %v10261_v12  ;;  %8799 = vmatpush3.msra.mxu0 %v10532_v22 }
 0x160   : > { %8404 = vmatmul.mubr.f32.gmra.mrb[6].mxu1 %v10478_v5  ;;  %8812 = vmatprep.subr.mxu0 %v6850_v28 }
 0x161   : > { %8408 = vmatprep.mubr.f32.mxu1 %v10416_v4 }
 0x162   : > { %8790 = vmatmul.mubr.f32.gmra.mrb[2].mxu0 %v10274_v38  ;;  %v10582_v38 = vsub.f32 %v6694_v59, %v10575_v57 }
 0x163   : > { %8792 = vmatprep.mubr.f32.mxu0 %v10281_v45 }
 0x164   : > { %8409 = vmatmul.mubr.f32.vlgmr.msra.gmra.mrb[0].mxu1 %v10433_v39  ;;  %v6837_v12 = vand.u32 4294901760, %v10582_v38 }
 0x165   : > { %8421 = vmatpush3.msra.mxu1 %v10378_v31  ;;  %8411 = vmatprep.mubr.f32.mxu1 %v10440_v29 }
 0x166   : > { %8793 = vmatmul.mubr.f32.gmra.mrb[4].mxu0 %v10296_v56  ;;  %8434 = vmatprep.subr.mxu1 %v10396_v36  ;;  %v10910_v56 = vld [vmem:[#allocation25_spill] sm:$0xff] }
 0x167   : > { %8795 = vmatprep.mubr.f32.mxu0 %v10303_v6  ;;  %v10901_v6 = vand.u32 4294901760, %v10416_v4  ;;  %v10915_v4 = vld [vmem:[#allocation20_spill] sm:$0xff] }
 0x168   : > { %8412 = vmatmul.mubr.f32.gmra.mrb[2].mxu1 %v10455_v63 }
 0x169   : > { %8414 = vmatprep.mubr.f32.mxu1 %v10462_v13 }
 0x16a   : > { %8796 = vmatmul.mubr.f32.gmra.mrb[6].mxu0 %v10318_v58  ;;  %v10912_v58 = vld [vmem:[#allocation29_spill] sm:$0xff] }
 0x16b   : > { %8800 = vmatprep.mubr.f32.mxu0 %v10163_v20  ;;  %v6838_v20 = vsub.f32 %v10582_v38, %v6837_v12 }
 0x16c   : > { %8415 = vmatmul.mubr.f32.gmra.mrb[4].mxu1 %v10476_v27 }
 0x16d   : > { %8417 = vmatprep.mubr.f32.mxu1 %v10486_v26  ;;  %v6839_v45 = vand.u32 4294901760, %v6838_v20  ;;  %v10907_v26 = vld [vmem:[#allocation2_spill] sm:$0xff] }
 0x16e   : > { %8801 = vmatmul.mubr.f32.vlgmr.msra.gmra.mrb[0].mxu0 %v10174_v49  ;;  %v10902_v49 = vand.u32 4294901760, %v10433_v39 }
 0x16f   : > { %8803 = vmatprep.mubr.f32.mxu0 %v10184_v47  ;;  %8813 = vmatpush3.msra.mxu0 %v6850_v28  ;;  %v10903_v47 = vand.u32 4294901760, %v10440_v29  ;;  %v10934_v28 = vld [vmem:[#allocation19_spill] sm:$0xff] }
 0x170   : > { %8418 = vmatmul.mubr.f32.gmra.mrb[6].mxu1 %v10499_v16  ;;  %8826 = vmatprep.subr.mxu0 %v10539_v19  ;;  %v10935_v14 = vand.u32 4294901760, %v10934_v28 }
 0x171   : > { %8422 = vmatprep.mubr.f32.mxu1 %v10901_v6  ;;  %v3659_v6 = vand.u32 4294901760, %v3658_v61 }
 0x172   : > { %8804 = vmatmul.mubr.f32.gmra.mrb[2].mxu0 %v10192_v42  ;;  %v10904_v42 = vand.u32 4294901760, %v10455_v63  ;;  %v3668_v59 = vsub.f32 %v10934_v28, %v10935_v14 }
 0x173   : > { %8806 = vmatprep.mubr.f32.mxu0 %v10203_v54  ;;  %v10905_v54 = vand.u32 4294901760, %v10462_v13  ;;  %v10906_v13 = vld [vmem:[#allocation3_spill] sm:$0xff] }
 0x174   : > { %8423 = vmatmul.mubr.f32.vlgmr.msra.gmra.mrb[0].mxu1 %v10902_v49  ;;  %v3679_v63 = vsub.f32 %v10907_v26, %v10906_v13  ;;  %v3669_v20 = vand.u32 4294901760, %v3668_v59  ;;  %v10936_v49 = vld [vmem:[#allocation4_spill] sm:$0xff] }
 0x175   : > { %8435 = vmatpush3.msra.mxu1 %v10396_v36  ;;  %8425 = vmatprep.mubr.f32.mxu1 %v10903_v47  ;;  %v10939_v47 = vld [vmem:[#allocation9_spill] sm:$0xff] }
 0x176   : > { %8807 = vmatmul.mubr.f32.gmra.mrb[4].mxu0 %v10208_v35  ;;  %8448 = vmatprep.subr.mxu1 %v10378_v31  ;;  %v10908_v35 = vld [vmem:[#allocation21_spill] sm:$0xff] }
 0x177   : > { %8809 = vmatprep.mubr.f32.mxu0 %v10215_v1  ;;  %v3680_v1 = vand.u32 4294901760, %v3679_v63 }
 0x178   : > { %8426 = vmatmul.mubr.f32.gmra.mrb[2].mxu1 %v10904_v42  ;;  %v10942_v42 = vld [vmem:[#allocation16_spill] sm:$0xff] }
 0x179   : > { %8428 = vmatprep.mubr.f32.mxu1 %v10905_v54  ;;  %v10943_v54 = vld [vmem:[#allocation18_spill] sm:$0xff] }
 0x17a   : > { %8810 = vmatmul.mubr.f32.gmra.mrb[6].mxu0 %v6839_v45  ;;  %v10941_v45 = vld [vmem:[#allocation14_spill] sm:$0xff] }
 0x17b   : > { %8814 = vmatprep.mubr.f32.mxu0 %v10085_v9 }
 0x17c   : > { %8429 = vmatmul.mubr.f32.gmra.mrb[4].mxu1 %v2855_v46  ;;  %v10920_v46 = vld [vmem:[#allocation22_spill] sm:$0xff] }
 0x17d   : > { %8431 = vmatprep.mubr.f32.mxu1 %v2865_v8  ;;  %v10922_v8 = vld [vmem:[#allocation11_spill] sm:$0xff] }
 0x17e   : > { %8815 = vmatmul.mubr.f32.vlgmr.msra.gmra.mrb[0].mxu0 %v10088_v60  ;;  %v10923_v50 = vand.u32 4294901760, %v10922_v8 }
 0x17f   : > { %8817 = vmatprep.mubr.f32.mxu0 %v10101_v55  ;;  %8827 = vmatpush3.msra.mxu0 %v10539_v19  ;;  %v10932_v19 = vld [vmem:[#allocation30_spill] sm:$0xff] }
 0x180   : > { %8432 = vmatmul.mubr.f32.gmra.mrb[6].mxu1 %v2875_v43  ;;  %8840 = vmatprep.subr.mxu0 %v10532_v22  ;;  %v10924_v43 = vld [vmem:[#allocation13_spill] sm:$0xff] }
 0x181   : > { %8436 = vmatprep.mubr.f32.mxu1 %v10402_v41  ;;  %v10925_v24 = vand.u32 4294901760, %v10924_v43 }
 0x182   : > { %8818 = vmatmul.mubr.f32.gmra.mrb[2].mxu0 %v10108_v7 }
 0x183   : > { %8820 = vmatprep.mubr.f32.mxu0 %v10125_v53  ;;  %v3638_v25 = vsub.f32 %v10924_v43, %v10925_v24 }
 0x184   : > { %8437 = vmatmul.mubr.f32.vlgmr.msra.gmra.mrb[0].mxu1 %v10419_v15 }
 0x185   : > { %8449 = vmatpush3.msra.mxu1 %v10378_v31  ;;  %8439 = vmatprep.mubr.f32.mxu1 %v10422_v10  ;;  %v10913_v31 = vld [vmem:[#allocation7_spill] sm:$0xff]  ;;  %v3639_v0 = vand.u32 4294901760, %v3638_v25 }
 0x186   : > { %8821 = vmatmul.mubr.f32.gmra.mrb[4].mxu0 %v10134_v23  ;;  %8462 = vmatprep.subr.mxu1 %v9378_v3  ;;  %v10914_v36 = vand.u32 4294901760, %v10913_v31 }
 0x187   : > { %8823 = vmatprep.mubr.f32.mxu0 %v10148_v21 }
 0x188   : > { %8440 = vmatmul.mubr.f32.gmra.mrb[2].mxu1 %v10435_v17 }
 0x189   : > { %8442 = vmatprep.mubr.f32.mxu1 %v10442_v30 }
 0x18a   : > { %8824 = vmatmul.mubr.f32.gmra.mrb[6].mxu0 %v10575_v57 }
 0x18b   : > { %8828 = vmatprep.mubr.f32.mxu0 %v10099_v37  ;;  %v10909_v37 = vld [vmem:[#allocation23_spill] sm:$0xff] }
 0x18c   : > { %8443 = vmatmul.mubr.f32.gmra.mrb[4].mxu1 %v10457_v32 }
 0x18d   : > { %8445 = vmatprep.mubr.f32.mxu1 %v10464_v18 }
 0x18e   : > { %8829 = vmatmul.mubr.f32.vlgmr.msra.gmra.mrb[0].mxu0 %v10106_v48  ;;  %v10911_v48 = vld [vmem:[#allocation27_spill] sm:$0xff] }
 0x18f   : > { %8831 = vmatprep.mubr.f32.mxu0 %v10908_v35  ;;  %8841 = vmatpush3.msra.mxu0 %v10532_v22 }
 0x190   : > { %8446 = vmatmul.mubr.f32.gmra.mrb[6].mxu1 %v10478_v5  ;;  %8854 = vmatprep.subr.mxu0 %v10546_v44 }
 0x191   : > { %8450 = vmatprep.mubr.f32.mxu1 %v10402_v41  ;;  %v3598_v41 = vsub.f32 %v10913_v31, %v10914_v36 }
 0x192   : > { %8832 = vmatmul.mubr.f32.gmra.mrb[2].mxu0 %v10909_v37 }
 0x193   : > { %8834 = vmatprep.mubr.f32.mxu0 %v10910_v56  ;;  %v3599_v39 = vand.u32 4294901760, %v3598_v41 }
 0x194   : > { %8451 = vmatmul.mubr.f32.vlgmr.msra.gmra.mrb[0].mxu1 %v10419_v15 }
 0x195   : > { %8463 = vmatpush3.msra.mxu1 %v9378_v3  ;;  %8453 = vmatprep.mubr.f32.mxu1 %v10422_v10  ;;  %v10916_v3 = vld [vmem:[#allocation8_spill] sm:$0xff] }
 0x196   : > { %8835 = vmatmul.mubr.f32.gmra.mrb[4].mxu0 %v10911_v48  ;;  %8476 = vmatprep.subr.mxu1 %v3680_v1  ;;  %v10917_v15 = vand.u32 4294901760, %v10916_v3 }
 0x197   : > { %8837 = vmatprep.mubr.f32.mxu0 %v10912_v58 }
 0x198   : > { %8454 = vmatmul.mubr.f32.gmra.mrb[2].mxu1 %v10435_v17  ;;  %v3608_v10 = vsub.f32 %v10916_v3, %v10917_v15  ;;  %v10918_v17 = vld [vmem:[#allocation10_spill] sm:$0xff] }
 0x199   : > { %8456 = vmatprep.mubr.f32.mxu1 %v10442_v30  ;;  %v10919_v29 = vand.u32 4294901760, %v10918_v17  ;;  %v10921_v30 = vld [vmem:[#allocation24_spill] sm:$0xff] }
 0x19a   : > { %8838 = vmatmul.mubr.f32.gmra.mrb[6].mxu0 %v10582_v38  ;;  %v3609_v16 = vand.u32 4294901760, %v3608_v10  ;;  %v10937_v38 = vld [vmem:[#allocation5_spill] sm:$0xff] }
 0x19b   : > { %8842 = vmatprep.mubr.f32.mxu0 %v10915_v4  ;;  %v3618_v27 = vsub.f32 %v10918_v17, %v10919_v29 }
 0x19c   : > { %8457 = vmatmul.mubr.f32.gmra.mrb[4].mxu1 %v10457_v32  ;;  %v3628_v32 = vsub.f32 %v10922_v8, %v10923_v50 }
 0x19d   : > { %8459 = vmatprep.mubr.f32.mxu1 %v10464_v18  ;;  %v3619_v18 = vand.u32 4294901760, %v3618_v27 }
 0x19e   : > { %8843 = vmatmul.mubr.f32.vlgmr.msra.gmra.mrb[0].mxu0 %v10920_v46  ;;  %v3629_v51 = vand.u32 4294901760, %v3628_v32 }
 0x19f   : > { %8845 = vmatprep.mubr.f32.mxu0 %v10921_v30  ;;  %8855 = vmatpush3.msra.mxu0 %v10546_v44  ;;  %v10933_v44 = vld [vmem:[#allocation31_spill] sm:$0xff] }
 0x1a0   : > { %8460 = vmatmul.mubr.f32.gmra.mrb[6].mxu1 %v10478_v5  ;;  %8868 = vmatprep.subr.mxu0 %v10532_v22  ;;  %v10929_v5 = vand.u32 4294901760, %v10928_v2 }
 0x1a1   : > { %8464 = vmatprep.mubr.f32.mxu1 %v3599_v39 }
 0x1a2   : > { %8846 = vmatmul.mubr.f32.gmra.mrb[2].mxu0 %v10926_v34  ;;  %v3648_v62 = vsub.f32 %v10928_v2, %v10929_v5 }
 0x1a3   : > { %8848 = vmatprep.mubr.f32.mxu0 %v10927_v33 }
 0x1a4   : > { %8465 = vmatmul.mubr.f32.vlgmr.msra.gmra.mrb[0].mxu1 %v3609_v16  ;;  %v3649_v52 = vand.u32 4294901760, %v3648_v62 }
 0x1a5   : > { %8477 = vmatpush3.msra.mxu1 %v3680_v1  ;;  %8467 = vmatprep.mubr.f32.mxu1 %v3619_v18 }
 0x1a6   : > { %8849 = vmatmul.mubr.f32.gmra.mrb[4].mxu0 %v10932_v19  ;;  %8490 = vmatprep.subr.mxu1 %v10907_v26 }
 0x1a7   : > { %8851 = vmatprep.mubr.f32.mxu0 %v10933_v44 }
 0x1a8   : > { %8468 = vmatmul.mubr.f32.gmra.mrb[2].mxu1 %v3629_v51 }
 0x1a9   : > { %8470 = vmatprep.mubr.f32.mxu1 %v3639_v0 }
 0x1aa   : > { %8852 = vmatmul.mubr.f32.gmra.mrb[6].mxu0 %v6837_v12  ;;  %v10938_v12 = vld [vmem:[#allocation6_spill] sm:$0xff] }
 0x1ab   : > { %8856 = vmatprep.mubr.f32.mxu0 %v10085_v9 }
 0x1ac   : > { %8471 = vmatmul.mubr.f32.gmra.mrb[4].mxu1 %v3649_v52 }
 0x1ad   : > { %8473 = vmatprep.mubr.f32.mxu1 %v3659_v6 }
 0x1ae   : > { %8857 = vmatmul.mubr.f32.vlgmr.msra.gmra.mrb[0].mxu0 %v10088_v60 }
 0x1af   : > { %8859 = vmatprep.mubr.f32.mxu0 %v10101_v55  ;;  %8869 = vmatpush3.msra.mxu0 %v10532_v22  ;;  %v10940_v22 = vld [vmem:[#allocation12_spill] sm:$0xff] }
 0x1b0   : > { %8474 = vmatmul.mubr.f32.gmra.mrb[6].mxu1 %v3669_v20 }
 0x1b1   : > { %8478 = vmatprep.mubr.f32.mxu1 %v10936_v49 }
 0x1b2   : > { %8860 = vmatmul.mubr.f32.gmra.mrb[2].mxu0 %v10108_v7 }
 0x1b3   : > { %8862 = vmatprep.mubr.f32.mxu0 %v10125_v53 }
 0x1b4   : > { %8479 = vmatmul.mubr.f32.vlgmr.msra.gmra.mrb[0].mxu1 %v10937_v38 }
 0x1b5   : > { %8491 = vmatpush3.msra.mxu1 %v10907_v26  ;;  %8481 = vmatprep.mubr.f32.mxu1 %v10938_v12 }
 0x1b6   : > { %8863 = vmatmul.mubr.f32.gmra.mrb[4].mxu0 %v10134_v23 }
 0x1b7   : > { %8865 = vmatprep.mubr.f32.mxu0 %v10148_v21 }
 0x1b8   : > { %8482 = vmatmul.mubr.f32.gmra.mrb[2].mxu1 %v10939_v47 }
 0x1b9   : > { %8484 = vmatprep.mubr.f32.mxu1 %v10940_v22 }
 0x1ba   : > { %8866 = vmatmul.mubr.f32.gmra.mrb[6].mxu0 %v10575_v57 }
 0x1bb   : > { %8870 = vmatprep.mubr.f32.mxu0 %v10085_v9 }
 0x1bc   : > { %8485 = vmatmul.mubr.f32.gmra.mrb[4].mxu1 %v10941_v45 }
 0x1bd   : > { %8487 = vmatprep.mubr.f32.mxu1 %v10942_v42 }
 0x1be   : > { %8871 = vmatmul.mubr.f32.vlgmr.msra.gmra.mrb[0].mxu0 %v10088_v60 }
 0x1bf   : > { %8873 = vmatprep.mubr.f32.mxu0 %v10101_v55 }
 0x1c0   : > { %8488 = vmatmul.mubr.f32.gmra.mrb[6].mxu1 %v10943_v54 }
 0x1c1   : > { %8492 = vmatprep.mubr.f32.mxu1 %v10913_v31 }
 0x1c2   : > { %8874 = vmatmul.mubr.f32.gmra.mrb[2].mxu0 %v10108_v7 }
 0x1c3   : > { %8876 = vmatprep.mubr.f32.mxu0 %v10125_v53 }
 0x1c4   : > { %8493 = vmatmul.mubr.f32.vlgmr.msra.gmra.mrb[0].mxu1 %v10916_v3 }
 0x1c5   : > { %8495 = vmatprep.mubr.f32.mxu1 %v10918_v17 }
 0x1c6   : > { %8877 = vmatmul.mubr.f32.gmra.mrb[4].mxu0 %v10134_v23  ;;  %v7635_v23 = vld [vmem:[%s10764_s5] ss:$0 sm:$0xff] }
 0x1c7   : > { %8879 = vmatprep.mubr.f32.mxu0 %v10148_v21 }
 0x1c8   : > { %8496 = vmatmul.mubr.f32.gmra.mrb[2].mxu1 %v10922_v8 }
 0x1c9   : > { %8498 = vmatprep.mubr.f32.mxu1 %v10924_v43 }
 0x1ca   : > { %8880 = vmatmul.mubr.f32.gmra.mrb[6].mxu0 %v10575_v57  ;;  %v7636_v57 = vld [vmem:[%s10765_s6] ss:$0 sm:$0xff] }
 0x1cc   : > { %8499 = vmatmul.mubr.f32.gmra.mrb[4].mxu1 %v10928_v2 }
 0x1cd   : > { %8501 = vmatprep.mubr.f32.mxu1 %v10930_v40 }
 0x1d0   : > { %8502 = vmatmul.mubr.f32.gmra.mrb[6].mxu1 %v10934_v28 }
 0x291   : > { %v8872_v9 = vpop.f32.mrb[0].mxu0 }
 0x292   : > { %v7400_v60 = vpop.f32.mrb[1].mxu0 }
 0x295   : > { %v8875_v55 = vpop.f32.mrb[2].mxu0 }
 0x296   : > { %v7412_v7 = vpop.f32.mrb[3].mxu0 }
 0x297   : > { %v8494_v53 = vpop.f32.mrb[0].mxu1 }
 0x298   : > { %v8882_v21 = vadd.f32 %v8872_v9, %v8494_v53  ;;  %v3863_v13 = vpop.f32.mrb[1].mxu1 }
 0x299   : > { %v8883_v26 = vadd.f32 %v7400_v60, %v3863_v13  ;;  %v8878_v63 = vpop.f32.mrb[4].mxu0 }
 0x29a   : > { %v7462_v35 = vmul.f32 %v8882_v21, %v7635_v23  ;;  %v7424_v37 = vpop.f32.mrb[5].mxu0 }
 0x29b   : > { %v7461_v1 = vmul.f32 %v8883_v26, %v7635_v23  ;;  %v8497_v56 = vpop.f32.mrb[2].mxu1 }
 0x29c   : > { %v7477_v48 = vadd.f32 %v7636_v57, %v7462_v35  ;;  %v8884_v58 = vadd.f32 %v8875_v55, %v8497_v56  ;;  %v3877_v31 = vpop.f32.mrb[3].mxu1 }
 0x29d   : > { %v7476_v36 = vadd.f32 %v7636_v57, %v7461_v1  ;;  %v8885_v41 = vadd.f32 %v7412_v7, %v3877_v31  ;;  %v8881_v4 = vpop.f32.mrb[6].mxu0 }
 0x29e   : > { %v7485_v3 = vmax.f32 %v7477_v48, 0.0  ;;  %v7464_v15 = vmul.f32 %v8884_v58, %v7635_v23  ;;  %v7436_v10 = vpop.f32.mrb[7].mxu0 }
 0x29f   : > { %v7484_v39 = vmax.f32 %v7476_v36, 0.0  ;;  %v7463_v17 = vmul.f32 %v8885_v41, %v7635_v23  ;;  %v8500_v29 = vpop.f32.mrb[4].mxu1 }
 0x2a0   : > { %7494 = vst.msk [vmem:[%s10738_s20 + $0x8] sm:$0xff] %vm7492_vm2, %v7485_v3  ;;  %v7479_v27 = vadd.f32 %v7636_v57, %v7464_v15  ;;  %v8886_v46 = vadd.f32 %v8878_v63, %v8500_v29  ;;  %v3891_v30 = vpop.f32.mrb[5].mxu1 }
 0x2a1   : > { %7493 = vst.msk [vmem:[%s10738_s20] sm:$0xff] %vm7492_vm2, %v7484_v39  ;;  %v7478_v16 = vadd.f32 %v7636_v57, %v7463_v17  ;;  %v8887_v8 = vadd.f32 %v7424_v37, %v3891_v30 }
 0x2a2   : > { %v7487_v50 = vmax.f32 %v7479_v27, 0.0  ;;  %v7466_v32 = vmul.f32 %v8886_v46, %v7635_v23 }
 0x2a3   : > { %v7486_v18 = vmax.f32 %v7478_v16, 0.0  ;;  %v7465_v43 = vmul.f32 %v8887_v8, %v7635_v23  ;;  %v8503_v24 = vpop.f32.mrb[6].mxu1 }
 0x2a4   : > { %7496 = vst.msk [vmem:[%s10738_s20 + $0x18] sm:$0xff] %vm7492_vm2, %v7487_v50  ;;  %v7481_v25 = vadd.f32 %v7636_v57, %v7466_v32  ;;  %v8888_v34 = vadd.f32 %v8881_v4, %v8503_v24  ;;  %v3905_v33 = vpop.f32.mrb[7].mxu1 }
 0x2a5   : > { %7495 = vst.msk [vmem:[%s10738_s20 + $0x10] sm:$0xff] %vm7492_vm2, %v7486_v18  ;;  %v7480_v51 = vadd.f32 %v7636_v57, %v7465_v43  ;;  %v8889_v2 = vadd.f32 %v7436_v10, %v3905_v33 }
 0x2a6   : > { %v7489_v5 = vmax.f32 %v7481_v25, 0.0  ;;  %v7468_v62 = vmul.f32 %v8888_v34, %v7635_v23 }
 0x2a7   : > { %v7488_v0 = vmax.f32 %v7480_v51, 0.0  ;;  %v7467_v40 = vmul.f32 %v8889_v2, %v7635_v23 }
 0x2a8   : > { %7498 = vst.msk [vmem:[%s10738_s20 + $0x28] sm:$0xff] %vm7492_vm2, %v7489_v5  ;;  %v7483_v11 = vadd.f32 %v7636_v57, %v7468_v62 }
 0x2a9   : > { %7497 = vst.msk [vmem:[%s10738_s20 + $0x20] sm:$0xff] %vm7492_vm2, %v7488_v0  ;;  %v7482_v61 = vadd.f32 %v7636_v57, %v7467_v40 }
 0x2aa   : > { %v7491_v19 = vmax.f32 %v7483_v11, 0.0 }
 0x2ab   : > { %v7490_v44 = vmax.f32 %v7482_v61, 0.0 }
 0x2ac   : > { %7500 = vst.msk [vmem:[%s10738_s20 + $0x38] sm:$0xff] %vm7492_vm2, %v7491_v19 }
 0x2ad   : > { %7499 = vst.msk [vmem:[%s10738_s20 + $0x30] sm:$0xff] %vm7492_vm2, %v7490_v44 }
 0x2ae PF: > { %s17_s24 = sadd.s32 1, %s9321_s24  }
 0x2af   : > { %p14_p4 = scmp.ge.s32.totalorder %s17_s24, 4  }
 0x2b1   :  { %16 = sbr.rel (!%p14_p4) target bundleno = 1 (0x1), region = 97 }

// kernel: wide_basic_forward.3
= control target key start
LH: loop header
LB: loop body
LE: loop exit
PB: predicated region body
PF: predicated region fallthrough
CT: control target
= control target key end

     0   :  { %s10185_s18 = smov 0   ;;  %s11606_s0 = inlined_call_operand.vmem [shape: f32[2,10,10,8], index: 0, kind: input, shape index: {}]   ;;  %s11607_s1 = inlined_call_operand.vmem [shape: f32[9,8,8], index: 1, kind: input, shape index: {}]   ;;  %s11608_s2 = inlined_call_operand.vmem [shape: f32[2,8,8,4], index: 2, kind: input, shape index: {}]   ;;  %s11609_s3 = inlined_call_operand.vmem [shape: f32[4,8], index: 3, kind: input, shape index: {}]   ;;  %s11610_s4 = inlined_call_operand.vmem [shape: f32[1,8], index: 4, kind: input, shape index: {}]   ;;  %s11611_s5 = inlined_call_operand.vmem [shape: f32[2,8,8,8], index: 5, kind: output, shape index: {}]  }
   0x1 LB: > { %s8215_s19 = sadd.s32 4294967295, %s10153_s18   ;;  %p8219_p0 = scmp.ge.s32.totalorder %s10153_s18, 1  ;;  %s10153_s18 = sphi %s10185_s18, %s15_s18  }
   0x2   : > { %p197_p1 = scmp.lt.s32.totalorder %s10153_s18, 3 }
   0x4   : > { %p198_p2 = pnand %p8219_p0, %p197_p1 }
   0x6   : > { %201 = sbr.rel (%p198_p2) target bundleno = 733 (0x2dd), region = 40 }
   0xd   : > { %v8225_v0 = vld [vmem:[%s11607_s1 + $0x8] sm:$0xff]  ;;  %p230_p3 = scmp.lt.s32.totalorder %s8215_s19, 1  ;;  %vm264_vm0 = vcmask 64512   ;;  %vm7366_vm1 = vcmask 1043456   ;;  %vm7341_vm2 = vcmask 31744  }
   0xe   : > { %v8253_v1 = vld [vmem:[%s11607_s1 + $0x28] sm:$0xff]  ;;  %v10199_v2 = vand.u32 4294901760, %v8225_v0 }
   0xf   : > { %v10201_v3 = vand.u32 4294901760, %v8253_v1  ;;  %s11768_s19 = smov (!%p230_p3, %s8215_s19), 1 }
  0x10   : > { %8826 = vmatprep.subr.mxu1 %v10199_v2  ;;  %v10208_v4 = vsub.f32 %v8225_v0, %v10199_v2  ;;  %s10138_s24 = smul.u32 160, %s11768_s19  ;;  %s8284_s21 = sshll.u32 %s11768_s19, 6 }
  0x11   : > { %9246 = vmatprep.subr.mxu0 %v10201_v3  ;;  %v10211_v5 = vsub.f32 %v8253_v1, %v10201_v3  ;;  %8827 = vmatpush3.msra.mxu1 %v10199_v2  ;;  %s11585_s29 = scalar_lea.vmem %s11611_s5, %s8284_s21 }
  0x12   : > { %9247 = vmatpush3.msra.mxu0 %v10201_v3  ;;  %v10217_v6 = vand.u32 4294901760, %v10208_v4  ;;  %s10225_s27 = scalar_lea.vmem %s11606_s0, %s10138_s24  ;;  %s11241_s24 = scalar_lea.vmem %s11608_s2, %s8284_s21 }
  0x13   : > { %v10220_v7 = vand.u32 4294901760, %v10211_v5  ;;  %v254_v8 = vld [vmem:[%s10225_s27 + $0x1] sm:$0xff]  ;;  %v8245_v10 = vld [vmem:[%s10225_s27 + $0x12] sm:$0xff] }
  0x14   : > { %v439_v9 = vsub.f32 %v10208_v4, %v10217_v6  ;;  %v255_v12 = vld [vmem:[%s10225_s27 + $0x11] sm:$0xff]  ;;  %v266_v13 = vsel %vm264_vm0, %v254_v8, 0  ;;  %v4186_v14 = vsel %vm264_vm0, %v8245_v10, 0  ;;  %v8246_v16 = vld [vmem:[%s10225_s27 + $0x22] sm:$0xff] }
  0x15   : > { %v4359_v11 = vsub.f32 %v10211_v5, %v10220_v7  ;;  %v269_v15 = vsel %vm264_vm0, %v255_v12, 0  ;;  %v256_v17 = vld [vmem:[%s10225_s27 + $0x21] sm:$0xff]  ;;  %v8247_v18 = vld [vmem:[%s10225_s27 + $0x32] sm:$0xff]  ;;  %v10240_v19 = vand.u32 4294901760, %v266_v13  ;;  %v10242_v21 = vand.u32 4294901760, %v4186_v14 }
  0x16   : > { %v440_v20 = vand.u32 4294901760, %v439_v9  ;;  %v257_v23 = vld [vmem:[%s10225_s27 + $0x31] sm:$0xff]  ;;  %v8248_v24 = vld [vmem:[%s10225_s27 + $0x42] sm:$0xff]  ;;  %v10248_v25 = vand.u32 4294901760, %v269_v15  ;;  %v4189_v26 = vsel %vm264_vm0, %v8246_v16, 0  ;;  %v272_v27 = vsel %vm264_vm0, %v256_v17, 0 }
  0x17   : > { %v10244_v22 = vand.u32 4294901760, %v4359_v11  ;;  %v4192_v28 = vsel %vm264_vm0, %v8247_v18, 0  ;;  %v10254_v29 = vsub.f32 %v266_v13, %v10240_v19  ;;  %v10257_v30 = vsub.f32 %v4186_v14, %v10242_v21  ;;  %v258_v53 = vld [vmem:[%s10225_s27 + $0x41] sm:$0xff]  ;;  %v8249_v54 = vld [vmem:[%s10225_s27 + $0x52] sm:$0xff] }
  0x18   : > { %8840 = vmatprep.subr.mxu1 %v440_v20  ;;  %v10260_v31 = vand.u32 4294901760, %v4189_v26  ;;  %v10262_v32 = vand.u32 4294901760, %v272_v27  ;;  %v10265_v33 = vsub.f32 %v269_v15, %v10248_v25  ;;  %v10267_v34 = vand.u32 4294901760, %v4192_v28  ;;  %v259_v63 = vld [vmem:[%s10225_s27 + $0x51] sm:$0xff]  ;;  %v8250_v0 = vld [vmem:[%s10225_s27 + $0x62] sm:$0xff] }
  0x19   : > { %11668 = vst [vmem:[#allocation2_spill] sm:$0xff] %v10257_v30  ;;  %9260 = vmatprep.subr.mxu0 %v10244_v22  ;;  %v275_v35 = vsel %vm264_vm0, %v257_v23, 0  ;;  %v4195_v36 = vsel %vm264_vm0, %v8248_v24, 0  ;;  %v11613_v37 = vand.u32 4294901760, %v10254_v29  ;;  %v10273_v38 = vand.u32 4294901760, %v10257_v30  ;;  %v260_v1 = vld [vmem:[%s10225_s27 + $0x61] sm:$0xff] }
  0x1a   : > { %v10276_v39 = vsub.f32 %v4189_v26, %v10260_v31  ;;  %v10279_v40 = vsub.f32 %v272_v27, %v10262_v32  ;;  %v11612_v41 = vand.u32 4294901760, %v10265_v33  ;;  %v10283_v42 = vsub.f32 %v4192_v28, %v10267_v34  ;;  %v8251_v16 = vld [vmem:[%s10225_s27 + $0x72] sm:$0xff] }
  0x1b   : > { %11669 = vst [vmem:[#allocation3_spill] sm:$0xff] %v10273_v38  ;;  %v10285_v43 = vand.u32 4294901760, %v275_v35  ;;  %v10287_v44 = vand.u32 4294901760, %v4195_v36  ;;  %v358_v45 = vsub.f32 %v10254_v29, %v11613_v37  ;;  %v4278_v46 = vsub.f32 %v10257_v30, %v10273_v38  ;;  %v261_v26 = vld [vmem:[%s10225_s27 + $0x71] sm:$0xff] }
  0x1c   : > { %11670 = vst [vmem:[#allocation4_spill] sm:$0xff] %v10276_v39  ;;  %11671 = vst [vmem:[#allocation5_spill] sm:$0xff] %v10279_v40  ;;  %v10295_v47 = vand.u32 4294901760, %v10276_v39  ;;  %v10298_v48 = vand.u32 4294901760, %v10279_v40  ;;  %v368_v49 = vsub.f32 %v10265_v33, %v11612_v41  ;;  %v10304_v50 = vand.u32 4294901760, %v10283_v42 }
  0x1d   : > { %11672 = vst [vmem:[#allocation6_spill] sm:$0xff] %v10283_v42  ;;  %v10307_v51 = vsub.f32 %v275_v35, %v10285_v43  ;;  %v10310_v52 = vsub.f32 %v4195_v36, %v10287_v44  ;;  %v359_v55 = vand.u32 4294901760, %v358_v45  ;;  %v10314_v56 = vand.u32 4294901760, %v4278_v46 }
  0x1e   : > { %11673 = vst [vmem:[#allocation7_spill] sm:$0xff] %v10295_v47  ;;  %11674 = vst [vmem:[#allocation8_spill] sm:$0xff] %v10298_v48  ;;  %v4288_v57 = vsub.f32 %v10276_v39, %v10295_v47  ;;  %v378_v58 = vsub.f32 %v10279_v40, %v10298_v48  ;;  %v369_v59 = vand.u32 4294901760, %v368_v49  ;;  %v4298_v60 = vsub.f32 %v10283_v42, %v10304_v50  ;;  %v8252_v49 = vld [vmem:[%s10225_s27 + $0x82] sm:$0xff] }
  0x1f   : > { %11675 = vst [vmem:[#allocation9_spill] sm:$0xff] %v10304_v50  ;;  %11676 = vst [vmem:[#allocation10_spill] sm:$0xff] %v10307_v51  ;;  %v10323_v61 = vand.u32 4294901760, %v10307_v51  ;;  %v10326_v62 = vand.u32 4294901760, %v10310_v52  ;;  %8828 = vmatprep.mubr.f32.mxu1 %v359_v55  ;;  %9248 = vmatprep.mubr.f32.mxu0 %v10314_v56  ;;  %v278_v10 = vsel %vm264_vm0, %v258_v53, 0  ;;  %v4198_v11 = vsel %vm264_vm0, %v8249_v54, 0 }
  0x20   : > { %11677 = vst [vmem:[#allocation11_spill] sm:$0xff] %v10310_v52  ;;  %v10332_v8 = vand.u32 4294901760, %v4288_v57  ;;  %v10334_v9 = vand.u32 4294901760, %v378_v58  ;;  %8829 = vmatmul.mubr.f32.vlgmr.msra.gmra.mrb[0].mxu1 %v369_v59  ;;  %v10338_v12 = vand.u32 4294901760, %v4298_v60  ;;  %v10344_v15 = vand.u32 4294901760, %v278_v10 }
  0x21   : > { %11678 = vst [vmem:[#allocation12_spill] sm:$0xff] %v10323_v61  ;;  %11679 = vst [vmem:[#allocation13_spill] sm:$0xff] %v10326_v62  ;;  %v388_v13 = vsub.f32 %v10307_v51, %v10323_v61  ;;  %v4308_v14 = vsub.f32 %v10310_v52, %v10326_v62  ;;  %8841 = vmatpush3.msra.mxu1 %v440_v20  ;;  %v10348_v17 = vand.u32 4294901760, %v4198_v11  ;;  %v281_v18 = vsel %vm264_vm0, %v259_v63, 0 }
  0x22   : > { %11680 = vst [vmem:[#allocation14_spill] sm:$0xff] %v10332_v8  ;;  %11681 = vst [vmem:[#allocation15_spill] sm:$0xff] %v10338_v12  ;;  %9249 = vmatmul.mubr.f32.vlgmr.msra.gmra.mrb[0].mxu0 %v10332_v8  ;;  %v4201_v23 = vsel %vm264_vm0, %v8250_v0, 0  ;;  %v284_v24 = vsel %vm264_vm0, %v260_v1, 0  ;;  %8831 = vmatprep.mubr.f32.mxu1 %v10334_v9  ;;  %v10361_v20 = vsub.f32 %v278_v10, %v10344_v15  ;;  %v10363_v35 = vand.u32 4294901760, %v281_v18 }
  0x23   : > { %11682 = vst [vmem:[#allocation16_spill] sm:$0xff] %v10348_v17  ;;  %9261 = vmatpush3.msra.mxu0 %v10244_v22  ;;  %v10356_v27 = vand.u32 4294901760, %v388_v13  ;;  %v10358_v28 = vand.u32 4294901760, %v4308_v14  ;;  %9251 = vmatprep.mubr.f32.mxu0 %v10338_v12  ;;  %v10367_v36 = vsub.f32 %v4198_v11, %v10348_v17  ;;  %v10369_v45 = vand.u32 4294901760, %v4201_v23 }
  0x24   : > { %11685 = vst [vmem:[#allocation19_spill] sm:$0xff] %v10361_v20  ;;  %v10371_v46 = vand.u32 4294901760, %v284_v24  ;;  %v4204_v22 = vsel %vm264_vm0, %v8251_v16, 0  ;;  %8854 = vmatprep.subr.mxu1 %v10208_v4  ;;  %v10378_v53 = vand.u32 4294901760, %v10361_v20  ;;  %v10381_v54 = vsub.f32 %v281_v18, %v10363_v35  ;;  %9274 = vmatprep.subr.mxu0 %v10211_v5 }
  0x25   : > { %11683 = vst [vmem:[#allocation17_spill] sm:$0xff] %v10356_v27  ;;  %11684 = vst [vmem:[#allocation18_spill] sm:$0xff] %v10358_v28  ;;  %8832 = vmatmul.mubr.f32.gmra.mrb[2].mxu1 %v10356_v27  ;;  %v10383_v55 = vand.u32 4294901760, %v4204_v22  ;;  %v287_v57 = vsel %vm264_vm0, %v261_v26, 0  ;;  %v10389_v58 = vand.u32 4294901760, %v10367_v36  ;;  %v10392_v59 = vsub.f32 %v4201_v23, %v10369_v45 }
  0x26   : > { %11686 = vst [vmem:[#allocation20_spill] sm:$0xff] %v10367_v36  ;;  %11687 = vst [vmem:[#allocation21_spill] sm:$0xff] %v10369_v45  ;;  %9252 = vmatmul.mubr.f32.gmra.mrb[2].mxu0 %v10358_v28  ;;  %v10395_v60 = vsub.f32 %v284_v24, %v10371_v46  ;;  %v10397_v63 = vand.u32 4294901760, %v287_v57  ;;  %v398_v0 = vsub.f32 %v10361_v20, %v10378_v53  ;;  %v10402_v1 = vand.u32 4294901760, %v10381_v54 }
  0x27   : > { %11688 = vst [vmem:[#allocation22_spill] sm:$0xff] %v10378_v53  ;;  %11689 = vst [vmem:[#allocation23_spill] sm:$0xff] %v10381_v54  ;;  %v10405_v10 = vsub.f32 %v4204_v22, %v10383_v55  ;;  %v4207_v11 = vsel %vm264_vm0, %v8252_v49, 0  ;;  %v4318_v13 = vsub.f32 %v10367_v36, %v10389_v58  ;;  %v10411_v14 = vand.u32 4294901760, %v10392_v59 }
  0x28   : > { %11690 = vst [vmem:[#allocation24_spill] sm:$0xff] %v10383_v55  ;;  %11691 = vst [vmem:[#allocation25_spill] sm:$0xff] %v10389_v58  ;;  %v10414_v16 = vand.u32 4294901760, %v10395_v60  ;;  %v10417_v18 = vsub.f32 %v287_v57, %v10397_v63  ;;  %v10419_v23 = vand.u32 4294901760, %v398_v0  ;;  %v408_v24 = vsub.f32 %v10381_v54, %v10402_v1 }
  0x29   : > { %11692 = vst [vmem:[#allocation26_spill] sm:$0xff] %v10392_v59  ;;  %11693 = vst [vmem:[#allocation27_spill] sm:$0xff] %v10395_v60  ;;  %v10424_v26 = vand.u32 4294901760, %v10405_v10  ;;  %v10426_v22 = vand.u32 4294901760, %v4207_v11  ;;  %v10428_v49 = vand.u32 4294901760, %v4318_v13  ;;  %v4328_v41 = vsub.f32 %v10392_v59, %v10411_v14 }
  0x2a   : > { %11694 = vst [vmem:[#allocation28_spill] sm:$0xff] %v10402_v1  ;;  %11695 = vst [vmem:[#allocation29_spill] sm:$0xff] %v10405_v10  ;;  %v418_v37 = vsub.f32 %v10395_v60, %v10414_v16  ;;  %v10435_v57 = vand.u32 4294901760, %v10417_v18  ;;  %8834 = vmatprep.mubr.f32.mxu1 %v10419_v23  ;;  %v10438_v0 = vand.u32 4294901760, %v408_v24 }
  0x2b   : > { %11696 = vst [vmem:[#allocation30_spill] sm:$0xff] %v10411_v14  ;;  %11697 = vst [vmem:[#allocation31_spill] sm:$0xff] %v10414_v16  ;;  %v4338_v28 = vsub.f32 %v10405_v10, %v10424_v26  ;;  %v10443_v12 = vsub.f32 %v4207_v11, %v10426_v22  ;;  %9254 = vmatprep.mubr.f32.mxu0 %v10428_v49  ;;  %v10446_v13 = vand.u32 4294901760, %v4328_v41 }
  0x2c   : > { %11698 = vst [vmem:[#allocation32_spill] sm:$0xff] %v10417_v18  ;;  %11699 = vst [vmem:[#allocation33_spill] sm:$0xff] %v10419_v23  ;;  %v10448_v27 = vand.u32 4294901760, %v418_v37  ;;  %v428_v8 = vsub.f32 %v10417_v18, %v10435_v57  ;;  %8835 = vmatmul.mubr.f32.gmra.mrb[4].mxu1 %v10438_v0 }
  0x2d   : > { %11700 = vst [vmem:[#allocation34_spill] sm:$0xff] %v10424_v26  ;;  %11701 = vst [vmem:[#allocation35_spill] sm:$0xff] %v10435_v57  ;;  %v10453_v23 = vand.u32 4294901760, %v4338_v28  ;;  %v4347_v24 = vand.u32 4294901760, %v10443_v12  ;;  %9255 = vmatmul.mubr.f32.gmra.mrb[4].mxu0 %v10446_v13 }
  0x2e   : > { %8837 = vmatprep.mubr.f32.mxu1 %v10448_v27  ;;  %v10458_v11 = vand.u32 4294901760, %v428_v8 }
  0x2f   : > { %9257 = vmatprep.mubr.f32.mxu0 %v10453_v23  ;;  %v4348_v37 = vsub.f32 %v10443_v12, %v4347_v24 }
  0x30   : > { %8838 = vmatmul.mubr.f32.gmra.mrb[6].mxu1 %v10458_v11 }
  0x31   : > { %v4349_v41 = vand.u32 4294901760, %v4348_v37  ;;  %8842 = vmatprep.mubr.f32.mxu1 %v10240_v19  ;;  %v246_v37 = vld [vmem:[%s10225_s27 + $0x10] sm:$0xff] }
  0x33   : > { %9258 = vmatmul.mubr.f32.gmra.mrb[6].mxu0 %v4349_v41 }
  0x34   : > { %9262 = vmatprep.mubr.f32.mxu0 %v10242_v21  ;;  %8843 = vmatmul.mubr.f32.vlgmr.msra.gmra.mrb[0].mxu1 %v10248_v25 }
  0x35   : > { %8855 = vmatpush3.msra.mxu1 %v10208_v4  ;;  %8845 = vmatprep.mubr.f32.mxu1 %v10262_v32  ;;  %v11702_v4 = vand.u32 4294901760, %v10254_v29 }
  0x36   : > { %8868 = vmatprep.subr.mxu1 %v10199_v2 }
  0x37   : > { %9263 = vmatmul.mubr.f32.vlgmr.msra.gmra.mrb[0].mxu0 %v10260_v31 }
  0x38   : > { %9275 = vmatpush3.msra.mxu0 %v10211_v5  ;;  %9265 = vmatprep.mubr.f32.mxu0 %v10267_v34  ;;  %v11703_v5 = vand.u32 4294901760, %v10265_v33 }
  0x39   : > { %8846 = vmatmul.mubr.f32.gmra.mrb[2].mxu1 %v10285_v43  ;;  %9288 = vmatprep.subr.mxu0 %v10201_v3 }
  0x3a   : > { %8848 = vmatprep.mubr.f32.mxu1 %v10344_v15 }
  0x3b   : > { %9266 = vmatmul.mubr.f32.gmra.mrb[2].mxu0 %v10287_v44 }
  0x3c   : > { %9268 = vmatprep.mubr.f32.mxu0 %v10348_v17 }
  0x3d   : > { %8849 = vmatmul.mubr.f32.gmra.mrb[4].mxu1 %v10363_v35 }
  0x3e   : > { %8851 = vmatprep.mubr.f32.mxu1 %v10371_v46 }
  0x3f   : > { %9269 = vmatmul.mubr.f32.gmra.mrb[4].mxu0 %v10369_v45 }
  0x40   : > { %9271 = vmatprep.mubr.f32.mxu0 %v10383_v55 }
  0x41   : > { %8852 = vmatmul.mubr.f32.gmra.mrb[6].mxu1 %v10397_v63 }
  0x42   : > { %8856 = vmatprep.mubr.f32.mxu1 %v10254_v29 }
  0x43   : > { %9272 = vmatmul.mubr.f32.gmra.mrb[6].mxu0 %v10426_v22 }
  0x44   : > { %9276 = vmatprep.mubr.f32.mxu0 %v10257_v30 }
  0x45   : > { %8857 = vmatmul.mubr.f32.vlgmr.msra.gmra.mrb[0].mxu1 %v10265_v33 }
  0x46   : > { %8869 = vmatpush3.msra.mxu1 %v10199_v2  ;;  %8859 = vmatprep.mubr.f32.mxu1 %v10279_v40 }
  0x47   : > { %9277 = vmatmul.mubr.f32.vlgmr.msra.gmra.mrb[0].mxu0 %v10276_v39  ;;  %8882 = vmatprep.subr.mxu1 %v10217_v6 }
  0x48   : > { %9289 = vmatpush3.msra.mxu0 %v10201_v3  ;;  %9279 = vmatprep.mubr.f32.mxu0 %v10283_v42 }
  0x49   : > { %8860 = vmatmul.mubr.f32.gmra.mrb[2].mxu1 %v10307_v51  ;;  %9302 = vmatprep.subr.mxu0 %v10220_v7 }
  0x4a   : > { %8862 = vmatprep.mubr.f32.mxu1 %v10361_v20 }
  0x4b   : > { %9280 = vmatmul.mubr.f32.gmra.mrb[2].mxu0 %v10310_v52 }
  0x4c   : > { %9282 = vmatprep.mubr.f32.mxu0 %v10367_v36 }
  0x4d   : > { %8863 = vmatmul.mubr.f32.gmra.mrb[4].mxu1 %v10381_v54 }
  0x4e   : > { %8865 = vmatprep.mubr.f32.mxu1 %v10395_v60 }
  0x4f   : > { %9283 = vmatmul.mubr.f32.gmra.mrb[4].mxu0 %v10392_v59 }
  0x50   : > { %9285 = vmatprep.mubr.f32.mxu0 %v10405_v10  ;;  %v8261_v10 = vld [vmem:[%s10225_s27 + $0x90] sm:$0xff] }
  0x51   : > { %8866 = vmatmul.mubr.f32.gmra.mrb[6].mxu1 %v10417_v18  ;;  %v4997_v52 = vsel %vm264_vm0, %v8261_v10, 0 }
  0x52   : > { %8870 = vmatprep.mubr.f32.mxu1 %v11702_v4  ;;  %v10682_v10 = vand.u32 4294901760, %v4997_v52 }
  0x53   : > { %9286 = vmatmul.mubr.f32.gmra.mrb[6].mxu0 %v10443_v12  ;;  %v245_v12 = vld [vmem:[%s10225_s27] sm:$0xff] }
  0x54   : > { %9290 = vmatprep.mubr.f32.mxu0 %v10273_v38  ;;  %v8260_v38 = vld [vmem:[%s10225_s27 + $0x80] sm:$0xff] }
  0x55   : > { %8871 = vmatmul.mubr.f32.vlgmr.msra.gmra.mrb[0].mxu1 %v11703_v5  ;;  %v8255_v5 = vld [vmem:[%s10225_s27 + $0x30] sm:$0xff] }
  0x56   : > { %8883 = vmatpush3.msra.mxu1 %v10217_v6  ;;  %8873 = vmatprep.mubr.f32.mxu1 %v10298_v48  ;;  %v253_v6 = vld [vmem:[%s11607_s1] sm:$0xff]  ;;  %v4994_v48 = vsel %vm264_vm0, %v8260_v38, 0 }
  0x57   : > { %9291 = vmatmul.mubr.f32.vlgmr.msra.gmra.mrb[0].mxu0 %v10295_v47  ;;  %8896 = vmatprep.subr.mxu1 %v10199_v2  ;;  %v10535_v29 = vand.u32 4294901760, %v253_v6  ;;  %v8259_v47 = vld [vmem:[%s10225_s27 + $0x70] sm:$0xff]  ;;  %v10666_v54 = vand.u32 4294901760, %v4994_v48 }
  0x58   : > { %9303 = vmatpush3.msra.mxu0 %v10220_v7  ;;  %9293 = vmatprep.mubr.f32.mxu0 %v10304_v50  ;;  %v8262_v7 = vld [vmem:[%s11607_s1 + $0x30] sm:$0xff] }
  0x59   : > { %8874 = vmatmul.mubr.f32.gmra.mrb[2].mxu1 %v10323_v61  ;;  %9316 = vmatprep.subr.mxu0 %v10201_v3  ;;  %v10539_v33 = vand.u32 4294901760, %v8262_v7  ;;  %v10546_v8 = vsub.f32 %v253_v6, %v10535_v29  ;;  %v10693_v40 = vsub.f32 %v4994_v48, %v10666_v54 }
  0x5a   : > { %8876 = vmatprep.mubr.f32.mxu1 %v10378_v53 }
  0x5b   : > { %9294 = vmatmul.mubr.f32.gmra.mrb[2].mxu0 %v10326_v62  ;;  %v10555_v28 = vsub.f32 %v8262_v7, %v10539_v33  ;;  %v1040_v7 = vsel %vm264_vm0, %v246_v37, 0  ;;  %v8258_v62 = vld [vmem:[%s10225_s27 + $0x60] sm:$0xff] }
  0x5c   : > { %9296 = vmatprep.mubr.f32.mxu0 %v10389_v58  ;;  %v10586_v58 = vand.u32 4294901760, %v1040_v7 }
  0x5d   : > { %8877 = vmatmul.mubr.f32.gmra.mrb[4].mxu1 %v10402_v1  ;;  %v10568_v4 = vand.u32 4294901760, %v10555_v28 }
  0x5e   : > { %8879 = vmatprep.mubr.f32.mxu1 %v10414_v16  ;;  %v8257_v16 = vld [vmem:[%s10225_s27 + $0x50] sm:$0xff]  ;;  %v10611_v61 = vsub.f32 %v1040_v7, %v10586_v58 }
  0x5f   : > { %9297 = vmatmul.mubr.f32.gmra.mrb[4].mxu0 %v10411_v14  ;;  %v5149_v14 = vsub.f32 %v10555_v28, %v10568_v4 }
  0x60   : > { %9299 = vmatprep.mubr.f32.mxu0 %v10424_v26 }
  0x61   : > { %8880 = vmatmul.mubr.f32.gmra.mrb[6].mxu1 %v10435_v57  ;;  %v4979_v57 = vsel %vm264_vm0, %v8255_v5, 0 }
  0x62   : > { %8884 = vmatprep.mubr.f32.mxu1 %v10240_v19  ;;  %v10601_v53 = vand.u32 4294901760, %v4979_v57 }
  0x63   : > { %9300 = vmatmul.mubr.f32.gmra.mrb[6].mxu0 %v4347_v24  ;;  %v1037_v24 = vsel %vm264_vm0, %v245_v12, 0  ;;  %v8256_v12 = vld [vmem:[%s10225_s27 + $0x40] sm:$0xff] }
  0x64   : > { %9304 = vmatprep.mubr.f32.mxu0 %v10242_v21  ;;  %v10572_v6 = vand.u32 4294901760, %v1037_v24  ;;  %v4982_v37 = vsel %vm264_vm0, %v8256_v12, 0 }
  0x65   : > { %8885 = vmatmul.mubr.f32.vlgmr.msra.gmra.mrb[0].mxu1 %v10248_v25  ;;  %v10604_v12 = vand.u32 4294901760, %v4982_v37 }
  0x66   : > { %8897 = vmatpush3.msra.mxu1 %v10199_v2  ;;  %8887 = vmatprep.mubr.f32.mxu1 %v10262_v32  ;;  %v8254_v2 = vld [vmem:[%s10225_s27 + $0x20] sm:$0xff]  ;;  %v10592_v1 = vsub.f32 %v1037_v24, %v10572_v6  ;;  %v10608_v24 = vand.u32 4294901760, %v5149_v14  ;;  %v10625_v14 = vsub.f32 %v4979_v57, %v10601_v53  ;;  %v10640_v57 = vand.u32 4294901760, %v10611_v61 }
  0x67   : > { %9305 = vmatmul.mubr.f32.vlgmr.msra.gmra.mrb[0].mxu0 %v10260_v31  ;;  %8910 = vmatprep.subr.mxu1 %v10535_v29  ;;  %v4976_v41 = vsel %vm264_vm0, %v8254_v2, 0 }
  0x68   : > { %9317 = vmatpush3.msra.mxu0 %v10201_v3  ;;  %9307 = vmatprep.mubr.f32.mxu0 %v10267_v34  ;;  %v10561_v3 = vand.u32 4294901760, %v10546_v8  ;;  %v10579_v26 = vand.u32 4294901760, %v4976_v41  ;;  %v11704_v18 = vand.u32 4294901760, %v10592_v1  ;;  %v10652_v59 = vand.u32 4294901760, %v10625_v14 }
  0x69   : > { %8888 = vmatmul.mubr.f32.gmra.mrb[2].mxu1 %v10285_v43  ;;  %9330 = vmatprep.subr.mxu0 %v10539_v33 }
  0x6a   : > { %8890 = vmatprep.mubr.f32.mxu1 %v10344_v15  ;;  %v1210_v2 = vsub.f32 %v10546_v8, %v10561_v3  ;;  %v10599_v50 = vsub.f32 %v4976_v41, %v10579_v26  ;;  %v4991_v41 = vsel %vm264_vm0, %v8259_v47, 0  ;;  %11705 = vst [vmem:[#allocation36_spill] sm:$0xff] %v10652_v59  ;;  %v5078_v20 = vsub.f32 %v10625_v14, %v10652_v59 }
  0x6b   : > { %9308 = vmatmul.mubr.f32.gmra.mrb[2].mxu0 %v10287_v44  ;;  %v10657_v60 = vand.u32 4294901760, %v4991_v41 }
  0x6c   : > { %9310 = vmatprep.mubr.f32.mxu0 %v10348_v17  ;;  %v10596_v5 = vand.u32 4294901760, %v1210_v2  ;;  %v4988_v2 = vsel %vm264_vm0, %v8258_v62, 0 }
  0x6d   : > { %8891 = vmatmul.mubr.f32.gmra.mrb[4].mxu1 %v10363_v35  ;;  %v10634_v7 = vand.u32 4294901760, %v4988_v2  ;;  %v10680_v51 = vsub.f32 %v4991_v41, %v10657_v60  ;;  %v10699_v41 = vand.u32 4294901760, %v5078_v20 }
  0x6e   : > { %8893 = vmatprep.mubr.f32.mxu1 %v10371_v46 }
  0x6f   : > { %9311 = vmatmul.mubr.f32.gmra.mrb[4].mxu0 %v10369_v45  ;;  %11709 = vst [vmem:[#allocation40_spill] sm:$0xff] %v10699_v41 }
  0x70   : > { %9313 = vmatprep.mubr.f32.mxu0 %v10383_v55 }
  0x71   : > { %8894 = vmatmul.mubr.f32.gmra.mrb[6].mxu1 %v10397_v63 }
  0x72   : > { %8898 = vmatprep.mubr.f32.mxu1 %v10240_v19  ;;  %v4985_v19 = vsel %vm264_vm0, %v8257_v16, 0  ;;  %v10632_v16 = vsub.f32 %v4982_v37, %v10604_v12  ;;  %v1129_v37 = vsub.f32 %v10592_v1, %v11704_v18  ;;  %v10664_v18 = vsub.f32 %v4988_v2, %v10634_v7 }
  0x73   : > { %9314 = vmatmul.mubr.f32.gmra.mrb[6].mxu0 %v10426_v22  ;;  %v10627_v62 = vand.u32 4294901760, %v4985_v19 }
  0x74   : > { %9318 = vmatprep.mubr.f32.mxu0 %v10242_v21  ;;  %v10661_v38 = vand.u32 4294901760, %v10632_v16  ;;  %v1130_v42 = vand.u32 4294901760, %v1129_v37  ;;  %v10690_v30 = vand.u32 4294901760, %v10664_v18 }
  0x75   : > { %8899 = vmatmul.mubr.f32.vlgmr.msra.gmra.mrb[0].mxu1 %v10248_v25  ;;  %v10622_v25 = vand.u32 4294901760, %v10599_v50  ;;  %v10655_v36 = vsub.f32 %v4985_v19, %v10627_v62  ;;  %v1139_v19 = vsub.f32 %v10611_v61, %v10640_v57 }
  0x76   : > { %8911 = vmatpush3.msra.mxu1 %v10535_v29  ;;  %8901 = vmatprep.mubr.f32.mxu1 %v10262_v32  ;;  %11706 = vst [vmem:[#allocation37_spill] sm:$0xff] %v10661_v38  ;;  %v5088_v37 = vsub.f32 %v10632_v16, %v10661_v38  ;;  %11708 = vst [vmem:[#allocation39_spill] sm:$0xff] %v10690_v30 }
  0x77   : > { %9319 = vmatmul.mubr.f32.vlgmr.msra.gmra.mrb[0].mxu0 %v10260_v31  ;;  %8924 = vmatprep.subr.mxu1 %v10596_v5  ;;  %v5068_v47 = vsub.f32 %v10599_v50, %v10622_v25  ;;  %v10677_v2 = vand.u32 4294901760, %v10655_v36 }
  0x78   : > { %9331 = vmatpush3.msra.mxu0 %v10539_v33  ;;  %9321 = vmatprep.mubr.f32.mxu0 %v10267_v34  ;;  %v10710_v48 = vand.u32 4294901760, %v5088_v37 }
  0x79   : > { %8902 = vmatmul.mubr.f32.gmra.mrb[2].mxu1 %v10285_v43  ;;  %9344 = vmatprep.subr.mxu0 %v10608_v24  ;;  %11707 = vst [vmem:[#allocation38_spill] sm:$0xff] %v10677_v2  ;;  %v10685_v39 = vand.u32 4294901760, %v5068_v47  ;;  %v5098_v47 = vsub.f32 %v10655_v36, %v10677_v2 }
  0x7a   : > { %8904 = vmatprep.mubr.f32.mxu1 %v10344_v15 }
  0x7b   : > { %9322 = vmatmul.mubr.f32.gmra.mrb[2].mxu0 %v10287_v44 }
  0x7c   : > { %9324 = vmatprep.mubr.f32.mxu0 %v10348_v17  ;;  %v10707_v17 = vsub.f32 %v4997_v52, %v10682_v10  ;;  %v10721_v52 = vand.u32 4294901760, %v5098_v47 }
  0x7d   : > { %8905 = vmatmul.mubr.f32.gmra.mrb[4].mxu1 %v10363_v35 }
  0x7e   : > { %8907 = vmatprep.mubr.f32.mxu1 %v10371_v46 }
  0x7f   : > { %9325 = vmatmul.mubr.f32.gmra.mrb[4].mxu0 %v10369_v45  ;;  %v10696_v45 = vand.u32 4294901760, %v1139_v19  ;;  %v5137_v19 = vand.u32 4294901760, %v10707_v17 }
  0x80   : > { %9327 = vmatprep.mubr.f32.mxu0 %v10383_v55  ;;  %v10704_v55 = vand.u32 4294901760, %v10680_v51 }
  0x81   : > { %8908 = vmatmul.mubr.f32.gmra.mrb[6].mxu1 %v10397_v63 }
  0x82   : > { %8912 = vmatprep.mubr.f32.mxu1 %v1130_v42  ;;  %11710 = vst [vmem:[#allocation41_spill] sm:$0xff] %v10704_v55  ;;  %v5108_v42 = vsub.f32 %v10664_v18, %v10690_v30  ;;  %v5118_v20 = vsub.f32 %v10680_v51, %v10704_v55 }
  0x83   : > { %9328 = vmatmul.mubr.f32.gmra.mrb[6].mxu0 %v10426_v22  ;;  %v10715_v22 = vand.u32 4294901760, %v10693_v40 }
  0x84   : > { %9332 = vmatprep.mubr.f32.mxu0 %v10685_v39  ;;  %v10729_v37 = vand.u32 4294901760, %v5108_v42  ;;  %v10737_v47 = vand.u32 4294901760, %v5118_v20 }
  0x85   : > { %11711 = vst [vmem:[#allocation42_spill] sm:$0xff] %v10715_v22  ;;  %8913 = vmatmul.mubr.f32.vlgmr.msra.gmra.mrb[0].mxu1 %v10696_v45 }
  0x86   : > { %8925 = vmatpush3.msra.mxu1 %v10596_v5  ;;  %8915 = vmatprep.mubr.f32.mxu1 %v10685_v39  ;;  %v5128_v5 = vsub.f32 %v10693_v40, %v10715_v22 }
  0x87   : > { %9333 = vmatmul.mubr.f32.vlgmr.msra.gmra.mrb[0].mxu0 %v10699_v41  ;;  %8938 = vmatprep.subr.mxu1 %v10546_v8 }
  0x88   : > { %9345 = vmatpush3.msra.mxu0 %v10608_v24  ;;  %9335 = vmatprep.mubr.f32.mxu0 %v10710_v48  ;;  %v5138_v24 = vsub.f32 %v10707_v17, %v5137_v19  ;;  %v10743_v42 = vand.u32 4294901760, %v5128_v5 }
  0x89   : > { %8916 = vmatmul.mubr.f32.gmra.mrb[2].mxu1 %v10699_v41  ;;  %9358 = vmatprep.subr.mxu0 %v10555_v28 }
  0x8a   : > { %8918 = vmatprep.mubr.f32.mxu1 %v10710_v48  ;;  %v5139_v41 = vand.u32 4294901760, %v5138_v24 }
  0x8b   : > { %9336 = vmatmul.mubr.f32.gmra.mrb[2].mxu0 %v10721_v52 }
  0x8c   : > { %9338 = vmatprep.mubr.f32.mxu0 %v10729_v37 }
  0x8d   : > { %8919 = vmatmul.mubr.f32.gmra.mrb[4].mxu1 %v10721_v52 }
  0x8e   : > { %8921 = vmatprep.mubr.f32.mxu1 %v10729_v37 }
  0x8f   : > { %9339 = vmatmul.mubr.f32.gmra.mrb[4].mxu0 %v10737_v47 }
  0x90   : > { %9341 = vmatprep.mubr.f32.mxu0 %v10743_v42 }
  0x91   : > { %8922 = vmatmul.mubr.f32.gmra.mrb[6].mxu1 %v10737_v47 }
  0x92   : > { %8926 = vmatprep.mubr.f32.mxu1 %v10572_v6 }
  0x93   : > { %9342 = vmatmul.mubr.f32.gmra.mrb[6].mxu0 %v5139_v41 }
  0x94   : > { %9346 = vmatprep.mubr.f32.mxu0 %v10579_v26 }
  0x95   : > { %8927 = vmatmul.mubr.f32.vlgmr.msra.gmra.mrb[0].mxu1 %v10586_v58 }
  0x96   : > { %8939 = vmatpush3.msra.mxu1 %v10546_v8  ;;  %8929 = vmatprep.mubr.f32.mxu1 %v10579_v26  ;;  %v11712_v8 = vand.u32 4294901760, %v10592_v1 }
  0x97   : > { %9347 = vmatmul.mubr.f32.vlgmr.msra.gmra.mrb[0].mxu0 %v10601_v53  ;;  %8952 = vmatprep.subr.mxu1 %v10535_v29 }
  0x98   : > { %9359 = vmatpush3.msra.mxu0 %v10555_v28  ;;  %9349 = vmatprep.mubr.f32.mxu0 %v10604_v12  ;;  %v8271_v28 = vld [vmem:[%s11607_s1 + $0x38] sm:$0xff] }
  0x99   : > { %8930 = vmatmul.mubr.f32.gmra.mrb[2].mxu1 %v10601_v53  ;;  %9372 = vmatprep.subr.mxu0 %v10539_v33 }
  0x9a   : > { %8932 = vmatprep.mubr.f32.mxu1 %v10604_v12 }
  0x9b   : > { %9350 = vmatmul.mubr.f32.gmra.mrb[2].mxu0 %v10627_v62 }
  0x9c   : > { %9352 = vmatprep.mubr.f32.mxu0 %v10634_v7 }
  0x9d   : > { %8933 = vmatmul.mubr.f32.gmra.mrb[4].mxu1 %v10627_v62 }
  0x9e   : > { %8935 = vmatprep.mubr.f32.mxu1 %v10634_v7 }
  0x9f   : > { %9353 = vmatmul.mubr.f32.gmra.mrb[4].mxu0 %v10657_v60 }
  0xa0   : > { %9355 = vmatprep.mubr.f32.mxu0 %v10666_v54 }
  0xa1   : > { %8936 = vmatmul.mubr.f32.gmra.mrb[6].mxu1 %v10657_v60 }
  0xa2   : > { %8940 = vmatprep.mubr.f32.mxu1 %v10592_v1  ;;  %v8226_v1 = vld [vmem:[%s11607_s1 + $0x10] sm:$0xff] }
  0xa3   : > { %9356 = vmatmul.mubr.f32.gmra.mrb[6].mxu0 %v10682_v10 }
  0xa4   : > { %9360 = vmatprep.mubr.f32.mxu0 %v10599_v50 }
  0xa5   : > { %8941 = vmatmul.mubr.f32.vlgmr.msra.gmra.mrb[0].mxu1 %v10611_v61 }
  0xa6   : > { %8953 = vmatpush3.msra.mxu1 %v10535_v29  ;;  %8943 = vmatprep.mubr.f32.mxu1 %v10599_v50 }
  0xa7   : > { %9361 = vmatmul.mubr.f32.vlgmr.msra.gmra.mrb[0].mxu0 %v10625_v14  ;;  %8966 = vmatprep.subr.mxu1 %v10561_v3 }
  0xa8   : > { %9373 = vmatpush3.msra.mxu0 %v10539_v33  ;;  %9363 = vmatprep.mubr.f32.mxu0 %v10632_v16 }
  0xa9   : > { %8944 = vmatmul.mubr.f32.gmra.mrb[2].mxu1 %v10625_v14  ;;  %9386 = vmatprep.subr.mxu0 %v10568_v4 }
  0xaa   : > { %8946 = vmatprep.mubr.f32.mxu1 %v10632_v16 }
  0xab   : > { %9364 = vmatmul.mubr.f32.gmra.mrb[2].mxu0 %v10655_v36 }
  0xac   : > { %9366 = vmatprep.mubr.f32.mxu0 %v10664_v18 }
  0xad   : > { %8947 = vmatmul.mubr.f32.gmra.mrb[4].mxu1 %v10655_v36 }
  0xae   : > { %8949 = vmatprep.mubr.f32.mxu1 %v10664_v18 }
  0xaf   : > { %9367 = vmatmul.mubr.f32.gmra.mrb[4].mxu0 %v10680_v51 }
  0xb0   : > { %9369 = vmatprep.mubr.f32.mxu0 %v10693_v40 }
  0xb1   : > { %8950 = vmatmul.mubr.f32.gmra.mrb[6].mxu1 %v10680_v51 }
  0xb2   : > { %8954 = vmatprep.mubr.f32.mxu1 %v11712_v8 }
  0xb3   : > { %9370 = vmatmul.mubr.f32.gmra.mrb[6].mxu0 %v10707_v17  ;;  %v1807_v17 = vld [vmem:[%s10225_s27 + $0x2] sm:$0xff] }
  0xb4   : > { %9374 = vmatprep.mubr.f32.mxu0 %v10622_v25  ;;  %v1818_v20 = vsel %vm264_vm0, %v1807_v17, 0 }
  0xb5   : > { %8955 = vmatmul.mubr.f32.vlgmr.msra.gmra.mrb[0].mxu1 %v10640_v57  ;;  %v10852_v5 = vand.u32 4294901760, %v1818_v20 }
  0xb6   : > { %8967 = vmatpush3.msra.mxu1 %v10561_v3  ;;  %8957 = vmatprep.mubr.f32.mxu1 %v10622_v25  ;;  %v10819_v3 = vand.u32 4294901760, %v8226_v1 }
  0xb7   : > { %9375 = vmatmul.mubr.f32.vlgmr.msra.gmra.mrb[0].mxu0 %v10652_v59  ;;  %8980 = vmatprep.subr.mxu1 %v10535_v29 }
  0xb8   : > { %9387 = vmatpush3.msra.mxu0 %v10568_v4  ;;  %9377 = vmatprep.mubr.f32.mxu0 %v10661_v38  ;;  %v10823_v4 = vand.u32 4294901760, %v8271_v28  ;;  %v10830_v41 = vsub.f32 %v8226_v1, %v10819_v3  ;;  %v10863_v1 = vsub.f32 %v1818_v20, %v10852_v5  ;;  %v8270_v20 = vld [vmem:[%s10225_s27 + $0x91] sm:$0xff] }
  0xb9   : > { %8958 = vmatmul.mubr.f32.gmra.mrb[2].mxu1 %v10652_v59  ;;  %9400 = vmatprep.subr.mxu0 %v10539_v33 }
  0xba   : > { %8960 = vmatprep.mubr.f32.mxu1 %v10661_v38  ;;  %v11714_v38 = vld [vmem:[#allocation14_spill] sm:$0xff] }
  0xbb   : > { %9378 = vmatmul.mubr.f32.gmra.mrb[2].mxu0 %v10677_v2 }
  0xbc   : > { %9380 = vmatprep.mubr.f32.mxu0 %v10690_v30 }
  0xbd   : > { %8961 = vmatmul.mubr.f32.gmra.mrb[4].mxu1 %v10677_v2 }
  0xbe   : > { %8963 = vmatprep.mubr.f32.mxu1 %v10690_v30  ;;  %v5786_v30 = vsel %vm264_vm0, %v8270_v20, 0 }
  0xbf   : > { %9381 = vmatmul.mubr.f32.gmra.mrb[4].mxu0 %v10704_v55  ;;  %v10890_v2 = vand.u32 4294901760, %v5786_v30 }
  0xc0   : > { %9383 = vmatprep.mubr.f32.mxu0 %v10715_v22  ;;  %v11656_v22 = vand.u32 4294901760, %v10863_v1 }
  0xc1   : > { %8964 = vmatmul.mubr.f32.gmra.mrb[6].mxu1 %v10704_v55  ;;  %v8269_v55 = vld [vmem:[%s10225_s27 + $0x81] sm:$0xff]  ;;  %v10899_v20 = vsub.f32 %v5786_v30, %v10890_v2 }
  0xc2   : > { %8968 = vmatprep.mubr.f32.mxu1 %v10572_v6 }
  0xc3   : > { %9384 = vmatmul.mubr.f32.gmra.mrb[6].mxu0 %v5137_v19  ;;  %v10844_v19 = vand.u32 4294901760, %v10830_v41  ;;  %v5926_v59 = vand.u32 4294901760, %v10899_v20 }
  0xc4   : > { %9388 = vmatprep.mubr.f32.mxu0 %v10579_v26 }
  0xc5   : > { %8969 = vmatmul.mubr.f32.vlgmr.msra.gmra.mrb[0].mxu1 %v10586_v58  ;;  %v1991_v24 = vsub.f32 %v10830_v41, %v10844_v19 }
  0xc6   : > { %8981 = vmatpush3.msra.mxu1 %v10535_v29  ;;  %8971 = vmatprep.mubr.f32.mxu1 %v10579_v26  ;;  %v10838_v29 = vsub.f32 %v8271_v28, %v10823_v4 }
  0xc7   : > { %9389 = vmatmul.mubr.f32.vlgmr.msra.gmra.mrb[0].mxu0 %v10601_v53  ;;  %8994 = vmatprep.subr.mxu1 %v10819_v3  ;;  %v1992_v28 = vand.u32 4294901760, %v1991_v24  ;;  %v1910_v24 = vsub.f32 %v10863_v1, %v11656_v22 }
  0xc8   : > { %9401 = vmatpush3.msra.mxu0 %v10539_v33  ;;  %9391 = vmatprep.mubr.f32.mxu0 %v10604_v12  ;;  %v10849_v33 = vand.u32 4294901760, %v10838_v29 }
  0xc9   : > { %8972 = vmatmul.mubr.f32.gmra.mrb[2].mxu1 %v10601_v53  ;;  %9414 = vmatprep.subr.mxu0 %v10823_v4 }
  0xca   : > { %8974 = vmatprep.mubr.f32.mxu1 %v10604_v12  ;;  %v5938_v8 = vsub.f32 %v10838_v29, %v10849_v33 }
  0xcb   : > { %9392 = vmatmul.mubr.f32.gmra.mrb[2].mxu0 %v10627_v62 }
  0xcc   : > { %9394 = vmatprep.mubr.f32.mxu0 %v10634_v7  ;;  %v5939_v17 = vand.u32 4294901760, %v5938_v8 }
  0xcd   : > { %8975 = vmatmul.mubr.f32.gmra.mrb[4].mxu1 %v10627_v62 }
  0xce   : > { %8977 = vmatprep.mubr.f32.mxu1 %v10634_v7 }
  0xcf   : > { %9395 = vmatmul.mubr.f32.gmra.mrb[4].mxu0 %v10657_v60 }
  0xd0   : > { %9397 = vmatprep.mubr.f32.mxu0 %v10666_v54 }
  0xd1   : > { %8978 = vmatmul.mubr.f32.gmra.mrb[6].mxu1 %v10657_v60 }
  0xd2   : > { %8982 = vmatprep.mubr.f32.mxu1 %v10572_v6  ;;  %v5783_v6 = vsel %vm264_vm0, %v8269_v55, 0  ;;  %v1911_v55 = vand.u32 4294901760, %v1910_v24 }
  0xd3   : > { %9398 = vmatmul.mubr.f32.gmra.mrb[6].mxu0 %v10682_v10  ;;  %v10884_v8 = vand.u32 4294901760, %v5783_v6 }
  0xd4   : > { %9402 = vmatprep.mubr.f32.mxu0 %v10579_v26 }
  0xd5   : > { %8983 = vmatmul.mubr.f32.vlgmr.msra.gmra.mrb[0].mxu1 %v10586_v58  ;;  %v10894_v22 = vsub.f32 %v5783_v6, %v10884_v8  ;;  %v11715_v6 = vld [vmem:[#allocation17_spill] sm:$0xff] }
  0xd6   : > { %8995 = vmatpush3.msra.mxu1 %v10819_v3  ;;  %8985 = vmatprep.mubr.f32.mxu1 %v10579_v26 }
  0xd7   : > { %9403 = vmatmul.mubr.f32.vlgmr.msra.gmra.mrb[0].mxu0 %v10601_v53  ;;  %9008 = vmatprep.subr.mxu1 %v1992_v28  ;;  %v10903_v24 = vand.u32 4294901760, %v10894_v22 }
  0xd8   : > { %9415 = vmatpush3.msra.mxu0 %v10823_v4  ;;  %9405 = vmatprep.mubr.f32.mxu0 %v10604_v12 }
  0xd9   : > { %8986 = vmatmul.mubr.f32.gmra.mrb[2].mxu1 %v10601_v53  ;;  %9428 = vmatprep.subr.mxu0 %v5939_v17  ;;  %11713 = vst [vmem:[#allocation43_spill] sm:$0xff] %v10903_v24  ;;  %v5917_v30 = vsub.f32 %v10894_v22, %v10903_v24 }
  0xda   : > { %8988 = vmatprep.mubr.f32.mxu1 %v10604_v12 }
  0xdb   : > { %9406 = vmatmul.mubr.f32.gmra.mrb[2].mxu0 %v10627_v62 }
  0xdc   : > { %9408 = vmatprep.mubr.f32.mxu0 %v10634_v7 }
  0xdd   : > { %8989 = vmatmul.mubr.f32.gmra.mrb[4].mxu1 %v10627_v62 }
  0xde   : > { %8991 = vmatprep.mubr.f32.mxu1 %v10634_v7 }
  0xdf   : > { %9409 = vmatmul.mubr.f32.gmra.mrb[4].mxu0 %v10657_v60 }
  0xe0   : > { %9411 = vmatprep.mubr.f32.mxu0 %v10666_v54 }
  0xe1   : > { %8992 = vmatmul.mubr.f32.gmra.mrb[6].mxu1 %v10657_v60 }
  0xe2   : > { %8996 = vmatprep.mubr.f32.mxu1 %v1911_v55  ;;  %v11727_v55 = vld [vmem:[#allocation6_spill] sm:$0xff] }
  0xe3   : > { %9412 = vmatmul.mubr.f32.gmra.mrb[6].mxu0 %v10682_v10  ;;  %v11716_v10 = vld [vmem:[#allocation33_spill] sm:$0xff] }
  0xe4   : > { %9416 = vmatprep.mubr.f32.mxu0 %v10334_v9  ;;  %v11717_v9 = vld [vmem:[#allocation15_spill] sm:$0xff] }
  0xe5   : > { %8997 = vmatmul.mubr.f32.vlgmr.msra.gmra.mrb[0].mxu1 %v10314_v56  ;;  %v11718_v56 = vld [vmem:[#allocation18_spill] sm:$0xff] }
  0xe6   : > { %9009 = vmatpush3.msra.mxu1 %v1992_v28  ;;  %8999 = vmatprep.mubr.f32.mxu1 %v11714_v38  ;;  %v5927_v38 = vsub.f32 %v10899_v20, %v5926_v59  ;;  %v10921_v28 = vand.u32 4294901760, %v5917_v30  ;;  %v11730_v30 = vld [vmem:[#allocation27_spill] sm:$0xff] }
  0xe7   : > { %9417 = vmatmul.mubr.f32.vlgmr.msra.gmra.mrb[0].mxu0 %v11715_v6  ;;  %9022 = vmatprep.subr.mxu1 %v10830_v41  ;;  %v11728_v6 = vld [vmem:[#allocation11_spill] sm:$0xff] }
  0xe8   : > { %9429 = vmatpush3.msra.mxu0 %v5939_v17  ;;  %9419 = vmatprep.mubr.f32.mxu0 %v11716_v10  ;;  %v5928_v17 = vand.u32 4294901760, %v5927_v38  ;;  %v11729_v10 = vld [vmem:[#allocation23_spill] sm:$0xff]  ;;  %v11733_v38 = vld [vmem:[#allocation32_spill] sm:$0xff] }
  0xe9   : > { %9000 = vmatmul.mubr.f32.gmra.mrb[2].mxu1 %v11717_v9  ;;  %9442 = vmatprep.subr.mxu0 %v10838_v29  ;;  %v11731_v9 = vld [vmem:[#allocation20_spill] sm:$0xff] }
  0xea   : > { %9002 = vmatprep.mubr.f32.mxu1 %v11718_v56  ;;  %v11732_v56 = vld [vmem:[#allocation26_spill] sm:$0xff] }
  0xeb   : > { %9420 = vmatmul.mubr.f32.gmra.mrb[2].mxu0 %v10438_v0  ;;  %v11722_v0 = vld [vmem:[#allocation5_spill] sm:$0xff] }
  0xec   : > { %9422 = vmatprep.mubr.f32.mxu0 %v10448_v27  ;;  %v11719_v27 = vld [vmem:[#allocation16_spill] sm:$0xff] }
  0xed   : > { %9003 = vmatmul.mubr.f32.gmra.mrb[4].mxu1 %v10428_v49  ;;  %v11721_v49 = vld [vmem:[#allocation24_spill] sm:$0xff] }
  0xee   : > { %9005 = vmatprep.mubr.f32.mxu1 %v10446_v13  ;;  %v11723_v13 = vld [vmem:[#allocation2_spill] sm:$0xff] }
  0xef   : > { %9423 = vmatmul.mubr.f32.gmra.mrb[4].mxu0 %v10458_v11  ;;  %v11724_v11 = vld [vmem:[#allocation4_spill] sm:$0xff] }
  0xf0   : > { %9425 = vmatprep.mubr.f32.mxu0 %v10921_v28 }
  0xf1   : > { %9006 = vmatmul.mubr.f32.gmra.mrb[6].mxu1 %v10453_v23  ;;  %v11720_v23 = vld [vmem:[#allocation21_spill] sm:$0xff] }
  0xf2   : > { %9010 = vmatprep.mubr.f32.mxu1 %v10852_v5 }
  0xf3   : > { %9426 = vmatmul.mubr.f32.gmra.mrb[6].mxu0 %v5928_v17  ;;  %v11734_v17 = vld [vmem:[#allocation29_spill] sm:$0xff] }
  0xf4   : > { %9430 = vmatprep.mubr.f32.mxu0 %v10262_v32 }
  0xf5   : > { %9011 = vmatmul.mubr.f32.vlgmr.msra.gmra.mrb[0].mxu1 %v10242_v21 }
  0xf6   : > { %9023 = vmatpush3.msra.mxu1 %v10830_v41  ;;  %9013 = vmatprep.mubr.f32.mxu1 %v10260_v31  ;;  %v11725_v41 = vld [vmem:[#allocation10_spill] sm:$0xff] }
  0xf7   : > { %9431 = vmatmul.mubr.f32.vlgmr.msra.gmra.mrb[0].mxu0 %v10285_v43  ;;  %9036 = vmatprep.subr.mxu1 %v10819_v3 }
  0xf8   : > { %9443 = vmatpush3.msra.mxu0 %v10838_v29  ;;  %9433 = vmatprep.mubr.f32.mxu0 %v10344_v15  ;;  %v11726_v29 = vld [vmem:[#allocation19_spill] sm:$0xff] }
  0xf9   : > { %9014 = vmatmul.mubr.f32.gmra.mrb[2].mxu1 %v10267_v34  ;;  %9456 = vmatprep.subr.mxu0 %v10823_v4 }
  0xfa   : > { %9016 = vmatprep.mubr.f32.mxu1 %v10287_v44 }
  0xfb   : > { %9434 = vmatmul.mubr.f32.gmra.mrb[2].mxu0 %v10363_v35 }
  0xfc   : > { %9436 = vmatprep.mubr.f32.mxu0 %v10371_v46 }
  0xfd   : > { %9017 = vmatmul.mubr.f32.gmra.mrb[4].mxu1 %v11719_v27 }
  0xfe   : > { %9019 = vmatprep.mubr.f32.mxu1 %v11720_v23 }
  0xff   : > { %9437 = vmatmul.mubr.f32.gmra.mrb[4].mxu0 %v10397_v63 }
 0x100   : > { %9439 = vmatprep.mubr.f32.mxu0 %v10884_v8 }
 0x101   : > { %9020 = vmatmul.mubr.f32.gmra.mrb[6].mxu1 %v11721_v49 }
 0x102   : > { %9024 = vmatprep.mubr.f32.mxu1 %v10863_v1 }
 0x103   : > { %9440 = vmatmul.mubr.f32.gmra.mrb[6].mxu0 %v10890_v2 }
 0x104   : > { %9444 = vmatprep.mubr.f32.mxu0 %v11722_v0  ;;  %v11735_v0 = vand.u32 4294901760, %v10863_v1  ;;  %v11741_v1 = vld [vmem:[#allocation9_spill] sm:$0xff] }
 0x105   : > { %9025 = vmatmul.mubr.f32.vlgmr.msra.gmra.mrb[0].mxu1 %v11723_v13  ;;  %v11736_v13 = vld [vmem:[#allocation8_spill] sm:$0xff] }
 0x106   : > { %9037 = vmatpush3.msra.mxu1 %v10819_v3  ;;  %9027 = vmatprep.mubr.f32.mxu1 %v11724_v11  ;;  %v11737_v11 = vld [vmem:[#allocation3_spill] sm:$0xff] }
 0x107   : > { %9445 = vmatmul.mubr.f32.vlgmr.msra.gmra.mrb[0].mxu0 %v11725_v41  ;;  %9050 = vmatprep.subr.mxu1 %v10844_v19  ;;  %v11738_v41 = vld [vmem:[#allocation7_spill] sm:$0xff] }
 0x108   : > { %9457 = vmatpush3.msra.mxu0 %v10823_v4  ;;  %9447 = vmatprep.mubr.f32.mxu0 %v11726_v29  ;;  %v11739_v29 = vld [vmem:[#allocation12_spill] sm:$0xff] }
 0x109   : > { %9028 = vmatmul.mubr.f32.gmra.mrb[2].mxu1 %v11727_v55  ;;  %9470 = vmatprep.subr.mxu0 %v10849_v33  ;;  %v11740_v55 = vld [vmem:[#allocation22_spill] sm:$0xff] }
 0x10a   : > { %9030 = vmatprep.mubr.f32.mxu1 %v11728_v6  ;;  %v11742_v6 = vld [vmem:[#allocation13_spill] sm:$0xff] }
 0x10b   : > { %9448 = vmatmul.mubr.f32.gmra.mrb[2].mxu0 %v11729_v10  ;;  %v11743_v10 = vld [vmem:[#allocation28_spill] sm:$0xff] }
 0x10c   : > { %9450 = vmatprep.mubr.f32.mxu0 %v11730_v30  ;;  %v11744_v30 = vld [vmem:[#allocation31_spill] sm:$0xff] }
 0x10d   : > { %9031 = vmatmul.mubr.f32.gmra.mrb[4].mxu1 %v11731_v9  ;;  %v11746_v9 = vld [vmem:[#allocation30_spill] sm:$0xff] }
 0x10e   : > { %9033 = vmatprep.mubr.f32.mxu1 %v11732_v56  ;;  %v11747_v56 = vld [vmem:[#allocation35_spill] sm:$0xff] }
 0x10f   : > { %9451 = vmatmul.mubr.f32.gmra.mrb[4].mxu0 %v11733_v38  ;;  %v11748_v38 = vld [vmem:[#allocation34_spill] sm:$0xff] }
 0x110   : > { %9453 = vmatprep.mubr.f32.mxu0 %v10894_v22 }
 0x111   : > { %9034 = vmatmul.mubr.f32.gmra.mrb[6].mxu1 %v11734_v17  ;;  %v8280_v17 = vld [vmem:[%s11607_s1 + $0x40] sm:$0xff] }
 0x112   : > { %9038 = vmatprep.mubr.f32.mxu1 %v11735_v0 }
 0x113   : > { %9454 = vmatmul.mubr.f32.gmra.mrb[6].mxu0 %v10899_v20 }
 0x114   : > { %9458 = vmatprep.mubr.f32.mxu0 %v11736_v13  ;;  %v11001_v13 = vand.u32 4294901760, %v8280_v17 }
 0x115   : > { %9039 = vmatmul.mubr.f32.vlgmr.msra.gmra.mrb[0].mxu1 %v11737_v11 }
 0x116   : > { %9051 = vmatpush3.msra.mxu1 %v10844_v19  ;;  %9041 = vmatprep.mubr.f32.mxu1 %v11738_v41  ;;  %v11745_v19 = vld [vmem:[#allocation25_spill] sm:$0xff] }
 0x117   : > { %9459 = vmatmul.mubr.f32.vlgmr.msra.gmra.mrb[0].mxu0 %v11739_v29  ;;  %9064 = vmatprep.subr.mxu1 %v10819_v3  ;;  %v8273_v29 = vld [vmem:[%s10225_s27 + $0x32] sm:$0xff] }
 0x118   : > { %9471 = vmatpush3.msra.mxu0 %v10849_v33  ;;  %9461 = vmatprep.mubr.f32.mxu0 %v11740_v55  ;;  %v8235_v33 = vld [vmem:[%s11607_s1 + $0x18] sm:$0xff]  ;;  %v8274_v55 = vld [vmem:[%s10225_s27 + $0x42] sm:$0xff] }
 0x119   : > { %9042 = vmatmul.mubr.f32.gmra.mrb[2].mxu1 %v11741_v1  ;;  %9484 = vmatprep.subr.mxu0 %v10823_v4  ;;  %v10997_v0 = vand.u32 4294901760, %v8235_v33 }
 0x11a   : > { %9044 = vmatprep.mubr.f32.mxu1 %v11742_v6 }
 0x11b   : > { %9462 = vmatmul.mubr.f32.gmra.mrb[2].mxu0 %v11743_v10  ;;  %v11008_v20 = vsub.f32 %v8235_v33, %v10997_v0  ;;  %v6557_v10 = vsel %vm264_vm0, %v8273_v29, 0 }
 0x11c   : > { %9464 = vmatprep.mubr.f32.mxu0 %v11744_v30 }
 0x11d   : > { %9045 = vmatmul.mubr.f32.gmra.mrb[4].mxu1 %v11745_v19  ;;  %v11021_v11 = vand.u32 4294901760, %v11008_v20  ;;  %v6560_v19 = vsel %vm264_vm0, %v8274_v55, 0 }
 0x11e   : > { %9047 = vmatprep.mubr.f32.mxu1 %v11746_v9  ;;  %v8275_v9 = vld [vmem:[%s10225_s27 + $0x52] sm:$0xff] }
 0x11f   : > { %9465 = vmatmul.mubr.f32.gmra.mrb[4].mxu0 %v11747_v56  ;;  %v2781_v1 = vsub.f32 %v11008_v20, %v11021_v11  ;;  %v8276_v56 = vld [vmem:[%s10225_s27 + $0x62] sm:$0xff]  ;;  %v6563_v29 = vsel %vm264_vm0, %v8275_v9, 0 }
 0x120   : > { %9467 = vmatprep.mubr.f32.mxu0 %v10903_v24  ;;  %v8277_v24 = vld [vmem:[%s10225_s27 + $0x72] sm:$0xff]  ;;  %v11067_v9 = vand.u32 4294901760, %v6563_v29 }
 0x121   : > { %9048 = vmatmul.mubr.f32.gmra.mrb[6].mxu1 %v11748_v38  ;;  %v2782_v33 = vand.u32 4294901760, %v2781_v1 }
 0x122   : > { %9052 = vmatprep.mubr.f32.mxu1 %v10852_v5 }
 0x123   : > { %9468 = vmatmul.mubr.f32.gmra.mrb[6].mxu0 %v5926_v59  ;;  %v8272_v59 = vld [vmem:[%s10225_s27 + $0x22] sm:$0xff] }
 0x124   : > { %9472 = vmatprep.mubr.f32.mxu0 %v10262_v32 }
 0x125   : > { %9053 = vmatmul.mubr.f32.vlgmr.msra.gmra.mrb[0].mxu1 %v10242_v21 }
 0x126   : > { %9065 = vmatpush3.msra.mxu1 %v10819_v3  ;;  %9055 = vmatprep.mubr.f32.mxu1 %v10260_v31  ;;  %v11016_v3 = vsub.f32 %v8280_v17, %v11001_v13  ;;  %v11050_v17 = vand.u32 4294901760, %v6557_v10 }
 0x127   : > { %9473 = vmatmul.mubr.f32.vlgmr.msra.gmra.mrb[0].mxu0 %v10285_v43  ;;  %9078 = vmatprep.subr.mxu1 %v10997_v0 }
 0x128   : > { %9485 = vmatpush3.msra.mxu0 %v10823_v4  ;;  %9475 = vmatprep.mubr.f32.mxu0 %v10344_v15  ;;  %v6554_v4 = vsel %vm264_vm0, %v8272_v59, 0  ;;  %v11027_v41 = vand.u32 4294901760, %v11016_v3  ;;  %v11053_v59 = vand.u32 4294901760, %v6560_v19  ;;  %v11065_v1 = vsub.f32 %v6557_v10, %v11050_v17  ;;  %v8279_v10 = vld [vmem:[%s10225_s27 + $0x92] sm:$0xff] }
 0x129   : > { %9056 = vmatmul.mubr.f32.gmra.mrb[2].mxu1 %v10267_v34  ;;  %9498 = vmatprep.subr.mxu0 %v11001_v13  ;;  %v11035_v6 = vand.u32 4294901760, %v6554_v4 }
 0x12a   : > { %9058 = vmatprep.mubr.f32.mxu1 %v10287_v44  ;;  %v6727_v30 = vsub.f32 %v11016_v3, %v11027_v41 }
 0x12b   : > { %9476 = vmatmul.mubr.f32.gmra.mrb[2].mxu0 %v10363_v35  ;;  %v11048_v38 = vsub.f32 %v6554_v4, %v11035_v6  ;;  %v8278_v4 = vld [vmem:[%s10225_s27 + $0x82] sm:$0xff] }
 0x12c   : > { %9478 = vmatprep.mubr.f32.mxu0 %v10371_v46  ;;  %v6728_v55 = vand.u32 4294901760, %v6727_v30 }
 0x12d   : > { %9059 = vmatmul.mubr.f32.gmra.mrb[4].mxu1 %v11719_v27 }
 0x12e   : > { %9061 = vmatprep.mubr.f32.mxu1 %v11720_v23 }
 0x12f   : > { %9479 = vmatmul.mubr.f32.gmra.mrb[4].mxu0 %v10397_v63 }
 0x130   : > { %9481 = vmatprep.mubr.f32.mxu0 %v10884_v8 }
 0x131   : > { %9062 = vmatmul.mubr.f32.gmra.mrb[6].mxu1 %v11721_v49 }
 0x132   : > { %9066 = vmatprep.mubr.f32.mxu1 %v10852_v5  ;;  %v6566_v5 = vsel %vm264_vm0, %v8276_v56, 0  ;;  %v11087_v56 = vsub.f32 %v6563_v29, %v11067_v9 }
 0x133   : > { %9482 = vmatmul.mubr.f32.gmra.mrb[6].mxu0 %v10890_v2  ;;  %v11074_v30 = vand.u32 4294901760, %v6566_v5 }
 0x134   : > { %9486 = vmatprep.mubr.f32.mxu0 %v10262_v32  ;;  %v11660_v32 = vand.u32 4294901760, %v11048_v38 }
 0x135   : > { %9067 = vmatmul.mubr.f32.vlgmr.msra.gmra.mrb[0].mxu1 %v10242_v21  ;;  %v11072_v21 = vsub.f32 %v6560_v19, %v11053_v59  ;;  %v11661_v19 = vand.u32 4294901760, %v11065_v1 }
 0x136   : > { %9079 = vmatpush3.msra.mxu1 %v10997_v0  ;;  %9069 = vmatprep.mubr.f32.mxu1 %v10260_v31  ;;  %v6569_v31 = vsel %vm264_vm0, %v8277_v24, 0 }
 0x137   : > { %9487 = vmatmul.mubr.f32.vlgmr.msra.gmra.mrb[0].mxu0 %v10285_v43  ;;  %9092 = vmatprep.subr.mxu1 %v2782_v33  ;;  %v6572_v43 = vsel %vm264_vm0, %v8278_v4, 0  ;;  %v11089_v24 = vand.u32 4294901760, %v6569_v31  ;;  %v11094_v4 = vsub.f32 %v6566_v5, %v11074_v30  ;;  %v6656_v29 = vsub.f32 %v11065_v1, %v11661_v19 }
 0x138   : > { %9499 = vmatpush3.msra.mxu0 %v11001_v13  ;;  %9489 = vmatprep.mubr.f32.mxu0 %v10344_v15  ;;  %v6646_v15 = vsub.f32 %v11048_v38, %v11660_v32 }
 0x139   : > { %9070 = vmatmul.mubr.f32.gmra.mrb[2].mxu1 %v10267_v34  ;;  %9512 = vmatprep.subr.mxu0 %v6728_v55  ;;  %v11662_v34 = vand.u32 4294901760, %v11072_v21  ;;  %v11107_v32 = vsub.f32 %v6569_v31, %v11089_v24  ;;  %v6657_v31 = vand.u32 4294901760, %v6656_v29 }
 0x13a   : > { %9072 = vmatprep.mubr.f32.mxu1 %v10287_v44  ;;  %v11096_v44 = vand.u32 4294901760, %v6572_v43 }
 0x13b   : > { %9490 = vmatmul.mubr.f32.gmra.mrb[2].mxu0 %v10363_v35  ;;  %v6575_v35 = vsel %vm264_vm0, %v8279_v10, 0  ;;  %v6647_v10 = vand.u32 4294901760, %v6646_v15  ;;  %v6695_v19 = vand.u32 4294901760, %v11107_v32 }
 0x13c   : > { %9492 = vmatprep.mubr.f32.mxu0 %v10371_v46  ;;  %v6675_v46 = vand.u32 4294901760, %v11087_v56  ;;  %v11109_v5 = vand.u32 4294901760, %v6575_v35 }
 0x13d   : > { %9073 = vmatmul.mubr.f32.gmra.mrb[4].mxu1 %v11719_v27  ;;  %v6666_v27 = vsub.f32 %v11072_v21, %v11662_v34 }
 0x13e   : > { %9075 = vmatprep.mubr.f32.mxu1 %v11720_v23  ;;  %v11117_v23 = vsub.f32 %v6572_v43, %v11096_v44  ;;  %v6676_v15 = vsub.f32 %v11087_v56, %v6675_v46  ;;  %v11127_v34 = vsub.f32 %v6575_v35, %v11109_v5  ;;  %v11749_v43 = vand.u32 4294901760, %v11094_v4 }
 0x13f   : > { %9493 = vmatmul.mubr.f32.gmra.mrb[4].mxu0 %v10397_v63  ;;  %v6667_v63 = vand.u32 4294901760, %v6666_v27  ;;  %v6696_v35 = vsub.f32 %v11107_v32, %v6695_v19 }
 0x140   : > { %9495 = vmatprep.mubr.f32.mxu0 %v10884_v8  ;;  %v6677_v29 = vand.u32 4294901760, %v6676_v15 }
 0x141   : > { %9076 = vmatmul.mubr.f32.gmra.mrb[6].mxu1 %v11721_v49  ;;  %v6686_v49 = vsub.f32 %v11094_v4, %v11749_v43 }
 0x142   : > { %9080 = vmatprep.mubr.f32.mxu1 %v10696_v45  ;;  %v6705_v45 = vand.u32 4294901760, %v11117_v23 }
 0x143   : > { %9496 = vmatmul.mubr.f32.gmra.mrb[6].mxu0 %v10890_v2  ;;  %v11750_v2 = vld [vmem:[#allocation40_spill] sm:$0xff]  ;;  %v6687_v27 = vand.u32 4294901760, %v6686_v49 }
 0x144   : > { %9500 = vmatprep.mubr.f32.mxu0 %v6647_v10  ;;  %v6715_v10 = vand.u32 4294901760, %v11127_v34 }
 0x145   : > { %9081 = vmatmul.mubr.f32.vlgmr.msra.gmra.mrb[0].mxu1 %v10685_v39  ;;  %v6706_v39 = vsub.f32 %v11117_v23, %v6705_v45 }
 0x146   : > { %9093 = vmatpush3.msra.mxu1 %v2782_v33  ;;  %9083 = vmatprep.mubr.f32.mxu1 %v11750_v2  ;;  %v6697_v33 = vand.u32 4294901760, %v6696_v35 }
 0x147   : > { %9501 = vmatmul.mubr.f32.vlgmr.msra.gmra.mrb[0].mxu0 %v6657_v31  ;;  %9106 = vmatprep.subr.mxu1 %v11008_v20  ;;  %v6716_v31 = vsub.f32 %v11127_v34, %v6715_v10 }
 0x148   : > { %9513 = vmatpush3.msra.mxu0 %v6728_v55  ;;  %9503 = vmatprep.mubr.f32.mxu0 %v6667_v63  ;;  %v6707_v55 = vand.u32 4294901760, %v6706_v39 }
 0x149   : > { %9084 = vmatmul.mubr.f32.gmra.mrb[2].mxu1 %v10710_v48  ;;  %9526 = vmatprep.subr.mxu0 %v11016_v3  ;;  %v6717_v63 = vand.u32 4294901760, %v6716_v31  ;;  %v8244_v48 = vld [vmem:[%s11607_s1 + $0x20] sm:$0xff] }
 0x14a   : > { %9086 = vmatprep.mubr.f32.mxu1 %v10721_v52  ;;  %v11760_v52 = vld [vmem:[#allocation42_spill] sm:$0xff] }
 0x14b   : > { %9504 = vmatmul.mubr.f32.gmra.mrb[2].mxu0 %v6677_v29  ;;  %v7336_v31 = vld [vmem:[%s11241_s24 + $0x20] sm:$0xff] }
 0x14c   : > { %9506 = vmatprep.mubr.f32.mxu0 %v6687_v27 }
 0x14d   : > { %9087 = vmatmul.mubr.f32.gmra.mrb[4].mxu1 %v10729_v37 }
 0x14e   : > { %9089 = vmatprep.mubr.f32.mxu1 %v10737_v47  ;;  %v11227_v47 = vand.u32 4294901760, %v8244_v48 }
 0x14f   : > { %9507 = vmatmul.mubr.f32.gmra.mrb[4].mxu0 %v6697_v33 }
 0x150   : > { %9509 = vmatprep.mubr.f32.mxu0 %v6707_v55 }
 0x151   : > { %9090 = vmatmul.mubr.f32.gmra.mrb[6].mxu1 %v10743_v42 }
 0x152   : > { %9094 = vmatprep.mubr.f32.mxu1 %v10586_v58 }
 0x153   : > { %9510 = vmatmul.mubr.f32.gmra.mrb[6].mxu0 %v6717_v63 }
 0x154   : > { %9514 = vmatprep.mubr.f32.mxu0 %v11035_v6 }
 0x155   : > { %9095 = vmatmul.mubr.f32.vlgmr.msra.gmra.mrb[0].mxu1 %v10579_v26 }
 0x156   : > { %9107 = vmatpush3.msra.mxu1 %v11008_v20  ;;  %9097 = vmatprep.mubr.f32.mxu1 %v10601_v53  ;;  %v11246_v20 = vsub.f32 %v8244_v48, %v11227_v47 }
 0x157   : > { %9515 = vmatmul.mubr.f32.vlgmr.msra.gmra.mrb[0].mxu0 %v11050_v17  ;;  %9120 = vmatprep.subr.mxu1 %v10997_v0 }
 0x158   : > { %9527 = vmatpush3.msra.mxu0 %v11016_v3  ;;  %9517 = vmatprep.mubr.f32.mxu0 %v11053_v59  ;;  %v7332_v3 = vld [vmem:[%s11241_s24] sm:$0xff] }
 0x159   : > { %9098 = vmatmul.mubr.f32.gmra.mrb[2].mxu1 %v10604_v12  ;;  %9540 = vmatprep.subr.mxu0 %v11001_v13 }
 0x15a   : > { %9100 = vmatprep.mubr.f32.mxu1 %v10627_v62 }
 0x15b   : > { %9518 = vmatmul.mubr.f32.gmra.mrb[2].mxu0 %v11067_v9 }
 0x15c   : > { %9520 = vmatprep.mubr.f32.mxu0 %v11074_v30 }
 0x15d   : > { %9101 = vmatmul.mubr.f32.gmra.mrb[4].mxu1 %v10634_v7 }
 0x15e   : > { %9103 = vmatprep.mubr.f32.mxu1 %v10657_v60 }
 0x15f   : > { %9521 = vmatmul.mubr.f32.gmra.mrb[4].mxu0 %v11089_v24 }
 0x160   : > { %9523 = vmatprep.mubr.f32.mxu0 %v11096_v44 }
 0x161   : > { %9104 = vmatmul.mubr.f32.gmra.mrb[6].mxu1 %v10666_v54 }
 0x162   : > { %9108 = vmatprep.mubr.f32.mxu1 %v10611_v61  ;;  %v11752_v61 = vld [vmem:[#allocation36_spill] sm:$0xff] }
 0x163   : > { %9524 = vmatmul.mubr.f32.gmra.mrb[6].mxu0 %v11109_v5 }
 0x164   : > { %9528 = vmatprep.mubr.f32.mxu0 %v11048_v38 }
 0x165   : > { %9109 = vmatmul.mubr.f32.vlgmr.msra.gmra.mrb[0].mxu1 %v10599_v50  ;;  %v11751_v50 = vand.u32 4294901760, %v11048_v38  ;;  %v8237_v38 = vld [vmem:[%s10225_s27 + $0x21] sm:$0xff] }
 0x166   : > { %9121 = vmatpush3.msra.mxu1 %v10997_v0  ;;  %9111 = vmatprep.mubr.f32.mxu1 %v10625_v14  ;;  %v11756_v14 = vld [vmem:[#allocation38_spill] sm:$0xff] }
 0x167   : > { %9529 = vmatmul.mubr.f32.vlgmr.msra.gmra.mrb[0].mxu0 %v11065_v1  ;;  %9134 = vmatprep.subr.mxu1 %v11021_v11 }
 0x168   : > { %9541 = vmatpush3.msra.mxu0 %v11001_v13  ;;  %9531 = vmatprep.mubr.f32.mxu0 %v11072_v21 }
 0x169   : > { %9112 = vmatmul.mubr.f32.gmra.mrb[2].mxu1 %v10632_v16  ;;  %9554 = vmatprep.subr.mxu0 %v11027_v41  ;;  %v11758_v16 = vld [vmem:[#allocation39_spill] sm:$0xff] }
 0x16a   : > { %9114 = vmatprep.mubr.f32.mxu1 %v10655_v36  ;;  %v11755_v36 = vld [vmem:[#allocation37_spill] sm:$0xff] }
 0x16b   : > { %9532 = vmatmul.mubr.f32.gmra.mrb[2].mxu0 %v11087_v56 }
 0x16c   : > { %9534 = vmatprep.mubr.f32.mxu0 %v11094_v4  ;;  %v7334_v4 = vld [vmem:[%s11241_s24 + $0x10] sm:$0xff] }
 0x16d   : > { %9115 = vmatmul.mubr.f32.gmra.mrb[4].mxu1 %v10664_v18  ;;  %v7340_v18 = vld [vmem:[%s11609_s3] sm:$0xf]  ;;  %v7349_v35 = vsel %vm7341_vm2, %v7334_v4, 0  ;;  %v7339_v4 = vld [vmem:[%s11241_s24 + $0x38] sm:$0xff] }
 0x16e   : > { %9117 = vmatprep.mubr.f32.mxu1 %v10680_v51  ;;  %v11753_v51 = vand.u32 4294901760, %v11065_v1  ;;  %v7368_v37 = vsel %vm7366_vm1, %v7340_v18, 0  ;;  %v8238_v1 = vld [vmem:[%s10225_s27 + $0x31] sm:$0xff]  ;;  %v7337_v18 = vld [vmem:[%s11241_s24 + $0x28] sm:$0xff] }
 0x16f   : > { %9535 = vmatmul.mubr.f32.gmra.mrb[4].mxu0 %v11107_v32  ;;  %v11232_v42 = vand.u32 4294901760, %v7368_v37  ;;  %v7343_v32 = vsel %vm7341_vm2, %v7332_v3, 0  ;;  %v3403_v15 = vsel %vm264_vm0, %v8238_v1, 0 }
 0x170   : > { %9537 = vmatprep.mubr.f32.mxu0 %v11117_v23  ;;  %v11280_v23 = vand.u32 4294901760, %v7343_v32  ;;  %v11298_v39 = vand.u32 4294901760, %v3403_v15 }
 0x171   : > { %9118 = vmatmul.mubr.f32.gmra.mrb[6].mxu1 %v10693_v40  ;;  %v11754_v40 = vand.u32 4294901760, %v11072_v21 }
 0x172   : > { %9122 = vmatprep.mubr.f32.mxu1 %v10640_v57  ;;  %v11759_v57 = vld [vmem:[#allocation41_spill] sm:$0xff]  ;;  %v11306_v63 = vsub.f32 %v7343_v32, %v11280_v23  ;;  %v11331_v48 = vsub.f32 %v3403_v15, %v11298_v39  ;;  %v7358_v32 = vsel %vm7341_vm2, %v7337_v18, 0 }
 0x173   : > { %9538 = vmatmul.mubr.f32.gmra.mrb[6].mxu0 %v11127_v34  ;;  %v3400_v34 = vsel %vm264_vm0, %v8237_v38, 0 }
 0x174   : > { %9542 = vmatprep.mubr.f32.mxu0 %v11751_v50  ;;  %v11290_v29 = vand.u32 4294901760, %v3400_v34 }
 0x175   : > { %9123 = vmatmul.mubr.f32.vlgmr.msra.gmra.mrb[0].mxu1 %v10622_v25  ;;  %v11757_v25 = vmov %v11749_v43  ;;  %v8239_v43 = vld [vmem:[%s10225_s27 + $0x41] sm:$0xff] }
 0x176   : > { %9135 = vmatpush3.msra.mxu1 %v11021_v11  ;;  %9125 = vmatprep.mubr.f32.mxu1 %v11752_v61  ;;  %v11255_v11 = vsub.f32 %v7368_v37, %v11232_v42  ;;  %v3406_v33 = vsel %vm264_vm0, %v8239_v43, 0  ;;  %v8241_v61 = vld [vmem:[%s10225_s27 + $0x61] sm:$0xff]  ;;  %v7338_v37 = vld [vmem:[%s11241_s24 + $0x30] sm:$0xff] }
 0x177   : > { %9543 = vmatmul.mubr.f32.vlgmr.msra.gmra.mrb[0].mxu0 %v11753_v51  ;;  %9148 = vmatprep.subr.mxu1 %v10997_v0  ;;  %v11313_v51 = vand.u32 4294901760, %v7349_v35 }
 0x178   : > { %9555 = vmatpush3.msra.mxu0 %v11027_v41  ;;  %9545 = vmatprep.mubr.f32.mxu0 %v11754_v40  ;;  %v11261_v41 = vand.u32 4294901760, %v11246_v20  ;;  %v11269_v21 = vand.u32 4294901760, %v11255_v11 }
 0x179   : > { %9126 = vmatmul.mubr.f32.gmra.mrb[2].mxu1 %v11755_v36  ;;  %9568 = vmatprep.subr.mxu0 %v11001_v13  ;;  %v8242_v36 = vld [vmem:[%s10225_s27 + $0x71] sm:$0xff]  ;;  %v11349_v38 = vsub.f32 %v7349_v35, %v11313_v51 }
 0x17a   : > { %9128 = vmatprep.mubr.f32.mxu1 %v11756_v14  ;;  %v7520_v2 = vsub.f32 %v11255_v11, %v11269_v21 }
 0x17b   : > { %9546 = vmatmul.mubr.f32.gmra.mrb[2].mxu0 %v6675_v46  ;;  %v3570_v46 = vsub.f32 %v11246_v20, %v11261_v41  ;;  %v11664_v35 = vand.u32 4294901760, %v11349_v38 }
 0x17c   : > { %9548 = vmatprep.mubr.f32.mxu0 %v11757_v25  ;;  %v11318_v14 = vand.u32 4294901760, %v7520_v2  ;;  %v11321_v25 = vsub.f32 %v3400_v34, %v11290_v29  ;;  %v11382_v2 = vand.u32 4294901760, %v7358_v32 }
 0x17d   : > { %9129 = vmatmul.mubr.f32.gmra.mrb[4].mxu1 %v11758_v16  ;;  %v11303_v55 = vand.u32 4294901760, %v3570_v46  ;;  %v11323_v16 = vand.u32 4294901760, %v3406_v33 }
 0x17e   : > { %9131 = vmatprep.mubr.f32.mxu1 %v11759_v57  ;;  %v7355_v57 = vsel %vm7341_vm2, %v7336_v31, 0  ;;  %v3498_v1 = vand.u32 4294901760, %v11321_v25 }
 0x17f   : > { %9549 = vmatmul.mubr.f32.gmra.mrb[4].mxu0 %v6695_v19  ;;  %v7333_v19 = vld [vmem:[%s11241_s24 + $0x8] sm:$0xff] }
 0x180   : > { %9551 = vmatprep.mubr.f32.mxu0 %v6705_v45  ;;  %v7346_v49 = vsel %vm7341_vm2, %v7333_v19, 0  ;;  %v8240_v45 = vld [vmem:[%s10225_s27 + $0x51] sm:$0xff]  ;;  %v11358_v19 = vsub.f32 %v3406_v33, %v11323_v16  ;;  %v3499_v31 = vsub.f32 %v11321_v25, %v3498_v1 }
 0x181   : > { %9132 = vmatmul.mubr.f32.gmra.mrb[6].mxu1 %v11760_v52  ;;  %v11308_v50 = vand.u32 4294901760, %v7346_v49  ;;  %v3412_v52 = vsel %vm264_vm0, %v8241_v61, 0 }
 0x182   : > { %9136 = vmatprep.mubr.f32.mxu1 %v10586_v58  ;;  %v11360_v34 = vand.u32 4294901760, %v3412_v52 }
 0x183   : > { %9552 = vmatmul.mubr.f32.gmra.mrb[6].mxu0 %v6715_v10  ;;  %v7335_v10 = vld [vmem:[%s11241_s24 + $0x18] sm:$0xff]  ;;  %v11341_v3 = vsub.f32 %v7346_v49, %v11308_v50 }
 0x184   : > { %9556 = vmatprep.mubr.f32.mxu0 %v11035_v6  ;;  %v7352_v40 = vsel %vm7341_vm2, %v7335_v10, 0  ;;  %v11398_v61 = vsub.f32 %v3412_v52, %v11360_v34 }
 0x185   : > { %9137 = vmatmul.mubr.f32.vlgmr.msra.gmra.mrb[0].mxu1 %v10579_v26 }
 0x186   : > { %9149 = vmatpush3.msra.mxu1 %v10997_v0  ;;  %9139 = vmatprep.mubr.f32.mxu1 %v10601_v53  ;;  %v8236_v0 = vld [vmem:[%s10225_s27 + $0x11] sm:$0xff] }
 0x187   : > { %9557 = vmatmul.mubr.f32.vlgmr.msra.gmra.mrb[0].mxu0 %v11050_v17  ;;  %9162 = vmatprep.subr.mxu1 %v11227_v47 }
 0x188   : > { %9569 = vmatpush3.msra.mxu0 %v11001_v13  ;;  %9559 = vmatprep.mubr.f32.mxu0 %v11053_v59  ;;  %v3397_v13 = vsel %vm264_vm0, %v8236_v0, 0  ;;  %v7438_v0 = vand.u32 4294901760, %v11306_v63 }
 0x189   : > { %9140 = vmatmul.mubr.f32.gmra.mrb[2].mxu1 %v10604_v12  ;;  %9582 = vmatprep.subr.mxu0 %v11232_v42  ;;  %v11273_v56 = vand.u32 4294901760, %v3397_v13 }
 0x18a   : > { %9142 = vmatprep.mubr.f32.mxu1 %v10627_v62  ;;  %v7439_v49 = vsub.f32 %v11306_v63, %v7438_v0 }
 0x18b   : > { %9560 = vmatmul.mubr.f32.gmra.mrb[2].mxu0 %v11067_v9  ;;  %v11296_v27 = vsub.f32 %v3397_v13, %v11273_v56  ;;  %v3415_v13 = vsel %vm264_vm0, %v8242_v36, 0 }
 0x18c   : > { %9562 = vmatprep.mubr.f32.mxu0 %v11074_v30  ;;  %v11372_v43 = vand.u32 4294901760, %v3415_v13 }
 0x18d   : > { %9143 = vmatmul.mubr.f32.gmra.mrb[4].mxu1 %v10634_v7 }
 0x18e   : > { %9145 = vmatprep.mubr.f32.mxu1 %v10657_v60 }
 0x18f   : > { %9563 = vmatmul.mubr.f32.gmra.mrb[4].mxu0 %v11089_v24 }
 0x190   : > { %9565 = vmatprep.mubr.f32.mxu0 %v11096_v44 }
 0x191   : > { %9146 = vmatmul.mubr.f32.gmra.mrb[6].mxu1 %v10666_v54 }
 0x192   : > { %9150 = vmatprep.mubr.f32.mxu1 %v10586_v58  ;;  %v3409_v58 = vsel %vm264_vm0, %v8240_v45, 0  ;;  %v11663_v45 = vand.u32 4294901760, %v11341_v3 }
 0x193   : > { %9566 = vmatmul.mubr.f32.gmra.mrb[6].mxu0 %v11109_v5 }
 0x194   : > { %9570 = vmatprep.mubr.f32.mxu0 %v11035_v6  ;;  %v3488_v6 = vand.u32 4294901760, %v11296_v27 }
 0x195   : > { %9151 = vmatmul.mubr.f32.vlgmr.msra.gmra.mrb[0].mxu1 %v10579_v26  ;;  %v11333_v26 = vand.u32 4294901760, %v3409_v58 }
 0x196   : > { %9163 = vmatpush3.msra.mxu1 %v11227_v47  ;;  %9153 = vmatprep.mubr.f32.mxu1 %v10601_v53  ;;  %v11343_v53 = vand.u32 4294901760, %v7352_v40  ;;  %v3489_v46 = vsub.f32 %v11296_v27, %v3488_v6 }
 0x197   : > { %9571 = vmatmul.mubr.f32.vlgmr.msra.gmra.mrb[0].mxu0 %v11050_v17  ;;  %9176 = vmatprep.subr.mxu1 %v11303_v55  ;;  %v11351_v17 = vand.u32 4294901760, %v7355_v57  ;;  %v11370_v15 = vsub.f32 %v3409_v58, %v11333_v26  ;;  %v11665_v58 = vand.u32 4294901760, %v11358_v19 }
 0x198   : > { %9583 = vmatpush3.msra.mxu0 %v11232_v42  ;;  %9573 = vmatprep.mubr.f32.mxu0 %v11053_v59  ;;  %v7361_v59 = vsel %vm7341_vm2, %v7338_v37, 0  ;;  %v7440_v37 = vand.u32 4294901760, %v7439_v49 }
 0x199   : > { %9154 = vmatmul.mubr.f32.gmra.mrb[2].mxu1 %v10604_v12  ;;  %9596 = vmatprep.subr.mxu0 %v11318_v14  ;;  %v3508_v12 = vand.u32 4294901760, %v11331_v48  ;;  %v11387_v10 = vsub.f32 %v7355_v57, %v11351_v17  ;;  %v11389_v33 = vand.u32 4294901760, %v7361_v59  ;;  %v11666_v36 = vand.u32 4294901760, %v11370_v15 }
 0x19a   : > { %9156 = vmatprep.mubr.f32.mxu1 %v10627_v62  ;;  %v11380_v62 = vsub.f32 %v7352_v40, %v11343_v53  ;;  %v7449_v57 = vsub.f32 %v11341_v3, %v11663_v45  ;;  %v3538_v45 = vand.u32 4294901760, %v11398_v61 }
 0x19b   : > { %9574 = vmatmul.mubr.f32.gmra.mrb[2].mxu0 %v11067_v9  ;;  %v7364_v9 = vsel %vm7341_vm2, %v7339_v4, 0  ;;  %v3509_v40 = vsub.f32 %v11331_v48, %v3508_v12  ;;  %v11424_v4 = vsub.f32 %v7361_v59, %v11389_v33  ;;  %v3529_v49 = vsub.f32 %v11370_v15, %v11666_v36 }
 0x19c   : > { %9576 = vmatprep.mubr.f32.mxu0 %v11074_v30  ;;  %v3490_v30 = vand.u32 4294901760, %v3489_v46  ;;  %v11667_v18 = vand.u32 4294901760, %v11380_v62  ;;  %v11416_v52 = vand.u32 4294901760, %v7364_v9  ;;  %v3500_v46 = vand.u32 4294901760, %v3499_v31 }
 0x19d   : > { %9157 = vmatmul.mubr.f32.gmra.mrb[4].mxu1 %v10634_v7  ;;  %v11406_v7 = vsub.f32 %v3415_v13, %v11372_v43  ;;  %v7459_v13 = vsub.f32 %v11349_v38, %v11664_v35  ;;  %v7450_v59 = vand.u32 4294901760, %v7449_v57  ;;  %v7498_v36 = vand.u32 4294901760, %v11424_v4 }
 0x19e   : > { %9159 = vmatprep.mubr.f32.mxu1 %v10657_v60  ;;  %v11414_v60 = vsub.f32 %v7358_v32, %v11382_v2  ;;  %v3519_v32 = vsub.f32 %v11358_v19, %v11665_v58  ;;  %v11441_v58 = vsub.f32 %v7364_v9, %v11416_v52  ;;  %v3539_v57 = vsub.f32 %v11398_v61, %v3538_v45 }
 0x19f   : > { %9577 = vmatmul.mubr.f32.gmra.mrb[4].mxu0 %v11089_v24  ;;  %v7478_v24 = vand.u32 4294901760, %v11387_v10  ;;  %v3548_v35 = vand.u32 4294901760, %v11406_v7 }
 0x1a0   : > { %9579 = vmatprep.mubr.f32.mxu0 %v11096_v44  ;;  %v3510_v44 = vand.u32 4294901760, %v3509_v40  ;;  %v7488_v31 = vand.u32 4294901760, %v11414_v60 }
 0x1a1   : > { %9160 = vmatmul.mubr.f32.gmra.mrb[6].mxu1 %v10666_v54  ;;  %v7469_v54 = vsub.f32 %v11380_v62, %v11667_v18  ;;  %v7479_v40 = vsub.f32 %v11387_v10, %v7478_v24  ;;  %v3530_v18 = vand.u32 4294901760, %v3529_v49  ;;  %v3549_v9 = vsub.f32 %v11406_v7, %v3548_v35 }
 0x1a2   : > { %9164 = vmatprep.mubr.f32.mxu1 %v3490_v30  ;;  %v7460_v30 = vand.u32 4294901760, %v7459_v13  ;;  %v7489_v13 = vsub.f32 %v11414_v60, %v7488_v31 }
 0x1a3   : > { %9580 = vmatmul.mubr.f32.gmra.mrb[6].mxu0 %v11109_v5  ;;  %v3520_v5 = vand.u32 4294901760, %v3519_v32  ;;  %v7499_v32 = vsub.f32 %v11424_v4, %v7498_v36  ;;  %v3550_v49 = vand.u32 4294901760, %v3549_v9 }
 0x1a4   : > { %9584 = vmatprep.mubr.f32.mxu0 %v7440_v37  ;;  %v7470_v37 = vand.u32 4294901760, %v7469_v54 }
 0x1a5   : > { %9165 = vmatmul.mubr.f32.vlgmr.msra.gmra.mrb[0].mxu1 %v3500_v46  ;;  %v7508_v46 = vand.u32 4294901760, %v11441_v58 }
 0x1a6   : > { %9177 = vmatpush3.msra.mxu1 %v11303_v55  ;;  %9167 = vmatprep.mubr.f32.mxu1 %v3510_v44  ;;  %v7480_v55 = vand.u32 4294901760, %v7479_v40  ;;  %v3540_v44 = vand.u32 4294901760, %v3539_v57 }
 0x1a7   : > { %9585 = vmatmul.mubr.f32.vlgmr.msra.gmra.mrb[0].mxu0 %v7450_v59  ;;  %9190 = vmatprep.subr.mxu1 %v11246_v20  ;;  %v7490_v59 = vand.u32 4294901760, %v7489_v13  ;;  %v7509_v54 = vsub.f32 %v11441_v58, %v7508_v46 }
 0x1a8   : > { %9597 = vmatpush3.msra.mxu0 %v11318_v14  ;;  %9587 = vmatprep.mubr.f32.mxu0 %v7460_v30  ;;  %v7500_v14 = vand.u32 4294901760, %v7499_v32 }
 0x1a9   : > { %9168 = vmatmul.mubr.f32.gmra.mrb[2].mxu1 %v3520_v5  ;;  %9610 = vmatprep.subr.mxu0 %v11255_v11  ;;  %v7510_v30 = vand.u32 4294901760, %v7509_v54 }
 0x1aa   : > { %9170 = vmatprep.mubr.f32.mxu1 %v3530_v18 }
 0x1ab   : > { %9588 = vmatmul.mubr.f32.gmra.mrb[2].mxu0 %v7470_v37 }
 0x1ac   : > { %9590 = vmatprep.mubr.f32.mxu0 %v7480_v55 }
 0x1ad   : > { %9171 = vmatmul.mubr.f32.gmra.mrb[4].mxu1 %v3540_v44 }
 0x1ae   : > { %9173 = vmatprep.mubr.f32.mxu1 %v3550_v49 }
 0x1af   : > { %9591 = vmatmul.mubr.f32.gmra.mrb[4].mxu0 %v7490_v59 }
 0x1b0   : > { %9593 = vmatprep.mubr.f32.mxu0 %v7500_v14 }
 0x1b1   : > { %9174 = vmatmul.mubr.f32.gmra.mrb[6].mxu1 %v10921_v28  ;;  %v11761_v28 = vand.u32 4294901760, %v11341_v3 }
 0x1b2   : > { %9178 = vmatprep.mubr.f32.mxu1 %v11273_v56 }
 0x1b3   : > { %9594 = vmatmul.mubr.f32.gmra.mrb[6].mxu0 %v7510_v30 }
 0x1b4   : > { %9598 = vmatprep.mubr.f32.mxu0 %v11280_v23 }
 0x1b5   : > { %9179 = vmatmul.mubr.f32.vlgmr.msra.gmra.mrb[0].mxu1 %v11290_v29 }
 0x1b6   : > { %9191 = vmatpush3.msra.mxu1 %v11246_v20  ;;  %9181 = vmatprep.mubr.f32.mxu1 %v11298_v39  ;;  %v11763_v20 = vand.u32 4294901760, %v11358_v19 }
 0x1b7   : > { %9599 = vmatmul.mubr.f32.vlgmr.msra.gmra.mrb[0].mxu0 %v11308_v50  ;;  %9204 = vmatprep.subr.mxu1 %v11227_v47 }
 0x1b8   : > { %9611 = vmatpush3.msra.mxu0 %v11255_v11  ;;  %9601 = vmatprep.mubr.f32.mxu0 %v11313_v51  ;;  %v11764_v11 = vand.u32 4294901760, %v11370_v15 }
 0x1b9   : > { %9182 = vmatmul.mubr.f32.gmra.mrb[2].mxu1 %v11323_v16  ;;  %9624 = vmatprep.subr.mxu0 %v11232_v42 }
 0x1ba   : > { %9184 = vmatprep.mubr.f32.mxu1 %v11333_v26 }
 0x1bb   : > { %9602 = vmatmul.mubr.f32.gmra.mrb[2].mxu0 %v11343_v53 }
 0x1bc   : > { %9604 = vmatprep.mubr.f32.mxu0 %v11351_v17 }
 0x1bd   : > { %9185 = vmatmul.mubr.f32.gmra.mrb[4].mxu1 %v11360_v34 }
 0x1be   : > { %9187 = vmatprep.mubr.f32.mxu1 %v11372_v43 }
 0x1bf   : > { %9605 = vmatmul.mubr.f32.gmra.mrb[4].mxu0 %v11382_v2 }
 0x1c0   : > { %9607 = vmatprep.mubr.f32.mxu0 %v11389_v33 }
 0x1c1   : > { %9188 = vmatmul.mubr.f32.gmra.mrb[6].mxu1 %v10884_v8 }
 0x1c2   : > { %9192 = vmatprep.mubr.f32.mxu1 %v11296_v27 }
 0x1c3   : > { %9608 = vmatmul.mubr.f32.gmra.mrb[6].mxu0 %v11416_v52 }
 0x1c4   : > { %9612 = vmatprep.mubr.f32.mxu0 %v11306_v63 }
 0x1c5   : > { %9193 = vmatmul.mubr.f32.vlgmr.msra.gmra.mrb[0].mxu1 %v11321_v25 }
 0x1c6   : > { %9205 = vmatpush3.msra.mxu1 %v11227_v47  ;;  %9195 = vmatprep.mubr.f32.mxu1 %v11331_v48 }
 0x1c7   : > { %9613 = vmatmul.mubr.f32.vlgmr.msra.gmra.mrb[0].mxu0 %v11341_v3  ;;  %9218 = vmatprep.subr.mxu1 %v11261_v41 }
 0x1c8   : > { %9625 = vmatpush3.msra.mxu0 %v11232_v42  ;;  %9615 = vmatprep.mubr.f32.mxu0 %v11349_v38 }
 0x1c9   : > { %9196 = vmatmul.mubr.f32.gmra.mrb[2].mxu1 %v11358_v19  ;;  %9638 = vmatprep.subr.mxu0 %v11269_v21 }
 0x1ca   : > { %9198 = vmatprep.mubr.f32.mxu1 %v11370_v15 }
 0x1cb   : > { %9616 = vmatmul.mubr.f32.gmra.mrb[2].mxu0 %v11380_v62 }
 0x1cc   : > { %9618 = vmatprep.mubr.f32.mxu0 %v11387_v10 }
 0x1cd   : > { %9199 = vmatmul.mubr.f32.gmra.mrb[4].mxu1 %v11398_v61 }
 0x1ce   : > { %9201 = vmatprep.mubr.f32.mxu1 %v11406_v7 }
 0x1cf   : > { %9619 = vmatmul.mubr.f32.gmra.mrb[4].mxu0 %v11414_v60 }
 0x1d0   : > { %9621 = vmatprep.mubr.f32.mxu0 %v11424_v4 }
 0x1d1   : > { %9202 = vmatmul.mubr.f32.gmra.mrb[6].mxu1 %v10894_v22  ;;  %v11762_v22 = vand.u32 4294901760, %v11349_v38 }
 0x1d2   : > { %9206 = vmatprep.mubr.f32.mxu1 %v3488_v6 }
 0x1d3   : > { %9622 = vmatmul.mubr.f32.gmra.mrb[6].mxu0 %v11441_v58 }
 0x1d4   : > { %9626 = vmatprep.mubr.f32.mxu0 %v7438_v0 }
 0x1d5   : > { %9207 = vmatmul.mubr.f32.vlgmr.msra.gmra.mrb[0].mxu1 %v3498_v1 }
 0x1d6   : > { %9219 = vmatpush3.msra.mxu1 %v11261_v41  ;;  %9209 = vmatprep.mubr.f32.mxu1 %v3508_v12  ;;  %v11765_v41 = vand.u32 4294901760, %v11380_v62 }
 0x1d7   : > { %9627 = vmatmul.mubr.f32.vlgmr.msra.gmra.mrb[0].mxu0 %v11761_v28  ;;  %9232 = vmatprep.subr.mxu1 %v11227_v47 }
 0x1d8   : > { %9639 = vmatpush3.msra.mxu0 %v11269_v21  ;;  %9629 = vmatprep.mubr.f32.mxu0 %v11762_v22  ;;  %v11766_v21 = vld [vmem:[#allocation43_spill] sm:$0xff] }
 0x1d9   : > { %9210 = vmatmul.mubr.f32.gmra.mrb[2].mxu1 %v11763_v20  ;;  %9652 = vmatprep.subr.mxu0 %v11232_v42 }
 0x1da   : > { %9212 = vmatprep.mubr.f32.mxu1 %v11764_v11 }
 0x1db   : > { %9630 = vmatmul.mubr.f32.gmra.mrb[2].mxu0 %v11765_v41 }
 0x1dc   : > { %9632 = vmatprep.mubr.f32.mxu0 %v7478_v24 }
 0x1dd   : > { %9213 = vmatmul.mubr.f32.gmra.mrb[4].mxu1 %v3538_v45 }
 0x1de   : > { %9215 = vmatprep.mubr.f32.mxu1 %v3548_v35 }
 0x1df   : > { %9633 = vmatmul.mubr.f32.gmra.mrb[4].mxu0 %v7488_v31 }
 0x1e0   : > { %9635 = vmatprep.mubr.f32.mxu0 %v7498_v36 }
 0x1e1   : > { %9216 = vmatmul.mubr.f32.gmra.mrb[6].mxu1 %v11766_v21 }
 0x1e2   : > { %9220 = vmatprep.mubr.f32.mxu1 %v11273_v56 }
 0x1e3   : > { %9636 = vmatmul.mubr.f32.gmra.mrb[6].mxu0 %v7508_v46 }
 0x1e4   : > { %9640 = vmatprep.mubr.f32.mxu0 %v11280_v23 }
 0x1e5   : > { %9221 = vmatmul.mubr.f32.vlgmr.msra.gmra.mrb[0].mxu1 %v11290_v29 }
 0x1e6   : > { %9233 = vmatpush3.msra.mxu1 %v11227_v47  ;;  %9223 = vmatprep.mubr.f32.mxu1 %v11298_v39 }
 0x1e7   : > { %9641 = vmatmul.mubr.f32.vlgmr.msra.gmra.mrb[0].mxu0 %v11308_v50 }
 0x1e8   : > { %9653 = vmatpush3.msra.mxu0 %v11232_v42  ;;  %9643 = vmatprep.mubr.f32.mxu0 %v11313_v51 }
 0x1e9   : > { %9224 = vmatmul.mubr.f32.gmra.mrb[2].mxu1 %v11323_v16 }
 0x1ea   : > { %9226 = vmatprep.mubr.f32.mxu1 %v11333_v26 }
 0x1eb   : > { %9644 = vmatmul.mubr.f32.gmra.mrb[2].mxu0 %v11343_v53 }
 0x1ec   : > { %9646 = vmatprep.mubr.f32.mxu0 %v11351_v17 }
 0x1ed   : > { %9227 = vmatmul.mubr.f32.gmra.mrb[4].mxu1 %v11360_v34 }
 0x1ee   : > { %9229 = vmatprep.mubr.f32.mxu1 %v11372_v43 }
 0x1ef   : > { %9647 = vmatmul.mubr.f32.gmra.mrb[4].mxu0 %v11382_v2 }
 0x1f0   : > { %9649 = vmatprep.mubr.f32.mxu0 %v11389_v33 }
 0x1f1   : > { %9230 = vmatmul.mubr.f32.gmra.mrb[6].mxu1 %v10884_v8 }
 0x1f2   : > { %9234 = vmatprep.mubr.f32.mxu1 %v11273_v56 }
 0x1f3   : > { %9650 = vmatmul.mubr.f32.gmra.mrb[6].mxu0 %v11416_v52 }
 0x1f4   : > { %9654 = vmatprep.mubr.f32.mxu0 %v11280_v23  ;;  %v8281_v23 = vld [vmem:[%s11610_s4] ss:$0 sm:$0xff] }
 0x1f5   : > { %9235 = vmatmul.mubr.f32.vlgmr.msra.gmra.mrb[0].mxu1 %v11290_v29 }
 0x1f6   : > { %9237 = vmatprep.mubr.f32.mxu1 %v11298_v39 }
 0x1f7   : > { %9655 = vmatmul.mubr.f32.vlgmr.msra.gmra.mrb[0].mxu0 %v11308_v50 }
 0x1f8   : > { %9657 = vmatprep.mubr.f32.mxu0 %v11313_v51 }
 0x1f9   : > { %9238 = vmatmul.mubr.f32.gmra.mrb[2].mxu1 %v11323_v16 }
 0x1fa   : > { %9240 = vmatprep.mubr.f32.mxu1 %v11333_v26 }
 0x1fb   : > { %9658 = vmatmul.mubr.f32.gmra.mrb[2].mxu0 %v11343_v53 }
 0x1fc   : > { %9660 = vmatprep.mubr.f32.mxu0 %v11351_v17 }
 0x1fd   : > { %9241 = vmatmul.mubr.f32.gmra.mrb[4].mxu1 %v11360_v34 }
 0x1fe   : > { %9243 = vmatprep.mubr.f32.mxu1 %v11372_v43 }
 0x1ff   : > { %9661 = vmatmul.mubr.f32.gmra.mrb[4].mxu0 %v11382_v2 }
 0x200   : > { %9663 = vmatprep.mubr.f32.mxu0 %v11389_v33 }
 0x201   : > { %9244 = vmatmul.mubr.f32.gmra.mrb[6].mxu1 %v10884_v8 }
 0x203   : > { %9664 = vmatmul.mubr.f32.gmra.mrb[6].mxu0 %v11416_v52 }
 0x2c8   : > { %v9236_v47 = vpop.f32.mrb[0].mxu1 }
 0x2c9   : > { %v4121_v42 = vpop.f32.mrb[1].mxu1 }
 0x2ca   : > { %v9656_v56 = vpop.f32.mrb[0].mxu0 }
 0x2cb   : > { %v9666_v29 = vadd.f32 %v9656_v56, %v9236_v47  ;;  %v8071_v27 = vpop.f32.mrb[1].mxu0 }
 0x2cc   : > { %v9667_v8 = vadd.f32 %v8071_v27, %v4121_v42  ;;  %v9239_v39 = vpop.f32.mrb[2].mxu1 }
 0x2cd   : > { %v8133_v63 = vadd.f32 %v9666_v29, %v8281_v23  ;;  %v4133_v50 = vpop.f32.mrb[3].mxu1 }
 0x2ce   : > { %v8132_v51 = vadd.f32 %v9667_v8, %v8281_v23  ;;  %v9659_v25 = vpop.f32.mrb[2].mxu0 }
 0x2cf   : > { %8141 = vst.msk [vmem:[%s11585_s29 + $0x8] sm:$0xff] %vm264_vm0, %v8133_v63  ;;  %v9668_v16 = vadd.f32 %v9659_v25, %v9239_v39  ;;  %v8083_v6 = vpop.f32.mrb[3].mxu0 }
 0x2d0   : > { %8140 = vst.msk [vmem:[%s11585_s29] sm:$0xff] %vm264_vm0, %v8132_v51  ;;  %v9669_v48 = vadd.f32 %v8083_v6, %v4133_v50  ;;  %v9242_v26 = vpop.f32.mrb[4].mxu1 }
 0x2d1   : > { %v8135_v0 = vadd.f32 %v9668_v16, %v8281_v23  ;;  %v4145_v3 = vpop.f32.mrb[5].mxu1 }
 0x2d2   : > { %v8134_v53 = vadd.f32 %v9669_v48, %v8281_v23  ;;  %v9662_v38 = vpop.f32.mrb[4].mxu0 }
 0x2d3   : > { %8143 = vst.msk [vmem:[%s11585_s29 + $0x18] sm:$0xff] %vm264_vm0, %v8135_v0  ;;  %v9670_v17 = vadd.f32 %v9662_v38, %v9242_v26  ;;  %v8095_v1 = vpop.f32.mrb[5].mxu0 }
 0x2d4   : > { %8142 = vst.msk [vmem:[%s11585_s29 + $0x10] sm:$0xff] %vm264_vm0, %v8134_v53  ;;  %v9671_v19 = vadd.f32 %v8095_v1, %v4145_v3  ;;  %v9245_v34 = vpop.f32.mrb[6].mxu1 }
 0x2d5   : > { %v8137_v12 = vadd.f32 %v9670_v17, %v8281_v23  ;;  %v4157_v15 = vpop.f32.mrb[7].mxu1 }
 0x2d6   : > { %v8136_v43 = vadd.f32 %v9671_v19, %v8281_v23  ;;  %v9665_v45 = vpop.f32.mrb[6].mxu0 }
 0x2d7   : > { %8145 = vst.msk [vmem:[%s11585_s29 + $0x28] sm:$0xff] %vm264_vm0, %v8137_v12  ;;  %v9672_v62 = vadd.f32 %v9665_v45, %v9245_v34  ;;  %v8107_v2 = vpop.f32.mrb[7].mxu0 }
 0x2d8   : > { %8144 = vst.msk [vmem:[%s11585_s29 + $0x20] sm:$0xff] %vm264_vm0, %v8136_v43  ;;  %v9673_v35 = vadd.f32 %v8107_v2, %v4157_v15 }
 0x2d9   : > { %v8139_v10 = vadd.f32 %v9672_v62, %v8281_v23 }
 0x2da   : > { %v8138_v33 = vadd.f32 %v9673_v35, %v8281_v23 }
 0x2db   : > { %8147 = vst.msk [vmem:[%s11585_s29 + $0x38] sm:$0xff] %vm264_vm0, %v8139_v10 }
 0x2dc   : > { %8146 = vst.msk [vmem:[%s11585_s29 + $0x30] sm:$0xff] %vm264_vm0, %v8138_v33 }
 0x2dd PF: > { %s15_s18 = sadd.s32 1, %s10153_s18  }
 0x2de   : > { %p12_p4 = scmp.ge.s32.totalorder %s15_s18, 4  }
 0x2e0   :  { %14 = sbr.rel (!%p12_p4) target bundleno = 1 (0x1), region = 83 }

</bundles_post_ra>
